<compile_context>
chip_gen: v7x
topology: tpu7x:2x2x1
jax: 0.10.0
libtpu: 0.0.40
codegen_flags: <defaults>
</compile_context>

<pallas_src>
import jax
import jax.numpy as jnp
from jax.experimental import pallas as pl
from jax.experimental.pallas import tpu as pltpu

N_CLASSES = 10
D_IN = 784
H1, H2 = 364, 52
LANE = 128


def _round_up(a, m):
    return (a + m - 1) // m * m


H1P = _round_up(H1, LANE)   # 384
H2P = _round_up(H2, LANE)   # 128


def flatnet_kernel(x_ref, w1_ref, b1_ref, w2_ref, b2_ref, w3_ref, b3_ref, o_ref):
    """Fused MLP tile: fc1 -> relu -> fc2 -> relu -> fc3 (logits, bf16 out)."""
    x = x_ref[...].astype(jnp.bfloat16)                               # (TILE_N, 784)

    h1 = jnp.dot(x, w1_ref[...], preferred_element_type=jnp.float32) + b1_ref[...]
    h1 = jnp.maximum(h1, 0.0).astype(jnp.bfloat16)                    # (TILE_N, 384)

    h2 = jnp.dot(h1, w2_ref[...], preferred_element_type=jnp.float32) + b2_ref[...]
    h2 = jnp.maximum(h2, 0.0).astype(jnp.bfloat16)                    # (TILE_N, 128)

    logits = jnp.dot(h2, w3_ref[...],
                     preferred_element_type=jnp.float32) + b3_ref[...]
    o_ref[...] = logits.astype(o_ref.dtype)                           # bf16 writeback


def init_torch_params(key, n_classes=N_CLASSES):
    """PyTorch-layout params: nn.Linear weight (out, in), bias (out,)."""
    dims = [(D_IN, H1), (H1, H2), (H2, n_classes)]
    keys = jax.random.split(key, 6)
    p = {}
    for i, (din, dout) in enumerate(dims, start=1):
        bound = 1.0 / (din ** 0.5)                      # PyTorch default init
        p[f"w{i}"] = jax.random.uniform(keys[2 * i - 2], (dout, din),
                                        jnp.float32, -bound, bound)
        p[f"b{i}"] = jax.random.uniform(keys[2 * i - 1], (dout,),
                                        jnp.float32, -bound, bound)
    return p


def prep_params(p, n_classes=N_CLASSES):
    """Transpose to (in, out), zero-pad feature dims to 128 multiples, cast weights to bf16."""
    out_p = _round_up(n_classes, LANE)

    def pad_w(w_t, rows, cols):                         # w_t: (in, out) f32
        return (jnp.zeros((rows, cols), jnp.float32)
                .at[:w_t.shape[0], :w_t.shape[1]].set(w_t)).astype(jnp.bfloat16)

    def pad_b(b, cols):
        return jnp.zeros((1, cols), jnp.float32).at[0, :b.shape[0]].set(b)

    return dict(
        w1=pad_w(p["w1"].T, D_IN, H1P), b1=pad_b(p["b1"], H1P),
        w2=pad_w(p["w2"].T, H1P, H2P),  b2=pad_b(p["b2"], H2P),
        w3=pad_w(p["w3"].T, H2P, out_p), b3=pad_b(p["b3"], out_p),
    )


def _pallas_forward(x2d, kp, *, tile_n, out_p, single_buffer_weights):
    """Batch-tiled fused MLP via pallas_call. x2d: (n, 784) f32."""
    n = x2d.shape[0]

    def resident(shape):
        # Grid-invariant arrays: fetched once into VMEM.
        if single_buffer_weights:
            return pl.BlockSpec(shape, lambda i: (0, 0),
                                pipeline_mode=pl.Buffered(1))
        return pl.BlockSpec(shape, lambda i: (0, 0))

    flops = 2 * n * (D_IN * H1P + H1P * H2P + H2P * out_p)
    bytes_accessed = (n * (D_IN * 4 + out_p * 2)                 # x f32 in, logits bf16 out
                      + 2 * (D_IN * H1P + H1P * H2P + H2P * out_p)  # bf16 weights
                      + 4 * (H1P + H2P + out_p))                 # f32 biases

    return pl.pallas_call(
        flatnet_kernel,
        out_shape=jax.ShapeDtypeStruct((n, out_p), jnp.bfloat16),
        grid=(pl.cdiv(n, tile_n),),
        in_specs=[
            pl.BlockSpec((tile_n, D_IN), lambda i: (i, 0)),       # x tile (f32, pipelined)
            resident((D_IN, H1P)), resident((1, H1P)),            # fc1
            resident((H1P, H2P)),  resident((1, H2P)),            # fc2
            resident((H2P, out_p)), resident((1, out_p)),         # fc3
        ],
        out_specs=pl.BlockSpec((tile_n, out_p), lambda i: (i, 0)),
        compiler_params=pltpu.CompilerParams(
            dimension_semantics=("parallel",),
            vmem_limit_bytes=64 * 1024 * 1024,
        ),
        cost_estimate=pl.CostEstimate(
            flops=flops, transcendentals=0, bytes_accessed=bytes_accessed),
    )(x2d, kp["w1"], kp["b1"], kp["w2"], kp["b2"], kp["w3"], kp["b3"])


def flatnet_forward(x, kp, *, n_classes=N_CLASSES, tile_n_max=2048,
                    min_pallas_batch=128):
    """x: (N, 1, 28, 28) NCHW (or anything flattening to 784); returns (N, n_classes) f32."""
    n = x.shape[0]
    x2d = x.reshape(n, -1).astype(jnp.float32)          # == x.view(N, -1)
    assert x2d.shape[1] == D_IN
    out_p = _round_up(n_classes, LANE)

    if n <= min_pallas_batch:
        # Tiny batch: one short grid step is pure launch/DMA latency; a plain
        # fused XLA dot chain wins.  Uses the same padded bf16 weights.
        h = jnp.maximum(x2d @ kp["w1"].astype(jnp.float32) + kp["b1"], 0.0)
        h = jnp.maximum(h @ kp["w2"].astype(jnp.float32) + kp["b2"], 0.0)
        logits = h @ kp["w3"].astype(jnp.float32) + kp["b3"]
        return logits[:, :n_classes]

    # Tile big enough to amortize the ~0.35 us/step pipeline overhead but
    # capped so (a) the grid has >= 2 steps (v7x has 2 TensorCores) and
    # (b) the double-buffered f32 x tile + f32 intermediates stay well inside
    # VMEM on v7x's 64 MiB (~20-25 MB working set at tile 2048).
    tile_n = max(16, min(tile_n_max, _round_up(pl.cdiv(n, 2), 16)))

    try:
        out = _pallas_forward(x2d, kp, tile_n=tile_n, out_p=out_p,
                              single_buffer_weights=True)
    except Exception:
        # Fallback if this JAX build rejects pipeline_mode=pl.Buffered(1).
        out = _pallas_forward(x2d, kp, tile_n=tile_n, out_p=out_p,
                              single_buffer_weights=False)

    return out[:, :n_classes].astype(jnp.float32)


def flatnet_ref(x, p):
    """Plain-JAX f32 reference matching the PyTorch forward."""
    n = x.shape[0]
    h = x.reshape(n, -1).astype(jnp.float32)
    h = jnp.maximum(h @ p["w1"].T + p["b1"], 0.0)
    h = jnp.maximum(h @ p["w2"].T + p["b2"], 0.0)
    return h @ p["w3"].T + p["b3"]


if __name__ == "__main__":
    key = jax.random.PRNGKey(0)
    k_x, k_p = jax.random.split(key)

    torch_params = init_torch_params(k_p)
    kernel_params = prep_params(torch_params)

    # Batch large enough to exercise the Pallas path (>= 2 grid steps).
    batch = 256
    x = jax.random.normal(k_x, (batch, 1, 28, 28), jnp.float32)  # NCHW -> 784 features

    out = flatnet_forward(x, kernel_params)
    jax.block_until_ready(out)
    assert out.shape == (batch, N_CLASSES) and out.dtype == jnp.float32

    ref = flatnet_ref(x, torch_params)
    err = float(jnp.max(jnp.abs(out - ref)))
    assert err < 0.15, f"mismatch vs f32 reference: max abs err = {err}"

    # Small-batch fallback path (plain jnp) also matches.
    out_small = flatnet_forward(x[:8], kernel_params)
    jax.block_until_ready(out_small)
    assert out_small.shape == (8, N_CLASSES)
    err_small = float(jnp.max(jnp.abs(out_small - ref[:8])))
    assert err_small < 0.15, f"small-batch mismatch: max abs err = {err_small}"

    print("KERNEL_OK")
</pallas_src>

<mosaic_0001>
module attributes {stable_mosaic.version = 11 : i64} {
  func.func @flatnet_kernel(%arg0: i32, %arg1: memref<128x784xf32, #tpu.memory_space<vmem>>, %arg2: memref<784x384xbf16, #tpu.memory_space<vmem>>, %arg3: memref<1x384xf32, #tpu.memory_space<vmem>>, %arg4: memref<384x128xbf16, #tpu.memory_space<vmem>>, %arg5: memref<1x128xf32, #tpu.memory_space<vmem>>, %arg6: memref<128x128xbf16, #tpu.memory_space<vmem>>, %arg7: memref<1x128xf32, #tpu.memory_space<vmem>>, %arg8: memref<128x128xbf16, #tpu.memory_space<vmem>>) attributes {dimension_semantics = [#tpu.dimension_semantics<parallel>], iteration_bounds = array<i64: 2>, scalar_prefetch = 0 : i64, scratch_operands = 0 : i64, tpu.core_type = #tpu.core_type<tc>, window_params = [{transform_indices = @transform_0, window_bounds = array<i64: 128, 784>}, {pipeline_mode = #tpu.pipeline_mode<synchronous>, transform_indices = @transform_1, window_bounds = array<i64: 784, 384>}, {pipeline_mode = #tpu.pipeline_mode<synchronous>, transform_indices = @transform_2, window_bounds = array<i64: 1, 384>}, {pipeline_mode = #tpu.pipeline_mode<synchronous>, transform_indices = @transform_3, window_bounds = array<i64: 384, 128>}, {pipeline_mode = #tpu.pipeline_mode<synchronous>, transform_indices = @transform_4, window_bounds = array<i64: 1, 128>}, {pipeline_mode = #tpu.pipeline_mode<synchronous>, transform_indices = @transform_5, window_bounds = array<i64: 128, 128>}, {pipeline_mode = #tpu.pipeline_mode<synchronous>, transform_indices = @transform_6, window_bounds = array<i64: 1, 128>}, {transform_indices = @transform_7, window_bounds = array<i64: 128, 128>}]} {
    %c0 = arith.constant 0 : index
    %c0_0 = arith.constant 0 : index
    %0 = vector.load %arg1[%c0, %c0_0] : memref<128x784xf32, #tpu.memory_space<vmem>>, vector<128x784xf32>
    %1 = arith.truncf %0 : vector<128x784xf32> to vector<128x784xbf16>
    %c0_1 = arith.constant 0 : index
    %c0_2 = arith.constant 0 : index
    %2 = vector.load %arg2[%c0_1, %c0_2] : memref<784x384xbf16, #tpu.memory_space<vmem>>, vector<784x384xbf16>
    %cst = arith.constant dense<0.000000e+00> : vector<128x384xf32>
    %3 = tpu.matmul %1, %2, %cst {dimension_numbers = #tpu.dot_dimension_numbers<[1], [0], [0], [1], [0, 0, 1, 1], [], []>} : vector<128x784xbf16>, vector<784x384xbf16>, vector<128x384xf32> -> vector<128x384xf32>
    %c0_3 = arith.constant 0 : index
    %c0_4 = arith.constant 0 : index
    %4 = vector.load %arg3[%c0_3, %c0_4] : memref<1x384xf32, #tpu.memory_space<vmem>>, vector<1x384xf32>
    %5 = vector.broadcast %4 : vector<1x384xf32> to vector<128x384xf32>
    %6 = arith.addf %3, %5 : vector<128x384xf32>
    %cst_5 = arith.constant 0.000000e+00 : f32
    %7 = vector.broadcast %cst_5 : f32 to vector<128x384xf32>
    %8 = arith.maximumf %6, %7 : vector<128x384xf32>
    %9 = arith.truncf %8 : vector<128x384xf32> to vector<128x384xbf16>
    %c0_6 = arith.constant 0 : index
    %c0_7 = arith.constant 0 : index
    %10 = vector.load %arg4[%c0_6, %c0_7] : memref<384x128xbf16, #tpu.memory_space<vmem>>, vector<384x128xbf16>
    %cst_8 = arith.constant dense<0.000000e+00> : vector<128x128xf32>
    %11 = tpu.matmul %9, %10, %cst_8 {dimension_numbers = #tpu.dot_dimension_numbers<[1], [0], [0], [1], [0, 0, 1, 1], [], []>} : vector<128x384xbf16>, vector<384x128xbf16>, vector<128x128xf32> -> vector<128x128xf32>
    %c0_9 = arith.constant 0 : index
    %c0_10 = arith.constant 0 : index
    %12 = vector.load %arg5[%c0_9, %c0_10] : memref<1x128xf32, #tpu.memory_space<vmem>>, vector<1x128xf32>
    %13 = vector.broadcast %12 : vector<1x128xf32> to vector<128x128xf32>
    %14 = arith.addf %11, %13 : vector<128x128xf32>
    %cst_11 = arith.constant 0.000000e+00 : f32
    %15 = vector.broadcast %cst_11 : f32 to vector<128x128xf32>
    %16 = arith.maximumf %14, %15 : vector<128x128xf32>
    %17 = arith.truncf %16 : vector<128x128xf32> to vector<128x128xbf16>
    %c0_12 = arith.constant 0 : index
    %c0_13 = arith.constant 0 : index
    %18 = vector.load %arg6[%c0_12, %c0_13] : memref<128x128xbf16, #tpu.memory_space<vmem>>, vector<128x128xbf16>
    %cst_14 = arith.constant dense<0.000000e+00> : vector<128x128xf32>
    %19 = tpu.matmul %17, %18, %cst_14 {dimension_numbers = #tpu.dot_dimension_numbers<[1], [0], [0], [1], [0, 0, 1, 1], [], []>} : vector<128x128xbf16>, vector<128x128xbf16>, vector<128x128xf32> -> vector<128x128xf32>
    %c0_15 = arith.constant 0 : index
    %c0_16 = arith.constant 0 : index
    %20 = vector.load %arg7[%c0_15, %c0_16] : memref<1x128xf32, #tpu.memory_space<vmem>>, vector<1x128xf32>
    %21 = vector.broadcast %20 : vector<1x128xf32> to vector<128x128xf32>
    %22 = arith.addf %19, %21 : vector<128x128xf32>
    %23 = arith.truncf %22 : vector<128x128xf32> to vector<128x128xbf16>
    %c0_17 = arith.constant 0 : index
    %c0_18 = arith.constant 0 : index
    %24 = vector.load %arg8[%c0_17, %c0_18] : memref<128x128xbf16, #tpu.memory_space<vmem>>, vector<128x128xbf16>
    tpu.vector_store %arg8[%c0_17, %c0_18], %23 {strides = array<i32>} : memref<128x128xbf16, #tpu.memory_space<vmem>>, vector<128x128xbf16>,
    return
  }
  func.func @transform_0(%arg0: i32) -> (i32, i32) {
    %c0_i32 = arith.constant 0 : i32
    %c0_i32_0 = arith.constant 0 : i32
    return %arg0, %c0_i32 : i32, i32
  }
  func.func @transform_1(%arg0: i32) -> (i32, i32) {
    %c0_i32 = arith.constant 0 : i32
    %c0_i32_0 = arith.constant 0 : i32
    %c0_i32_1 = arith.constant 0 : i32
    return %c0_i32, %c0_i32_0 : i32, i32
  }
  func.func @transform_2(%arg0: i32) -> (i32, i32) {
    %c0_i32 = arith.constant 0 : i32
    %c0_i32_0 = arith.constant 0 : i32
    %c0_i32_1 = arith.constant 0 : i32
    return %c0_i32, %c0_i32_0 : i32, i32
  }
  func.func @transform_3(%arg0: i32) -> (i32, i32) {
    %c0_i32 = arith.constant 0 : i32
    %c0_i32_0 = arith.constant 0 : i32
    %c0_i32_1 = arith.constant 0 : i32
    return %c0_i32, %c0_i32_0 : i32, i32
  }
  func.func @transform_4(%arg0: i32) -> (i32, i32) {
    %c0_i32 = arith.constant 0 : i32
    %c0_i32_0 = arith.constant 0 : i32
    %c0_i32_1 = arith.constant 0 : i32
    return %c0_i32, %c0_i32_0 : i32, i32
  }
  func.func @transform_5(%arg0: i32) -> (i32, i32) {
    %c0_i32 = arith.constant 0 : i32
    %c0_i32_0 = arith.constant 0 : i32
    %c0_i32_1 = arith.constant 0 : i32
    return %c0_i32, %c0_i32_0 : i32, i32
  }
  func.func @transform_6(%arg0: i32) -> (i32, i32) {
    %c0_i32 = arith.constant 0 : i32
    %c0_i32_0 = arith.constant 0 : i32
    %c0_i32_1 = arith.constant 0 : i32
    return %c0_i32, %c0_i32_0 : i32, i32
  }
  func.func @transform_7(%arg0: i32) -> (i32, i32) {
    %c0_i32 = arith.constant 0 : i32
    %c0_i32_0 = arith.constant 0 : i32
    return %arg0, %c0_i32 : i32, i32
  }
}

module attributes {stable_mosaic.version = 11 : i64} {
  func.func @flatnet_kernel(%arg0: i32, %arg1: memref<128x784xf32, #tpu.memory_space<vmem>>, %arg2: memref<784x384xbf16, #tpu.memory_space<vmem>>, %arg3: memref<1x384xf32, #tpu.memory_space<vmem>>, %arg4: memref<384x128xbf16, #tpu.memory_space<vmem>>, %arg5: memref<1x128xf32, #tpu.memory_space<vmem>>, %arg6: memref<128x128xbf16, #tpu.memory_space<vmem>>, %arg7: memref<1x128xf32, #tpu.memory_space<vmem>>, %arg8: memref<128x128xbf16, #tpu.memory_space<vmem>>) attributes {dimension_semantics = [#tpu.dimension_semantics<parallel>], iteration_bounds = array<i64: 2>, scalar_prefetch = 0 : i64, scratch_operands = 0 : i64, tpu.core_type = #tpu.core_type<tc>, window_params = [{transform_indices = @transform_0, window_bounds = array<i64: 128, 784>}, {pipeline_mode = #tpu.pipeline_mode<synchronous>, transform_indices = @transform_1, window_bounds = array<i64: 784, 384>}, {pipeline_mode = #tpu.pipeline_mode<synchronous>, transform_indices = @transform_2, window_bounds = array<i64: 1, 384>}, {pipeline_mode = #tpu.pipeline_mode<synchronous>, transform_indices = @transform_3, window_bounds = array<i64: 384, 128>}, {pipeline_mode = #tpu.pipeline_mode<synchronous>, transform_indices = @transform_4, window_bounds = array<i64: 1, 128>}, {pipeline_mode = #tpu.pipeline_mode<synchronous>, transform_indices = @transform_5, window_bounds = array<i64: 128, 128>}, {pipeline_mode = #tpu.pipeline_mode<synchronous>, transform_indices = @transform_6, window_bounds = array<i64: 1, 128>}, {transform_indices = @transform_7, window_bounds = array<i64: 128, 128>}]} {
    %c0 = arith.constant 0 : index
    %c0_0 = arith.constant 0 : index
    %0 = vector.load %arg1[%c0, %c0_0] : memref<128x784xf32, #tpu.memory_space<vmem>>, vector<128x784xf32>
    %1 = arith.truncf %0 : vector<128x784xf32> to vector<128x784xbf16>
    %c0_1 = arith.constant 0 : index
    %c0_2 = arith.constant 0 : index
    %2 = vector.load %arg2[%c0_1, %c0_2] : memref<784x384xbf16, #tpu.memory_space<vmem>>, vector<784x384xbf16>
    %cst = arith.constant dense<0.000000e+00> : vector<128x384xf32>
    %3 = tpu.matmul %1, %2, %cst {dimension_numbers = #tpu.dot_dimension_numbers<[1], [0], [0], [1], [0, 0, 1, 1], [], []>} : vector<128x784xbf16>, vector<784x384xbf16>, vector<128x384xf32> -> vector<128x384xf32>
    %c0_3 = arith.constant 0 : index
    %c0_4 = arith.constant 0 : index
    %4 = vector.load %arg3[%c0_3, %c0_4] : memref<1x384xf32, #tpu.memory_space<vmem>>, vector<1x384xf32>
    %5 = vector.broadcast %4 : vector<1x384xf32> to vector<128x384xf32>
    %6 = arith.addf %3, %5 : vector<128x384xf32>
    %cst_5 = arith.constant 0.000000e+00 : f32
    %7 = vector.broadcast %cst_5 : f32 to vector<128x384xf32>
    %8 = arith.maximumf %6, %7 : vector<128x384xf32>
    %9 = arith.truncf %8 : vector<128x384xf32> to vector<128x384xbf16>
    %c0_6 = arith.constant 0 : index
    %c0_7 = arith.constant 0 : index
    %10 = vector.load %arg4[%c0_6, %c0_7] : memref<384x128xbf16, #tpu.memory_space<vmem>>, vector<384x128xbf16>
    %cst_8 = arith.constant dense<0.000000e+00> : vector<128x128xf32>
    %11 = tpu.matmul %9, %10, %cst_8 {dimension_numbers = #tpu.dot_dimension_numbers<[1], [0], [0], [1], [0, 0, 1, 1], [], []>} : vector<128x384xbf16>, vector<384x128xbf16>, vector<128x128xf32> -> vector<128x128xf32>
    %c0_9 = arith.constant 0 : index
    %c0_10 = arith.constant 0 : index
    %12 = vector.load %arg5[%c0_9, %c0_10] : memref<1x128xf32, #tpu.memory_space<vmem>>, vector<1x128xf32>
    %13 = vector.broadcast %12 : vector<1x128xf32> to vector<128x128xf32>
    %14 = arith.addf %11, %13 : vector<128x128xf32>
    %cst_11 = arith.constant 0.000000e+00 : f32
    %15 = vector.broadcast %cst_11 : f32 to vector<128x128xf32>
    %16 = arith.maximumf %14, %15 : vector<128x128xf32>
    %17 = arith.truncf %16 : vector<128x128xf32> to vector<128x128xbf16>
    %c0_12 = arith.constant 0 : index
    %c0_13 = arith.constant 0 : index
    %18 = vector.load %arg6[%c0_12, %c0_13] : memref<128x128xbf16, #tpu.memory_space<vmem>>, vector<128x128xbf16>
    %cst_14 = arith.constant dense<0.000000e+00> : vector<128x128xf32>
    %19 = tpu.matmul %17, %18, %cst_14 {dimension_numbers = #tpu.dot_dimension_numbers<[1], [0], [0], [1], [0, 0, 1, 1], [], []>} : vector<128x128xbf16>, vector<128x128xbf16>, vector<128x128xf32> -> vector<128x128xf32>
    %c0_15 = arith.constant 0 : index
    %c0_16 = arith.constant 0 : index
    %20 = vector.load %arg7[%c0_15, %c0_16] : memref<1x128xf32, #tpu.memory_space<vmem>>, vector<1x128xf32>
    %21 = vector.broadcast %20 : vector<1x128xf32> to vector<128x128xf32>
    %22 = arith.addf %19, %21 : vector<128x128xf32>
    %23 = arith.truncf %22 : vector<128x128xf32> to vector<128x128xbf16>
    %c0_17 = arith.constant 0 : index
    %c0_18 = arith.constant 0 : index
    %24 = vector.load %arg8[%c0_17, %c0_18] : memref<128x128xbf16, #tpu.memory_space<vmem>>, vector<128x128xbf16>
    tpu.vector_store %arg8[%c0_17, %c0_18], %23 {strides = array<i32>} : memref<128x128xbf16, #tpu.memory_space<vmem>>, vector<128x128xbf16>,
    return
  }
  func.func @transform_0(%arg0: i32) -> (i32, i32) {
    %c0_i32 = arith.constant 0 : i32
    %c0_i32_0 = arith.constant 0 : i32
    return %arg0, %c0_i32 : i32, i32
  }
  func.func @transform_1(%arg0: i32) -> (i32, i32) {
    %c0_i32 = arith.constant 0 : i32
    %c0_i32_0 = arith.constant 0 : i32
    %c0_i32_1 = arith.constant 0 : i32
    return %c0_i32, %c0_i32_0 : i32, i32
  }
  func.func @transform_2(%arg0: i32) -> (i32, i32) {
    %c0_i32 = arith.constant 0 : i32
    %c0_i32_0 = arith.constant 0 : i32
    %c0_i32_1 = arith.constant 0 : i32
    return %c0_i32, %c0_i32_0 : i32, i32
  }
  func.func @transform_3(%arg0: i32) -> (i32, i32) {
    %c0_i32 = arith.constant 0 : i32
    %c0_i32_0 = arith.constant 0 : i32
    %c0_i32_1 = arith.constant 0 : i32
    return %c0_i32, %c0_i32_0 : i32, i32
  }
  func.func @transform_4(%arg0: i32) -> (i32, i32) {
    %c0_i32 = arith.constant 0 : i32
    %c0_i32_0 = arith.constant 0 : i32
    %c0_i32_1 = arith.constant 0 : i32
    return %c0_i32, %c0_i32_0 : i32, i32
  }
  func.func @transform_5(%arg0: i32) -> (i32, i32) {
    %c0_i32 = arith.constant 0 : i32
    %c0_i32_0 = arith.constant 0 : i32
    %c0_i32_1 = arith.constant 0 : i32
    return %c0_i32, %c0_i32_0 : i32, i32
  }
  func.func @transform_6(%arg0: i32) -> (i32, i32) {
    %c0_i32 = arith.constant 0 : i32
    %c0_i32_0 = arith.constant 0 : i32
    %c0_i32_1 = arith.constant 0 : i32
    return %c0_i32, %c0_i32_0 : i32, i32
  }
  func.func @transform_7(%arg0: i32) -> (i32, i32) {
    %c0_i32 = arith.constant 0 : i32
    %c0_i32_0 = arith.constant 0 : i32
    return %arg0, %c0_i32 : i32, i32
  }
}

</mosaic_0001>

<bundles_post_ra>
// kernel: tpu_custom_call.1
= control target key start
LH: loop header
LB: loop body
LE: loop exit
PB: predicated region body
PF: predicated region fallthrough
CT: control target
= control target key end

     0   :  { %s5623_s0 = inlined_call_operand.hbm [shape: f32[256,784], index: 0, kind: input, shape index: {}]   ;;  %s5624_s1 = inlined_call_operand.hbm [shape: bf16[784,384], index: 1, kind: input, shape index: {}]   ;;  %s5625_s2 = inlined_call_operand.hbm [shape: f32[1,384], index: 2, kind: input, shape index: {}]   ;;  %s5626_s3 = inlined_call_operand.hbm [shape: bf16[384,128], index: 3, kind: input, shape index: {}]   ;;  %s5627_s4 = inlined_call_operand.hbm [shape: f32[1,128], index: 4, kind: input, shape index: {}]   ;;  %s5628_s5 = inlined_call_operand.hbm [shape: bf16[128,128], index: 5, kind: input, shape index: {}]   ;;  %s5629_s6 = inlined_call_operand.hbm [shape: f32[1,128], index: 6, kind: input, shape index: {}]   ;;  %s5630_s7 = inlined_call_operand.hbm [shape: bf16[256,128], index: 7, kind: output, shape index: {}]  }
   0x1   :  { %5634 = sst [smem:[#allocation20_spill]] %s5624_s1 }
   0x2   :  { %12 = vsyncpa [#allocation3], 0 }
   0x3   :  { %14 = vsyncpa [#allocation3 + $0x1], 0 }
   0x4   :  { %15 = vsyncpa [#allocation6], 0 }
   0x5   :  { %16 = vsyncpa [#allocation9], 0 }
   0x6   :  { %17 = vsyncpa [#allocation12], 0 }
   0x7   :  { %18 = vsyncpa [#allocation4], 0 }
   0x8   :  { %20 = vsyncpa [#allocation4 + $0x1], 0  ;;  %s4784_s24 = smov 0   ;;  %s4786_s25 = smov 0  }
   0x9   :  { %s4788_s26 = smov 0   ;;  %s4790_s27 = smov 0  }
   0xa LB: > { %s4727_s28 = smov [#allocation5]   ;;  %s4805_s30 = sadd.s32 4294967295, %s4725_s27   ;;  %s4725_s27 = sphi %s4790_s27, %s5657_s27   ;;  %s4721_s26 = sphi %s4788_s26, %s5656_s26   ;;  %s4717_s25 = sphi %s4786_s25, %s5655_s25   ;;  %s4713_s24 = sphi %s4784_s24, %s5654_s24  }
   0xb   : > { %s221_s29 = sshll.u32 %s4727_s28, 4  ;;  %p3294_p0 = scmp.ge.s32.totalorder %s4725_s27, 1  ;;  %s4810_s29 = int_to_ptr.vmem [resolvable:$true] %s221_s29 }
   0xc   : > { %p5631_p1 = scmp.eq.s32.totalorder %s4805_s30, 0  ;;  %p209_p2 = scmp.lt.s32.totalorder %s4725_s27, 3 }
   0xd   : > { %s4728_s9 = smov [#allocation8]   ;;  %s4729_s12 = smov [#allocation11]  }
   0xe   : > { %p4812_p3 = pnand %p3294_p0, %p209_p2  ;;  %s245_s10 = sshll.u32 %s4728_s9, 4  ;;  %s4825_s10 = int_to_ptr.vmem [resolvable:$true] %s245_s10 }
   0xf   : > { %s4827_s13 = sshll.u32 %s4729_s12, 4  ;;  %s5637_s1 = sld [smem:[#allocation20_spill]]  ;;  %s270_s13 = int_to_ptr.vmem [resolvable:$true] %s4827_s13 }
  0x10   : > { %s5635_s8 = scalar_select %p4812_p3, 1, 0 }
  0x11   : > { %p4133_p5 = pneg %p4812_p3 }
  0x13   : > { %p4821_p6 = pnand %p4133_p5, %p5631_p1 }
  0x15   : > { %s4449_s16 = scalar_lea.hbm %s5637_s1, 18816  ;;  %p4837_p8 = pneg %p4821_p6 }
  0x16   : > { %p4450_p7 = scmp.ne.s32.totalorder %s5637_s1, %s4449_s16  ;;  %p4456_p11 = scmp.lt.u32.totalorder %s4449_s16, %s5637_s1 }
  0x18   : > { %p4452_p9 = pnand %p4837_p8, %p4450_p7 }
  0x1a   : > { %p4453_p10 = pneg %p4452_p9 }
  0x1c   : > { %p4458_p12 = pnand %p4456_p11, %p4453_p10 }
  0x1e   : > { %4461 = shalt.err (!%p4458_p12)
}
  0x1f   : > { %s4462_s22 = scalar_lea.vmem %s4810_s29, 18816  ;;  %p4470_p5 = scmp.lt.s32.totalorder %s4810_s29, %s4810_s29 }
  0x20   : > { %p4463_p13 = scmp.ne.s32.totalorder %s4810_s29, %s4462_s22  ;;  %p4471_p4 = scmp.lt.s32.totalorder %s4462_s22, %s4462_s22 }
  0x22   : > { %p4465_p0 = pnand %p4463_p13, %p4837_p8  ;;  %p4472_p7 = por %p4471_p4, %p4470_p5 }
  0x24   : > { %p4466_p2 = pneg %p4465_p0 }
  0x26   : > { %p4473_p9 = pnand %p4472_p7, %p4466_p2 }
  0x28   : > { %4476 = shalt.err (!%p4473_p9)
}
  0x29   : > { %s4730_s23 = smov 192   ;;  %s4731_s28 = smov 12  }
  0x2a   : > { %4136 = dma.hbm_to_vmem [thread:$0]  (!%p4821_p6), %s5637_s1, 18816, %s4810_s29, [#allocation6], %s4730_s23, %s4730_s23, %s4731_s28  }
  0x2b   : > { %s4477_s16 = scalar_lea.hbm %s5626_s3, 3072 }
  0x2c   : > { %p4478_p4 = scmp.ne.s32.totalorder %s5626_s3, %s4477_s16  ;;  %p4484_p12 = scmp.lt.u32.totalorder %s4477_s16, %s5626_s3 }
  0x2e   : > { %p4480_p10 = pnand %p4478_p4, %p4837_p8 }
  0x30   : > { %p4481_p11 = pneg %p4480_p10 }
  0x32   : > { %p4486_p13 = pnand %p4484_p12, %p4481_p11 }
  0x34   : > { %4489 = shalt.err (!%p4486_p13)
}
  0x35   : > { %s4490_s29 = scalar_lea.vmem %s4825_s10, 3072  ;;  %p4498_p7 = scmp.lt.s32.totalorder %s4825_s10, %s4825_s10 }
  0x36   : > { %p4491_p0 = scmp.ne.s32.totalorder %s4825_s10, %s4490_s29  ;;  %p4499_p9 = scmp.lt.s32.totalorder %s4490_s29, %s4490_s29 }
  0x38   : > { %p4493_p2 = pnand %p4491_p0, %p4837_p8  ;;  %p4500_p4 = por %p4499_p9, %p4498_p7 }
  0x3a   : > { %p4494_p5 = pneg %p4493_p2 }
  0x3c   : > { %p4501_p10 = pnand %p4500_p4, %p4494_p5 }
  0x3e   : > { %4504 = shalt.err (!%p4501_p10)
}
  0x3f   : > { %s4732_s22 = smov 64   ;;  %s4733_s23 = smov 4  }
  0x40   : > { %4142 = dma.hbm_to_vmem [thread:$0]  (!%p4821_p6), %s5626_s3, 3072, %s4825_s10, [#allocation9], %s4732_s22, %s4732_s22, %s4733_s23  }
  0x41   : > { %s4505_s15 = scalar_lea.hbm %s5628_s5, 1024 }
  0x42   : > { %p4506_p11 = scmp.ne.s32.totalorder %s5628_s5, %s4505_s15  ;;  %p4512_p0 = scmp.lt.u32.totalorder %s4505_s15, %s5628_s5 }
  0x44   : > { %p4508_p12 = pnand %p4506_p11, %p4837_p8 }
  0x46   : > { %p4509_p13 = pneg %p4508_p12 }
  0x48   : > { %p4514_p2 = pnand %p4512_p0, %p4509_p13 }
  0x4a   : > { %4517 = shalt.err (!%p4514_p2)
}
  0x4b   : > { %s4518_s21 = scalar_lea.vmem %s270_s13, 1024  ;;  %p4526_p4 = scmp.lt.s32.totalorder %s270_s13, %s270_s13 }
  0x4c   : > { %p4519_p5 = scmp.ne.s32.totalorder %s270_s13, %s4518_s21  ;;  %p4527_p10 = scmp.lt.s32.totalorder %s4518_s21, %s4518_s21 }
  0x4e   : > { %p4521_p7 = pnand %p4519_p5, %p4837_p8  ;;  %p4528_p1 = por %p4527_p10, %p4526_p4 }
  0x50   : > { %p4522_p9 = pneg %p4521_p7 }
  0x52   : > { %p4529_p3 = pnand %p4528_p1, %p4522_p9 }
  0x54   : > { %4532 = shalt.err (!%p4529_p3)
}
  0x55   : > { %4148 = dma.hbm_to_vmem [thread:$0]  (!%p4821_p6), %s5628_s5, 1024, %s270_s13, [#allocation12], %s4732_s22, %s4732_s22, %s4733_s23  }
  0x56   : > { %s4734_s28 = smov [#allocation7]   ;;  %s4735_s12 = smov [#allocation10]  }
  0x57   : > { %s235_s9 = sshll.u32 %s4734_s28, 4  ;;  %s259_s14 = sshll.u32 %s4735_s12, 4  ;;  %s236_s9 = int_to_ptr.vmem [resolvable:$true] %s235_s9  ;;  %s260_s14 = int_to_ptr.vmem [resolvable:$true] %s259_s14 }
  0x58   : > { %s4533_s17 = scalar_lea.hbm %s5625_s2, 48 }
  0x59   : > { %p4534_p1 = scmp.ne.s32.totalorder %s5625_s2, %s4533_s17  ;;  %p4540_p12 = scmp.lt.u32.totalorder %s4533_s17, %s5625_s2 }
  0x5b   : > { %p4536_p3 = pnand %p4534_p1, %p4837_p8 }
  0x5d   : > { %p4537_p11 = pneg %p4536_p3 }
  0x5f   : > { %p4542_p13 = pnand %p4540_p12, %p4537_p11 }
  0x61   : > { %4545 = shalt.err (!%p4542_p13)
}
  0x62   : > { %s4546_s13 = scalar_lea.vmem %s236_s9, 48  ;;  %s4553_s22 = scalar_lea.vmem %s236_s9, 64 }
  0x63   : > { %p4547_p0 = scmp.ne.s32.totalorder %s236_s9, %s4546_s13  ;;  %p4554_p7 = scmp.lt.s32.totalorder %s236_s9, %s236_s9 }
  0x64   : > { %p4555_p9 = scmp.lt.s32.totalorder %s4553_s22, %s4546_s13 }
  0x65   : > { %p4549_p2 = pnand %p4547_p0, %p4837_p8 }
  0x66   : > { %p4556_p4 = por %p4555_p9, %p4554_p7 }
  0x67   : > { %p4550_p5 = pneg %p4549_p2 }
  0x69   : > { %p4557_p10 = pnand %p4556_p4, %p4550_p5 }
  0x6b   : > { %4560 = shalt.err (!%p4557_p10)
}
  0x6c   : > { %4139 = dma.hbm_to_vmem [thread:$0]  (!%p4821_p6), %s5625_s2, 48, %s236_s9, [#allocation6]  }
  0x6d   : > { %s4561_s15 = scalar_lea.hbm %s5627_s4, 16 }
  0x6e   : > { %p4562_p1 = scmp.ne.s32.totalorder %s5627_s4, %s4561_s15  ;;  %p4568_p12 = scmp.lt.u32.totalorder %s4561_s15, %s5627_s4 }
  0x70   : > { %p4564_p3 = pnand %p4562_p1, %p4837_p8 }
  0x72   : > { %p4565_p11 = pneg %p4564_p3 }
  0x74   : > { %p4570_p13 = pnand %p4568_p12, %p4565_p11 }
  0x76   : > { %4573 = shalt.err (!%p4570_p13)
}
  0x77   : > { %s4574_s21 = scalar_lea.vmem %s260_s14, 16  ;;  %s4581_s9 = scalar_lea.vmem %s260_s14, 32 }
  0x78   : > { %p4575_p0 = scmp.ne.s32.totalorder %s260_s14, %s4574_s21  ;;  %p4582_p7 = scmp.lt.s32.totalorder %s260_s14, %s260_s14 }
  0x79   : > { %p4583_p9 = scmp.lt.s32.totalorder %s4581_s9, %s4574_s21 }
  0x7a   : > { %p4577_p2 = pnand %p4575_p0, %p4837_p8 }
  0x7b   : > { %p4584_p4 = por %p4583_p9, %p4582_p7 }
  0x7c   : > { %p4578_p5 = pneg %p4577_p2 }
  0x7e   : > { %p4585_p10 = pnand %p4584_p4, %p4578_p5 }
  0x80   : > { %4588 = shalt.err (!%p4585_p10)
}
  0x81   : > { %4145 = dma.hbm_to_vmem [thread:$0]  (!%p4821_p6), %s5627_s4, 16, %s260_s14, [#allocation9]  }
  0x82   : > { %s4736_s22 = smov [#allocation13]   ;;  %s4589_s12 = scalar_lea.hbm %s5629_s6, 16 }
  0x83   : > { %s283_s23 = sshll.u32 %s4736_s22, 4  ;;  %p4590_p1 = scmp.ne.s32.totalorder %s5629_s6, %s4589_s12  ;;  %s284_s23 = int_to_ptr.vmem [resolvable:$true] %s283_s23 }
  0x84   : > { %p4596_p12 = scmp.lt.u32.totalorder %s4589_s12, %s5629_s6 }
  0x85   : > { %p4592_p3 = pnand %p4590_p1, %p4837_p8 }
  0x87   : > { %p4593_p11 = pneg %p4592_p3 }
  0x89   : > { %p4598_p13 = pnand %p4596_p12, %p4593_p11 }
  0x8b   : > { %4601 = shalt.err (!%p4598_p13)
}
  0x8c   : > { %s4602_s14 = scalar_lea.vmem %s284_s23, 16  ;;  %s4609_s20 = scalar_lea.vmem %s284_s23, 32 }
  0x8d   : > { %p4603_p0 = scmp.ne.s32.totalorder %s284_s23, %s4602_s14  ;;  %p4610_p7 = scmp.lt.s32.totalorder %s284_s23, %s284_s23 }
  0x8e   : > { %p4611_p9 = scmp.lt.s32.totalorder %s4609_s20, %s4602_s14 }
  0x8f   : > { %p4605_p2 = pnand %p4603_p0, %p4837_p8 }
  0x90   : > { %p4612_p4 = por %p4611_p9, %p4610_p7 }
  0x91   : > { %p4606_p5 = pneg %p4605_p2 }
  0x93   : > { %p4613_p10 = pnand %p4612_p4, %p4606_p5 }
  0x95   : > { %4616 = shalt.err (!%p4613_p10)
}
  0x96   : > { %4151 = dma.hbm_to_vmem [thread:$0]  (!%p4821_p6), %s5629_s6, 16, %s284_s23, [#allocation12]  }
  0x97   : > { %s3293_s19 = sadd.s32 4294967294, %s4725_s27   ;;  %s4956_s11 = sadd.s32 1, %s4725_s27  }
  0x98   : > { %s30_s10 = ssub.s32 %s4725_s27, %s4956_s11  ;;  %s33_s13 = sadd.s32 1, %s4721_s26 }
  0x99   : > { %p31_p8 = scmp.eq.s32.totalorder %s30_s10, 0  ;;  %p40_p1 = scmp.ne.s32.totalorder %s4721_s26, %s4717_s25 }
  0x9a   : > { %p41_p3 = scmp.eq.s32.totalorder %s4725_s27, 0  ;;  %p46_p11 = scmp.ne.s32.totalorder %s4717_s25, %s4713_s24 }
  0x9b   : > { %s4967_s22 = scalar_select %p31_p8, %s4721_s26, %s33_s13  }
  0x9c   : > { %p42_p12 = por %p41_p3, %p40_p1  ;;  %p5639_p13 = scmp.eq.s32.totalorder %s4805_s30, 0 }
  0x9d   : > { %p196_p6 = scmp.eq.s32.totalorder %s4805_s30, 1  ;;  %p202_p2 = scmp.eq.s32.totalorder %s3293_s19, 1 }
  0x9e   : > { %p4971_p0 = por %p5639_p13, %p46_p11  ;;  %p4166_p5 = scmp.lt.s32.totalorder %s4725_s27, 2 }
  0x9f   : > { %s294_s23 = sand.u32 1, %s4721_s26   ;;  %p4978_p7 = por %p196_p6, %p40_p1 }
  0xa0   : > { %p4982_p9 = por %p202_p2, %p46_p11  ;;  %s4102_s15 = smul.u32 896, %s294_s23 }
  0xa1   : > { %s5641_s28 = scalar_select %p4978_p7, 1, 0 }
  0xa2   : > { %s5642_s12 = scalar_select %p4982_p9, 1, 0 }
  0xa3   : > { %s4103_s16 = smul.u32 14336, %s4725_s27  ;;  %p4987_p4 = pnand %p4166_p5, %p42_p12 }
  0xa4   : > { %s298_s21 = scalar_lea.vmem [#allocation2], %s4102_s15  ;;  %s4998_s19 = scalar_lea.sflag [#allocation3], %s294_s23 }
  0xa5   : > { %s4994_s20 = scalar_lea.hbm %s5623_s0, %s4103_s16  ;;  %s306_s9 = sshll.u32 %s298_s21, 4  ;;  %s4996_s9 = int_to_ptr.vmem [resolvable:$true] %s306_s9 }
  0xa6   : > { %s4617_s10 = scalar_lea.hbm %s4994_s20, 14336  ;;  %p4619_p8 = pneg %p4987_p4 }
  0xa7   : > { %p4618_p10 = scmp.ne.s32.totalorder %s4994_s20, %s4617_s10  ;;  %s4622_s18 = scalar_lea.hbm %s5623_s0, 28672 }
  0xa8   : > { %p4623_p11 = scmp.lt.u32.totalorder %s4994_s20, %s5623_s0  ;;  %p4624_p12 = scmp.lt.u32.totalorder %s4622_s18, %s4617_s10 }
  0xa9   : > { %p4620_p1 = pnand %p4619_p8, %p4618_p10  ;;  %p4626_p6 = scmp.lt.u32.totalorder %s4617_s10, %s4994_s20 }
  0xaa   : > { %p4625_p13 = por %p4624_p12, %p4623_p11 }
  0xab   : > { %p4621_p3 = pneg %p4620_p1 }
  0xac   : > { %p4627_p2 = por %p4626_p6, %p4625_p13 }
  0xae   : > { %p4628_p5 = pnand %p4627_p2, %p4621_p3 }
  0xb0   : > { %4631 = shalt.err (!%p4628_p5)
}
  0xb1   : > { %s4632_s23 = scalar_lea.vmem %s4996_s9, 14336  ;;  %s4737_s15 = smov [#allocation2]  }
  0xb2   : > { %p4633_p10 = scmp.ne.s32.totalorder %s4996_s9, %s4632_s23  ;;  %s4637_s21 = sshll.u32 %s4737_s15, 4  ;;  %s4638_s21 = int_to_ptr.vmem [resolvable:$false] %s4637_s21 }
  0xb3   : > { %s4639_s1 = scalar_lea.vmem %s4638_s21, 28672  ;;  %p4640_p7 = scmp.lt.s32.totalorder %s4996_s9, %s4638_s21 }
  0xb4   : > { %p4635_p1 = pnand %p4633_p10, %p4619_p8  ;;  %p4641_p11 = scmp.lt.s32.totalorder %s4639_s1, %s4632_s23 }
  0xb6   : > { %p4636_p9 = pneg %p4635_p1  ;;  %p4642_p12 = por %p4641_p11, %p4640_p7 }
  0xb8   : > { %p4643_p13 = pnand %p4642_p12, %p4636_p9 }
  0xba   : > { %4646 = shalt.err (!%p4643_p13)
}
  0xbb   : > { %s4738_s10 = smov 896   ;;  %s4739_s13 = smov 56  }
  0xbc   : > { %4155 = dma.hbm_to_vmem [thread:$0]  (!%p4987_p4), %s4994_s20, 14336, %s4996_s9, %s4998_s19, %s4738_s10, %s4738_s10, %s4739_s13  }
  0xbd   : > { %p5644_p8 = scmp.ne.s32.totalorder %s5635_s8, 0 }
  0xbe   : > { %s5029_s16 = sand.u32 (!%p5644_p8), 1, %s4717_s25  }
  0xbf   : > { %318 = sbr.rel (%p5644_p8) target bundleno = 1203 (0x4b3), region = 48  ;;  %s321_s14 = scalar_lea.sflag (!%p5644_p8), [#allocation3], %s5029_s16 }
  0xc0   : > { %s4104_s18 = smul.u32 (!%p5644_p8), 896, %s5029_s16 }
  0xc2   : > { %s5033_s23 = scalar_lea.vmem (!%p5644_p8), [#allocation2], %s4104_s18 }
  0xc6   : > { %4692 = dma.done.wait (%p4971_p0), %s321_s14, 14336  }
  0xc7   : > { %4694 = vsyncadd (%p4971_p0), %s321_s14, 4294952960  ;;  %p5645_p7 = scmp.eq.s32.totalorder %s4805_s30, 0 }
  0xc9   : > { %4696 = dma.done.wait (%p5645_p7), [#allocation6], 18864   ;;  %p5646_p9 = pmov %p5645_p7 }
  0xca   : > { %p5647_p4 = pmov %p5645_p7 }
  0xcb   : > { %4698 = vsyncadd (%p5646_p9), [#allocation6], 4294948432 }
  0xcc   : > { %4700 = dma.done.wait (%p5647_p4), [#allocation9], 3088   ;;  %p5648_p3 = pmov %p5647_p4 }
  0xce   : > { %4702 = vsyncadd (%p5648_p3), [#allocation9], 4294964208  ;;  %p5649_p6 = pmov %p5648_p3 }
  0xcf   : > { %p5650_p2 = pmov %p5648_p3 }
  0xd0   : > { %4704 = dma.done.wait (%p5649_p6), [#allocation12], 1040  }
  0xd1   : > { %4706 = vsyncadd (%p5650_p2), [#allocation12], 4294966256  ;;  %v4221_v0 = vld [vmem:[#allocation5 + $0x4] ss:$12 sps:$4 sm:$0xff]   ;;  %v4223_v1 = vld [vmem:[#allocation5 + $0xc8] ss:$12 sps:$4 sm:$0xff]  }
  0xd2   : > { %1572 = vmatprep.subr.bf16.mxu0 %v4221_v0  ;;  %v4224_v2 = vld [vmem:[#allocation5] ss:$12 sps:$4 sm:$0xff]   ;;  %3595 = vmatprep.subr.bf16.mxu1 %v4223_v1  ;;  %v4225_v3 = vld [vmem:[#allocation5 + $0x8] ss:$12 sps:$4 sm:$0xff]   ;;  %v4229_v6 = vld [vmem:[#allocation5 + $0x18] ss:$12 sps:$4 sm:$0xff]  }
  0xd3   : > { %1573 = vmatpush1.bf16.msra.mxu0 %v4224_v2  ;;  %v4226_v4 = vld [vmem:[#allocation5 + $0x1c] ss:$12 sps:$4 sm:$0xff]   ;;  %3596 = vmatpush3.bf16.msra.mxu1 %v4225_v3  ;;  %v4228_v5 = vld [vmem:[#allocation5 + $0xe0] ss:$12 sps:$4 sm:$0xff]   ;;  %v4233_v9 = vld [vmem:[#allocation5 + $0xf8] ss:$12 sps:$4 sm:$0xff]  }
  0xd4   : > { %1574 = vmatprep.subr.bf16.mxu0 %v4226_v4  ;;  %v4230_v7 = vld [vmem:[#allocation5 + $0x20] ss:$12 sps:$4 sm:$0xff]   ;;  %3597 = vmatprep.subr.bf16.mxu1 %v4228_v5  ;;  %v4234_v10 = vld [vmem:[#allocation5 + $0x30] ss:$12 sps:$4 sm:$0xff]   ;;  %v4235_v11 = vld [vmem:[#allocation5 + $0x38] ss:$12 sps:$4 sm:$0xff]  }
  0xd5   : > { %v4231_v8 = vld [vmem:[#allocation5 + $0x34] ss:$12 sps:$4 sm:$0xff]   ;;  %v4236_v12 = vld [vmem:[#allocation5 + $0x4c] ss:$12 sps:$4 sm:$0xff]   ;;  %v4238_v13 = vld [vmem:[#allocation5 + $0x110] ss:$12 sps:$4 sm:$0xff]  }
  0xd6   : > { %v4239_v14 = vld [vmem:[#allocation5 + $0x48] ss:$12 sps:$4 sm:$0xff]   ;;  %v4240_v15 = vld [vmem:[#allocation5 + $0x50] ss:$12 sps:$4 sm:$0xff]   ;;  %v4244_v18 = vld [vmem:[#allocation5 + $0x60] ss:$12 sps:$4 sm:$0xff]  }
  0xd7   : > { %1575 = vmatpush1.bf16.msra.mxu0 %v4229_v6  ;;  %3598 = vmatpush3.bf16.msra.mxu1 %v4230_v7  ;;  %v4241_v16 = vld [vmem:[#allocation5 + $0x64] ss:$12 sps:$4 sm:$0xff]   ;;  %v4243_v17 = vld [vmem:[#allocation5 + $0x128] ss:$12 sps:$4 sm:$0xff]   ;;  %v4248_v21 = vld [vmem:[#allocation5 + $0x140] ss:$12 sps:$4 sm:$0xff]  }
  0xd8   : > { %1576 = vmatprep.subr.bf16.mxu0 %v4231_v8  ;;  %3599 = vmatprep.subr.bf16.mxu1 %v4233_v9  ;;  %v4245_v19 = vld [vmem:[#allocation5 + $0x68] ss:$12 sps:$4 sm:$0xff]   ;;  %v4249_v22 = vld [vmem:[#allocation5 + $0x78] ss:$12 sps:$4 sm:$0xff]   ;;  %v4250_v23 = vld [vmem:[#allocation5 + $0x80] ss:$12 sps:$4 sm:$0xff]  }
  0xd9   : > { %v4246_v20 = vld [vmem:[#allocation5 + $0x7c] ss:$12 sps:$4 sm:$0xff]   ;;  %v4251_v24 = vld [vmem:[#allocation5 + $0x94] ss:$12 sps:$4 sm:$0xff]   ;;  %v4253_v25 = vld [vmem:[#allocation5 + $0x158] ss:$12 sps:$4 sm:$0xff]  }
  0xda   : > { %v4254_v26 = vld [vmem:[#allocation5 + $0x90] ss:$12 sps:$4 sm:$0xff]   ;;  %v4255_v27 = vld [vmem:[#allocation5 + $0x98] ss:$12 sps:$4 sm:$0xff]   ;;  %v4259_v30 = vld [vmem:[#allocation5 + $0xa8] ss:$12 sps:$4 sm:$0xff]  }
  0xdb   : > { %1577 = vmatpush1.bf16.msra.mxu0 %v4234_v10  ;;  %3600 = vmatpush3.bf16.msra.mxu1 %v4235_v11  ;;  %v4256_v28 = vld [vmem:[#allocation5 + $0xac] ss:$12 sps:$4 sm:$0xff]   ;;  %v4258_v29 = vld [vmem:[#allocation5 + $0x170] ss:$12 sps:$4 sm:$0xff]   ;;  %v390_v32 = vld [vmem:[%s5033_s23 + $0x40] sm:$0xff]  ;;  %vm1547_vm0 = vcmask 130048  }
  0xdc   : > { %1578 = vmatprep.subr.bf16.mxu0 %v4236_v12  ;;  %3601 = vmatprep.subr.bf16.mxu1 %v4238_v13  ;;  %v383_v31 = vld [vmem:[%s5033_s23 + $0x8] sm:$0xff]  ;;  %v4260_v33 = vld [vmem:[#allocation5 + $0xb0] ss:$12 sps:$4 sm:$0xff]   ;;  %v382_v36 = vld [vmem:[%s5033_s23] sm:$0xff]  ;;  %s3312_s8 = sshll.u32 %s5029_s16, 6  ;;  %s3547_s20 = sshll.u32 %s4805_s30, 10 }
  0xdd   : > { %v495_v34 = vpack.c.bf16 %v390_v32, %v383_v31  ;;  %v4261_v35 = vld [vmem:[#allocation5 + $0xc4] ss:$12 sps:$4 sm:$0xff]   ;;  %v389_v37 = vld [vmem:[%s5033_s23 + $0x38] sm:$0xff]  ;;  %v4263_v41 = vld [vmem:[#allocation5 + $0xc0] ss:$12 sps:$4 sm:$0xff]   ;;  %s5562_s29 = scalar_lea.vmem [#allocation14], %s3312_s8  ;;  %s5577_s15 = scalar_lea.hbm %s5630_s7, %s3547_s20 }
  0xde   : > { %v397_v38 = vld [vmem:[%s5033_s23 + $0x78] sm:$0xff]  ;;  %v404_v39 = vld [vmem:[%s5033_s23 + $0xb0] sm:$0xff]  ;;  %v5057_v40 = vpack.c.bf16 %v389_v37, %v382_v36  ;;  %v403_v47 = vld [vmem:[%s5033_s23 + $0xa8] sm:$0xff]  ;;  %s3163_s17 = sshll.u32 %s5562_s29, 4  ;;  %s3150_s30 = scalar_lea.sflag [#allocation4], %s5029_s16  ;;  %s5572_s17 = int_to_ptr.vmem [resolvable:$true] %s3163_s17 }
  0xdf   : > { %1579 = vmatpush1.bf16.msra.mxu0 %v4239_v14  ;;  %3602 = vmatpush3.bf16.msra.mxu1 %v4240_v15  ;;  %v4264_v42 = vld [vmem:[#allocation5 + $0xdc] ss:$12 sps:$4 sm:$0xff]   ;;  %v5059_v43 = vpack.c.bf16 %v404_v39, %v397_v38  ;;  %v4266_v44 = vld [vmem:[#allocation5 + $0xd8] ss:$12 sps:$4 sm:$0xff]   ;;  %v4267_v45 = vld [vmem:[#allocation5 + $0xf4] ss:$12 sps:$4 sm:$0xff]  }
  0xe0   : > { %1580 = vmatprep.subr.bf16.mxu0 %v4241_v16  ;;  %3603 = vmatprep.subr.bf16.mxu1 %v4243_v17  ;;  %v396_v46 = vld [vmem:[%s5033_s23 + $0x70] sm:$0xff]  ;;  %v411_v48 = vld [vmem:[%s5033_s23 + $0xe8] sm:$0xff]  ;;  %v418_v49 = vld [vmem:[%s5033_s23 + $0x120] sm:$0xff]  ;;  %s4647_s21 = scalar_lea.vmem %s5572_s17, 1024  ;;  %p5651_p5 = scmp.ne.s32.totalorder %s5641_s28, 0 }
  0xe1   : > { %2056 = vmatprep.mubr.bf16.mxu1 %v495_v34  ;;  %1604 = vmatprep.mubr.bf16.mxu0 %v495_v34  ;;  %v5067_v50 = vpack.c.bf16 %v403_v47, %v396_v46  ;;  %v4269_v51 = vld [vmem:[#allocation5 + $0xf0] ss:$12 sps:$4 sm:$0xff]   ;;  %v4270_v52 = vld [vmem:[#allocation5 + $0x10c] ss:$12 sps:$4 sm:$0xff]   ;;  %v5069_v53 = vpack.c.bf16 %v418_v49, %v411_v48  ;;  %v4272_v54 = vld [vmem:[#allocation5 + $0x108] ss:$12 sps:$4 sm:$0xff]   ;;  %p4648_p0 = scmp.ne.s32.totalorder %s5572_s17, %s4647_s21 }
  0xe2   : > { %v4273_v55 = vld [vmem:[#allocation5 + $0x124] ss:$12 sps:$4 sm:$0xff]   ;;  %v417_v57 = vld [vmem:[%s5033_s23 + $0x118] sm:$0xff]  ;;  %v4288_v60 = vld [vmem:[#allocation5 + $0x248] ss:$12 sps:$4 sm:$0xff]   ;;  %s4741_s1 = smov [#allocation14]  }
  0xe3   : > { %1581 = vmatpush1.bf16.msra.mxu0 %v4244_v18  ;;  %3604 = vmatpush3.bf16.msra.mxu1 %v4245_v19  ;;  %v410_v56 = vld [vmem:[%s5033_s23 + $0xe0] sm:$0xff]  ;;  %v425_v58 = vld [vmem:[%s5033_s23 + $0x158] sm:$0xff]  ;;  %v432_v59 = vld [vmem:[%s5033_s23 + $0x190] sm:$0xff]  ;;  %p4649_p10 = pnand %p4648_p0, %p5651_p5  ;;  %s4651_s10 = sshll.u32 %s4741_s1, 4  ;;  %s4652_s10 = int_to_ptr.vmem [resolvable:$false] %s4651_s10 }
  0xe4   : > { %1582 = vmatprep.subr.bf16.mxu0 %v4246_v20  ;;  %3605 = vmatprep.subr.bf16.mxu1 %v4248_v21  ;;  %v4289_v61 = vld [vmem:[#allocation5 + $0x188] ss:$12 sps:$4 sm:$0xff]   ;;  %v5077_v62 = vpack.c.bf16 %v417_v57, %v410_v56  ;;  %v4275_v63 = vld [vmem:[#allocation5 + $0x120] ss:$12 sps:$4 sm:$0xff]   ;;  %v5079_v1 = vpack.c.bf16 %v432_v59, %v425_v58  ;;  %v4278_v3 = vld [vmem:[#allocation5 + $0x138] ss:$12 sps:$4 sm:$0xff]   ;;  %p4654_p11 = scmp.lt.s32.totalorder %s5572_s17, %s4652_s10 }
  0xe5   : > { %v4276_v0 = vld [vmem:[#allocation5 + $0x13c] ss:$12 sps:$4 sm:$0xff]   ;;  %v4293_v2 = vld [vmem:[#allocation5 + $0x260] ss:$12 sps:$4 sm:$0xff]   ;;  %v424_v6 = vld [vmem:[%s5033_s23 + $0x150] sm:$0xff]  ;;  %p4650_p1 = pneg %p4649_p10  ;;  %s4653_s13 = scalar_lea.vmem %s4652_s10, 2048 }
  0xe6   : > { %v4294_v4 = vld [vmem:[#allocation5 + $0x1a0] ss:$12 sps:$4 sm:$0xff]   ;;  %v4298_v10 = vld [vmem:[#allocation5 + $0x278] ss:$12 sps:$4 sm:$0xff]   ;;  %v4281_v13 = vld [vmem:[#allocation5 + $0x150] ss:$12 sps:$4 sm:$0xff]   ;;  %p4655_p12 = scmp.lt.s32.totalorder %s4653_s13, %s4647_s21 }
  0xe7   : > { %1583 = vmatpush1.bf16.msra.mxu0 %v4249_v22  ;;  %3606 = vmatpush3.bf16.msra.mxu1 %v4250_v23  ;;  %v4279_v5 = vld [vmem:[#allocation5 + $0x154] ss:$12 sps:$4 sm:$0xff]   ;;  %v431_v7 = vld [vmem:[%s5033_s23 + $0x188] sm:$0xff]  ;;  %v4299_v11 = vld [vmem:[#allocation5 + $0x1b8] ss:$12 sps:$4 sm:$0xff]  }
  0xe8   : > { %1584 = vmatprep.subr.bf16.mxu0 %v4251_v24  ;;  %3607 = vmatprep.subr.bf16.mxu1 %v4253_v25  ;;  %v439_v8 = vld [vmem:[%s5033_s23 + $0x1c8] sm:$0xff]  ;;  %v446_v9 = vld [vmem:[%s5033_s23 + $0x200] sm:$0xff]  ;;  %v5087_v12 = vpack.c.bf16 %v431_v7, %v424_v6  ;;  %v4303_v16 = vld [vmem:[#allocation5 + $0x290] ss:$12 sps:$4 sm:$0xff]   ;;  %p4656_p13 = por %p4655_p12, %p4654_p11 }
  0xe9   : > { %v4282_v14 = vld [vmem:[#allocation5 + $0x16c] ss:$12 sps:$4 sm:$0xff]   ;;  %v5089_v15 = vpack.c.bf16 %v446_v9, %v439_v8  ;;  %v4304_v17 = vld [vmem:[#allocation5 + $0x1d0] ss:$12 sps:$4 sm:$0xff]   ;;  %v4284_v18 = vld [vmem:[#allocation5 + $0x168] ss:$12 sps:$4 sm:$0xff]  }
  0xea   : > { %v4287_v19 = vld [vmem:[#allocation5 + $0x184] ss:$12 sps:$4 sm:$0xff]   ;;  %v445_v21 = vld [vmem:[%s5033_s23 + $0x1f8] sm:$0xff]  ;;  %v4308_v24 = vld [vmem:[#allocation5 + $0x2a8] ss:$12 sps:$4 sm:$0xff]   ;;  %p4657_p8 = pnand %p4656_p13, %p4650_p1 }
  0xeb   : > { %1585 = vmatpush1.bf16.msra.mxu0 %v4254_v26  ;;  %3608 = vmatpush3.bf16.msra.mxu1 %v4255_v27  ;;  %v438_v20 = vld [vmem:[%s5033_s23 + $0x1c0] sm:$0xff]  ;;  %v453_v22 = vld [vmem:[%s5033_s23 + $0x238] sm:$0xff]  ;;  %v460_v23 = vld [vmem:[%s5033_s23 + $0x270] sm:$0xff] }
  0xec   : > { %1586 = vmatprep.subr.bf16.mxu0 %v4256_v28  ;;  %3609 = vmatprep.subr.bf16.mxu1 %v4258_v29  ;;  %v4309_v25 = vld [vmem:[#allocation5 + $0x1e8] ss:$12 sps:$4 sm:$0xff]   ;;  %v4285_v26 = vld [vmem:[#allocation5 + $0x180] ss:$12 sps:$4 sm:$0xff]   ;;  %v5097_v27 = vpack.c.bf16 %v445_v21, %v438_v20  ;;  %v4290_v32 = vld [vmem:[#allocation5 + $0x198] ss:$12 sps:$4 sm:$0xff]  }
  0xed   : > { %v4292_v28 = vld [vmem:[#allocation5 + $0x19c] ss:$12 sps:$4 sm:$0xff]   ;;  %v4313_v29 = vld [vmem:[#allocation5 + $0x2c0] ss:$12 sps:$4 sm:$0xff]   ;;  %v452_v34 = vld [vmem:[%s5033_s23 + $0x230] sm:$0xff] }
  0xee   : > { %v4314_v31 = vld [vmem:[#allocation5 + $0x200] ss:$12 sps:$4 sm:$0xff]   ;;  %v4318_v38 = vld [vmem:[#allocation5 + $0x2d8] ss:$12 sps:$4 sm:$0xff]   ;;  %v4300_v46 = vld [vmem:[#allocation5 + $0x1c8] ss:$12 sps:$4 sm:$0xff]  }
  0xef   : > { %1587 = vmatpush1.bf16.msra.mxu0 %v4259_v30  ;;  %3610 = vmatpush3.bf16.msra.mxu1 %v4260_v33  ;;  %v5099_v30 = vpack.c.bf16 %v460_v23, %v453_v22  ;;  %v4297_v33 = vld [vmem:[#allocation5 + $0x1b4] ss:$12 sps:$4 sm:$0xff]   ;;  %v467_v36 = vld [vmem:[%s5033_s23 + $0x2a8] sm:$0xff]  ;;  %v4319_v39 = vld [vmem:[#allocation5 + $0x218] ss:$12 sps:$4 sm:$0xff]  }
  0xf0   : > { %1588 = vmatprep.subr.bf16.mxu0 %v4261_v35  ;;  %3659 = vmatprep.subr.bf16.mxu1 %v4288_v60  ;;  %v459_v35 = vld [vmem:[%s5033_s23 + $0x268] sm:$0xff]  ;;  %v474_v37 = vld [vmem:[%s5033_s23 + $0x2e0] sm:$0xff]  ;;  %v473_v49 = vld [vmem:[%s5033_s23 + $0x2d8] sm:$0xff] }
  0xf1   : > { %v4307_v47 = vld [vmem:[#allocation5 + $0x1e4] ss:$12 sps:$4 sm:$0xff]   ;;  %v4317_v57 = vld [vmem:[#allocation5 + $0x214] ss:$12 sps:$4 sm:$0xff]   ;;  %v487_v59 = vld [vmem:[%s5033_s23 + $0x348] sm:$0xff] }
  0xf2   : > { %2057 = vmatmul.mubr.bf16.vlgmr.msra.gmra.mrb[0].mxu1 %v5057_v40  ;;  %v466_v48 = vld [vmem:[%s5033_s23 + $0x2a0] sm:$0xff]  ;;  %v480_v58 = vld [vmem:[%s5033_s23 + $0x310] sm:$0xff]  ;;  %v385_v60 = vld [vmem:[%s5033_s23 + $0x18] sm:$0xff] }
  0xf3   : > { %1589 = vmatpush1.bf16.msra.mxu0 %v4263_v41  ;;  %2064 = vmatprep.mubr.bf16.mxu1 %v5059_v43  ;;  %v5109_v41 = vpack.c.bf16 %v459_v35, %v452_v34  ;;  %v399_v6 = vld [vmem:[%s5033_s23 + $0x88] sm:$0xff]  ;;  %v406_v8 = vld [vmem:[%s5033_s23 + $0xc0] sm:$0xff]  ;;  %v420_v20 = vld [vmem:[%s5033_s23 + $0x130] sm:$0xff] }
  0xf4   : > { %1590 = vmatprep.subr.bf16.mxu0 %v4264_v42  ;;  %3660 = vmatpush3.bf16.msra.mxu1 %v4289_v61  ;;  %v4302_v42 = vld [vmem:[#allocation5 + $0x1cc] ss:$12 sps:$4 sm:$0xff]   ;;  %v392_v61 = vld [vmem:[%s5033_s23 + $0x50] sm:$0xff]  ;;  %v434_v34 = vld [vmem:[%s5033_s23 + $0x1a0] sm:$0xff] }
  0xf5   : > { %3661 = vmatprep.subr.bf16.mxu1 %v4293_v2  ;;  %v5135_v2 = vpack.c.bf16 %v392_v61, %v385_v60  ;;  %v4352_v7 = vld [vmem:[#allocation5 + $0x3c8] ss:$12 sps:$4 sm:$0xff]   ;;  %v4325_v9 = vld [vmem:[#allocation5 + $0x240] ss:$12 sps:$4 sm:$0xff]   ;;  %v4362_v22 = vld [vmem:[#allocation5 + $0x3f8] ss:$12 sps:$4 sm:$0xff]  }
  0xf6   : > { %v4358_v21 = vld [vmem:[#allocation5 + $0x320] ss:$12 sps:$4 sm:$0xff]   ;;  %v4331_v23 = vld [vmem:[#allocation5 + $0x270] ss:$12 sps:$4 sm:$0xff]  }
  0xf7   : > { %1591 = vmatpush1.bf16.msra.mxu0 %v4266_v44  ;;  %v4323_v44 = vld [vmem:[#allocation5 + $0x2f0] ss:$12 sps:$4 sm:$0xff]   ;;  %v447_v60 = vld [vmem:[%s5033_s23 + $0x208] sm:$0xff] }
  0xf8   : > { %1592 = vmatprep.subr.bf16.mxu0 %v4267_v45  ;;  %3662 = vmatpush3.bf16.msra.mxu1 %v4294_v4  ;;  %v5111_v45 = vpack.c.bf16 %v474_v37, %v467_v36  ;;  %v384_v4 = vld [vmem:[%s5033_s23 + $0x10] sm:$0xff]  ;;  %v4337_v37 = vld [vmem:[#allocation5 + $0x2a0] ss:$12 sps:$4 sm:$0xff]  }
  0xf9   : > { %3663 = vmatprep.subr.bf16.mxu1 %v4298_v10  ;;  %v4368_v35 = vld [vmem:[#allocation5 + $0x350] ss:$12 sps:$4 sm:$0xff]   ;;  %v4372_v36 = vld [vmem:[#allocation5 + $0x428] ss:$12 sps:$4 sm:$0xff]  }
  0xfa   : > { %2065 = vmatmul.mubr.bf16.gmra.mrb[4].mxu1 %v5067_v50  ;;  %v455_v61 = vld [vmem:[%s5033_s23 + $0x248] sm:$0xff] }
  0xfb   : > { %1593 = vmatpush1.bf16.msra.mxu0 %v4269_v51  ;;  %2072 = vmatprep.mubr.bf16.mxu1 %v5069_v53  ;;  %v481_v51 = vld [vmem:[%s5033_s23 + $0x318] sm:$0xff] }
  0xfc   : > { %1594 = vmatprep.subr.bf16.mxu0 %v4270_v52  ;;  %3664 = vmatpush3.bf16.msra.mxu1 %v4299_v11  ;;  %v488_v52 = vld [vmem:[%s5033_s23 + $0x350] sm:$0xff]  ;;  %v4330_v11 = vld [vmem:[#allocation5 + $0x25c] ss:$12 sps:$4 sm:$0xff]  }
  0xfd   : > { %3665 = vmatprep.subr.bf16.mxu1 %v4303_v16  ;;  %v5123_v56 = vpack.c.bf16 %v488_v52, %v481_v51  ;;  %v4333_v16 = vld [vmem:[#allocation5 + $0x274] ss:$12 sps:$4 sm:$0xff]   ;;  %v4382_v51 = vld [vmem:[#allocation5 + $0x458] ss:$12 sps:$4 sm:$0xff]   ;;  %v4343_v52 = vld [vmem:[#allocation5 + $0x2d0] ss:$12 sps:$4 sm:$0xff]  }
  0xff   : > { %1595 = vmatpush1.bf16.msra.mxu0 %v4272_v54  ;;  %v5121_v54 = vpack.c.bf16 %v473_v49, %v466_v48  ;;  %v448_v48 = vld [vmem:[%s5033_s23 + $0x210] sm:$0xff]  ;;  %v4378_v49 = vld [vmem:[#allocation5 + $0x380] ss:$12 sps:$4 sm:$0xff]  }
 0x100   : > { %1596 = vmatprep.subr.bf16.mxu0 %v4273_v55  ;;  %3666 = vmatpush3.bf16.msra.mxu1 %v4304_v17  ;;  %v4312_v55 = vld [vmem:[#allocation5 + $0x1fc] ss:$12 sps:$4 sm:$0xff]   ;;  %v398_v17 = vld [vmem:[%s5033_s23 + $0x80] sm:$0xff] }
 0x101   : > { %3667 = vmatprep.subr.bf16.mxu1 %v4308_v24 }
 0x102   : > { %2073 = vmatmul.mubr.bf16.gmra.mrb[8].mxu1 %v5077_v62 }
 0x103   : > { %1597 = vmatpush1.bf16.msra.mxu0 %v4275_v63  ;;  %2080 = vmatprep.mubr.bf16.mxu1 %v5079_v1  ;;  %v4315_v63 = vld [vmem:[#allocation5 + $0x210] ss:$12 sps:$4 sm:$0xff]  }
 0x104   : > { %1598 = vmatprep.subr.bf16.mxu0 %v4276_v0  ;;  %3668 = vmatpush3.bf16.msra.mxu1 %v4309_v25  ;;  %v4322_v0 = vld [vmem:[#allocation5 + $0x22c] ss:$12 sps:$4 sm:$0xff]  }
 0x105   : > { %3669 = vmatprep.subr.bf16.mxu1 %v4313_v29  ;;  %v4336_v25 = vld [vmem:[#allocation5 + $0x28c] ss:$12 sps:$4 sm:$0xff]   ;;  %v4367_v29 = vld [vmem:[#allocation5 + $0x410] ss:$12 sps:$4 sm:$0xff]  }
 0x107   : > { %1599 = vmatpush1.bf16.msra.mxu0 %v4278_v3  ;;  %v4327_v3 = vld [vmem:[#allocation5 + $0x244] ss:$12 sps:$4 sm:$0xff]  }
 0x108   : > { %1600 = vmatprep.subr.bf16.mxu0 %v4279_v5  ;;  %3670 = vmatpush3.bf16.msra.mxu1 %v4314_v31  ;;  %v391_v5 = vld [vmem:[%s5033_s23 + $0x48] sm:$0xff]  ;;  %v412_v31 = vld [vmem:[%s5033_s23 + $0xf0] sm:$0xff] }
 0x109   : > { %3671 = vmatprep.subr.bf16.mxu1 %v4318_v38  ;;  %v5145_v10 = vpack.c.bf16 %v391_v5, %v384_v4  ;;  %v4361_v5 = vld [vmem:[#allocation5 + $0x334] ss:$12 sps:$4 sm:$0xff]  }
 0x10a   : > { %2081 = vmatmul.mubr.bf16.gmra.mrb[12].mxu1 %v5087_v12 }
 0x10b   : > { %1601 = vmatpush1.bf16.msra.mxu0 %v4281_v13  ;;  %2088 = vmatprep.mubr.bf16.mxu1 %v5089_v15  ;;  %v5147_v13 = vpack.c.bf16 %v406_v8, %v399_v6  ;;  %v454_v6 = vld [vmem:[%s5033_s23 + $0x240] sm:$0xff]  ;;  %v469_v8 = vld [vmem:[%s5033_s23 + $0x2b8] sm:$0xff] }
 0x10c   : > { %1602 = vmatprep.subr.bf16.mxu0 %v4282_v14  ;;  %3672 = vmatpush3.bf16.msra.mxu1 %v4319_v39  ;;  %v4353_v14 = vld [vmem:[#allocation5 + $0x308] ss:$12 sps:$4 sm:$0xff]  }
 0x10d   : > { %3673 = vmatprep.subr.bf16.mxu1 %v4323_v44  ;;  %v4342_v39 = vld [vmem:[#allocation5 + $0x2bc] ss:$12 sps:$4 sm:$0xff]   ;;  %v4377_v44 = vld [vmem:[#allocation5 + $0x440] ss:$12 sps:$4 sm:$0xff]  }
 0x10f   : > { %1603 = vmatpush1.bf16.msra.mxu0 %v4284_v18  ;;  %v405_v18 = vld [vmem:[%s5033_s23 + $0xb8] sm:$0xff] }
 0x110   : > { %1685 = vmatprep.subr.bf16.mxu0 %v4287_v19  ;;  %v413_v19 = vld [vmem:[%s5033_s23 + $0xf8] sm:$0xff]  ;;  %v5157_v24 = vpack.c.bf16 %v405_v18, %v398_v17  ;;  %v475_v17 = vld [vmem:[%s5033_s23 + $0x2e8] sm:$0xff] }
 0x111   : > { %v483_v18 = vld [vmem:[%s5033_s23 + $0x328] sm:$0xff] }
 0x112   : > { %1605 = vmatmul.mubr.bf16.vlgmr.msra.gmra.mrb[0].mxu0 %v5057_v40  ;;  %2089 = vmatmul.mubr.bf16.gmra.mrb[16].mxu1 %v5097_v27  ;;  %v4295_v40 = vld [vmem:[#allocation5 + $0x1b0] ss:$12 sps:$4 sm:$0xff]  }
 0x113   : > { %1686 = vmatpush1.bf16.msra.mxu0 %v4285_v26  ;;  %1614 = vmatprep.mubr.bf16.mxu0 %v5059_v43  ;;  %v4324_v43 = vld [vmem:[#allocation5 + $0x230] ss:$12 sps:$4 sm:$0xff]   ;;  %v4334_v26 = vld [vmem:[#allocation5 + $0x288] ss:$12 sps:$4 sm:$0xff]  }
 0x114   : > { %1687 = vmatprep.subr.bf16.mxu0 %v4292_v28  ;;  %2096 = vmatprep.mubr.bf16.mxu1 %v5099_v30  ;;  %v4363_v28 = vld [vmem:[#allocation5 + $0x338] ss:$12 sps:$4 sm:$0xff]  }
 0x115   : > { %3674 = vmatpush3.bf16.msra.mxu1 %v4324_v43  ;;  %v426_v43 = vld [vmem:[%s5033_s23 + $0x160] sm:$0xff] }
 0x116   : > { %3723 = vmatprep.subr.bf16.mxu1 %v4352_v7  ;;  %v461_v7 = vld [vmem:[%s5033_s23 + $0x278] sm:$0xff] }
 0x117   : > { %1688 = vmatpush1.bf16.msra.mxu0 %v4290_v32  ;;  %v419_v32 = vld [vmem:[%s5033_s23 + $0x128] sm:$0xff] }
 0x118   : > { %1689 = vmatprep.subr.bf16.mxu0 %v4297_v33  ;;  %v427_v33 = vld [vmem:[%s5033_s23 + $0x168] sm:$0xff]  ;;  %v5169_v38 = vpack.c.bf16 %v419_v32, %v412_v31  ;;  %v394_v31 = vld [vmem:[%s5033_s23 + $0x60] sm:$0xff] }
 0x11a   : > { %1615 = vmatmul.mubr.bf16.gmra.mrb[4].mxu0 %v5067_v50  ;;  %2097 = vmatmul.mubr.bf16.gmra.mrb[20].mxu1 %v5109_v41  ;;  %v4305_v50 = vld [vmem:[#allocation5 + $0x1e0] ss:$12 sps:$4 sm:$0xff]  }
 0x11b   : > { %1690 = vmatpush1.bf16.msra.mxu0 %v4295_v40  ;;  %1624 = vmatprep.mubr.bf16.mxu0 %v5069_v53  ;;  %v4310_v53 = vld [vmem:[#allocation5 + $0x1f8] ss:$12 sps:$4 sm:$0xff]  }
 0x11c   : > { %1691 = vmatprep.subr.bf16.mxu0 %v4302_v42  ;;  %2104 = vmatprep.mubr.bf16.mxu1 %v5111_v45  ;;  %v4340_v40 = vld [vmem:[#allocation5 + $0x2b8] ss:$12 sps:$4 sm:$0xff]   ;;  %v4373_v42 = vld [vmem:[#allocation5 + $0x368] ss:$12 sps:$4 sm:$0xff]  }
 0x11f   : > { %1692 = vmatpush1.bf16.msra.mxu0 %v4300_v46  ;;  %v433_v46 = vld [vmem:[%s5033_s23 + $0x198] sm:$0xff] }
 0x120   : > { %1693 = vmatprep.subr.bf16.mxu0 %v4307_v47  ;;  %v441_v47 = vld [vmem:[%s5033_s23 + $0x1d8] sm:$0xff] }
 0x122   : > { %1625 = vmatmul.mubr.bf16.gmra.mrb[8].mxu0 %v5077_v62  ;;  %2105 = vmatmul.mubr.bf16.gmra.mrb[24].mxu1 %v5121_v54  ;;  %v5133_v62 = vpack.c.bf16 %v487_v59, %v480_v58  ;;  %v4351_v58 = vld [vmem:[#allocation5 + $0x304] ss:$12 sps:$4 sm:$0xff]  }
 0x123   : > { %1694 = vmatpush1.bf16.msra.mxu0 %v4305_v50  ;;  %1634 = vmatprep.mubr.bf16.mxu0 %v5079_v1  ;;  %v4320_v1 = vld [vmem:[#allocation5 + $0x228] ss:$12 sps:$4 sm:$0xff]   ;;  %v5181_v50 = vpack.c.bf16 %v433_v46, %v426_v43 }
 0x124   : > { %1695 = vmatprep.subr.bf16.mxu0 %v4312_v55  ;;  %2112 = vmatprep.mubr.bf16.mxu1 %v5123_v56  ;;  %v5183_v55 = vpack.c.bf16 %v448_v48, %v441_v47  ;;  %v440_v59 = vld [vmem:[%s5033_s23 + $0x1d0] sm:$0xff]  ;;  %v407_v48 = vld [vmem:[%s5033_s23 + $0xc8] sm:$0xff] }
 0x125   : > { %v4397_v46 = vld [vmem:[#allocation5 + $0x3f4] ss:$12 sps:$4 sm:$0xff]  }
 0x126   : > { %v400_v47 = vld [vmem:[%s5033_s23 + $0x90] sm:$0xff] }
 0x127   : > { %1696 = vmatpush1.bf16.msra.mxu0 %v4310_v53  ;;  %v4387_v53 = vld [vmem:[#allocation5 + $0x470] ss:$12 sps:$4 sm:$0xff]  }
 0x128   : > { %1697 = vmatprep.subr.bf16.mxu0 %v4317_v57  ;;  %v4346_v57 = vld [vmem:[#allocation5 + $0x2e8] ss:$12 sps:$4 sm:$0xff]  }
 0x12a   : > { %1635 = vmatmul.mubr.bf16.gmra.mrb[12].mxu0 %v5087_v12  ;;  %2113 = vmatmul.mubr.bf16.gmra.mrb[28].mxu1 %v5133_v62  ;;  %v4328_v12 = vld [vmem:[#allocation5 + $0x258] ss:$12 sps:$4 sm:$0xff]  }
 0x12b   : > { %1698 = vmatpush1.bf16.msra.mxu0 %v4315_v63  ;;  %1644 = vmatprep.mubr.bf16.mxu0 %v5089_v15  ;;  %v4357_v15 = vld [vmem:[#allocation5 + $0x3e0] ss:$12 sps:$4 sm:$0xff]   ;;  %v4388_v63 = vld [vmem:[#allocation5 + $0x3b0] ss:$12 sps:$4 sm:$0xff]  }
 0x12c   : > { %1699 = vmatprep.subr.bf16.mxu0 %v4322_v0  ;;  %2153 = vmatprep.mubr.bf16.mxu1 %v5135_v2  ;;  %v462_v0 = vld [vmem:[%s5033_s23 + $0x280] sm:$0xff] }
 0x12d   : > { %v5195_v4 = vpack.c.bf16 %v462_v0, %v455_v61  ;;  %v4401_v61 = vld [vmem:[#allocation5 + $0x420] ss:$12 sps:$4 sm:$0xff]   ;;  %v4406_v0 = vld [vmem:[#allocation5 + $0x43c] ss:$12 sps:$4 sm:$0xff]  }
 0x12f   : > { %1700 = vmatpush1.bf16.msra.mxu0 %v4320_v1  ;;  %v5193_v1 = vpack.c.bf16 %v447_v60, %v440_v59  ;;  %v429_v59 = vld [vmem:[%s5033_s23 + $0x178] sm:$0xff]  ;;  %v436_v60 = vld [vmem:[%s5033_s23 + $0x1b0] sm:$0xff] }
 0x130   : > { %1701 = vmatprep.subr.bf16.mxu0 %v4327_v3  ;;  %v4356_v3 = vld [vmem:[#allocation5 + $0x31c] ss:$12 sps:$4 sm:$0xff]  }
 0x132   : > { %1645 = vmatmul.mubr.bf16.gmra.mrb[16].mxu0 %v5097_v27  ;;  %2154 = vmatmul.mubr.bf16.vlgmr.msra.gmra.mrb[32].mxu1 %v5145_v10  ;;  %v5159_v27 = vpack.c.bf16 %v420_v20, %v413_v19  ;;  %v490_v19 = vld [vmem:[%s5033_s23 + $0x360] sm:$0xff] }
 0x133   : > { %1702 = vmatpush1.bf16.msra.mxu0 %v4325_v9  ;;  %1654 = vmatprep.mubr.bf16.mxu0 %v5099_v30  ;;  %v4339_v30 = vld [vmem:[#allocation5 + $0x2a4] ss:$12 sps:$4 sm:$0xff]   ;;  %v4369_v20 = vld [vmem:[#allocation5 + $0x360] ss:$12 sps:$4 sm:$0xff]  }
 0x134   : > { %1703 = vmatprep.subr.bf16.mxu0 %v4330_v11  ;;  %2161 = vmatprep.mubr.bf16.mxu1 %v5147_v13  ;;  %v476_v9 = vld [vmem:[%s5033_s23 + $0x2f0] sm:$0xff] }
 0x135   : > { %3724 = vmatpush3.bf16.msra.mxu1 %v4353_v14  ;;  %v4359_v11 = vld [vmem:[#allocation5 + $0x330] ss:$12 sps:$4 sm:$0xff]   ;;  %v5207_v14 = vpack.c.bf16 %v476_v9, %v469_v8  ;;  %v4412_v9 = vld [vmem:[#allocation5 + $0x46c] ss:$12 sps:$4 sm:$0xff]  }
 0x136   : > { %3725 = vmatprep.subr.bf16.mxu1 %v4357_v15  ;;  %v4371_v15 = vld [vmem:[#allocation5 + $0x364] ss:$12 sps:$4 sm:$0xff]  }
 0x137   : > { %1704 = vmatpush1.bf16.msra.mxu0 %v4328_v12  ;;  %v4366_v12 = vld [vmem:[#allocation5 + $0x34c] ss:$12 sps:$4 sm:$0xff]  }
 0x138   : > { %1705 = vmatprep.subr.bf16.mxu0 %v4333_v16  ;;  %v468_v16 = vld [vmem:[%s5033_s23 + $0x2b0] sm:$0xff] }
 0x139   : > { %3726 = vmatpush3.bf16.msra.mxu1 %v4358_v21  ;;  %v5217_v21 = vpack.c.bf16 %v475_v17, %v468_v16  ;;  %v464_v16 = vld [vmem:[%s5033_s23 + $0x290] sm:$0xff]  ;;  %v4413_v17 = vld [vmem:[#allocation5 + $0x480] ss:$12 sps:$4 sm:$0xff]  }
 0x13a   : > { %1655 = vmatmul.mubr.bf16.gmra.mrb[20].mxu0 %v5109_v41  ;;  %3727 = vmatprep.subr.bf16.mxu1 %v4362_v22  ;;  %v5171_v41 = vpack.c.bf16 %v434_v34, %v427_v33  ;;  %v4376_v22 = vld [vmem:[#allocation5 + $0x37c] ss:$12 sps:$4 sm:$0xff]   ;;  %v4386_v33 = vld [vmem:[#allocation5 + $0x3ac] ss:$12 sps:$4 sm:$0xff]  }
 0x13b   : > { %2162 = vmatmul.mubr.bf16.gmra.mrb[36].mxu1 %v5157_v24  ;;  %1706 = vmatpush1.bf16.msra.mxu0 %v4331_v23  ;;  %v5219_v23 = vpack.c.bf16 %v490_v19, %v483_v18  ;;  %v4384_v34 = vld [vmem:[#allocation5 + $0x3a8] ss:$12 sps:$4 sm:$0xff]  }
 0x13c   : > { %1707 = vmatprep.subr.bf16.mxu0 %v4336_v25  ;;  %1664 = vmatprep.mubr.bf16.mxu0 %v5111_v45  ;;  %v4345_v45 = vld [vmem:[#allocation5 + $0x2d4] ss:$12 sps:$4 sm:$0xff]   ;;  %v4374_v25 = vld [vmem:[#allocation5 + $0x378] ss:$12 sps:$4 sm:$0xff]  }
 0x13d   : > { %2169 = vmatprep.mubr.bf16.mxu1 %v5159_v27  ;;  %3728 = vmatpush3.bf16.msra.mxu1 %v4363_v28  ;;  %v489_v28 = vld [vmem:[%s5033_s23 + $0x358] sm:$0xff] }
 0x13e   : > { %3729 = vmatprep.subr.bf16.mxu1 %v4367_v29  ;;  %v4379_v29 = vld [vmem:[#allocation5 + $0x390] ss:$12 sps:$4 sm:$0xff]  }
 0x13f   : > { %1708 = vmatpush1.bf16.msra.mxu0 %v4334_v26  ;;  %v4381_v26 = vld [vmem:[#allocation5 + $0x394] ss:$12 sps:$4 sm:$0xff]  }
 0x140   : > { %1709 = vmatprep.subr.bf16.mxu0 %v4339_v30  ;;  %v387_v30 = vld [vmem:[%s5033_s23 + $0x28] sm:$0xff] }
 0x141   : > { %3730 = vmatpush3.bf16.msra.mxu1 %v4368_v35  ;;  %v5231_v35 = vpack.c.bf16 %v394_v31, %v387_v30 }
 0x142   : > { %1665 = vmatmul.mubr.bf16.gmra.mrb[24].mxu0 %v5121_v54  ;;  %3731 = vmatprep.subr.bf16.mxu1 %v4372_v36  ;;  %v4348_v54 = vld [vmem:[#allocation5 + $0x2ec] ss:$12 sps:$4 sm:$0xff]   ;;  %v4391_v36 = vld [vmem:[#allocation5 + $0x3c4] ss:$12 sps:$4 sm:$0xff]  }
 0x143   : > { %2170 = vmatmul.mubr.bf16.gmra.mrb[40].mxu1 %v5169_v38  ;;  %1710 = vmatpush1.bf16.msra.mxu0 %v4337_v37  ;;  %v386_v37 = vld [vmem:[%s5033_s23 + $0x20] sm:$0xff] }
 0x144   : > { %1711 = vmatprep.subr.bf16.mxu0 %v4342_v39  ;;  %1674 = vmatprep.mubr.bf16.mxu0 %v5123_v56  ;;  %v4383_v56 = vld [vmem:[#allocation5 + $0x398] ss:$12 sps:$4 sm:$0xff]  }
 0x145   : > { %2177 = vmatprep.mubr.bf16.mxu1 %v5171_v41  ;;  %3732 = vmatpush3.bf16.msra.mxu1 %v4373_v42  ;;  %v401_v39 = vld [vmem:[%s5033_s23 + $0x98] sm:$0xff] }
 0x146   : > { %3733 = vmatprep.subr.bf16.mxu1 %v4377_v44  ;;  %v4394_v42 = vld [vmem:[#allocation5 + $0x3dc] ss:$12 sps:$4 sm:$0xff]  }
 0x147   : > { %1712 = vmatpush1.bf16.msra.mxu0 %v4340_v40  ;;  %v408_v40 = vld [vmem:[%s5033_s23 + $0xd0] sm:$0xff] }
 0x148   : > { %1713 = vmatprep.subr.bf16.mxu0 %v4345_v45  ;;  %v4392_v45 = vld [vmem:[#allocation5 + $0x3d8] ss:$12 sps:$4 sm:$0xff]   ;;  %v5243_v43 = vpack.c.bf16 %v408_v40, %v401_v39  ;;  %v416_v40 = vld [vmem:[%s5033_s23 + $0x110] sm:$0xff] }
 0x149   : > { %3734 = vmatpush3.bf16.msra.mxu1 %v4378_v49  ;;  %v415_v49 = vld [vmem:[%s5033_s23 + $0x108] sm:$0xff]  ;;  %v409_v39 = vld [vmem:[%s5033_s23 + $0xd8] sm:$0xff] }
 0x14a   : > { %1675 = vmatmul.mubr.bf16.gmra.mrb[28].mxu0 %v5133_v62  ;;  %3735 = vmatprep.subr.bf16.mxu1 %v4382_v51  ;;  %v4349_v62 = vld [vmem:[#allocation5 + $0x300] ss:$12 sps:$4 sm:$0xff]  }
 0x14b   : > { %2178 = vmatmul.mubr.bf16.gmra.mrb[44].mxu1 %v5181_v50  ;;  %1714 = vmatpush1.bf16.msra.mxu0 %v4343_v52  ;;  %v422_v51 = vld [vmem:[%s5033_s23 + $0x140] sm:$0xff]  ;;  %v4395_v52 = vld [vmem:[#allocation5 + $0x3f0] ss:$12 sps:$4 sm:$0xff]  }
 0x14c   : > { %1715 = vmatprep.subr.bf16.mxu0 %v4348_v54  ;;  %1717 = vmatprep.mubr.bf16.mxu0 %v5135_v2  ;;  %v4354_v2 = vld [vmem:[#allocation5 + $0x318] ss:$12 sps:$4 sm:$0xff]   ;;  %v5253_v54 = vpack.c.bf16 %v407_v48, %v400_v47  ;;  %v451_v47 = vld [vmem:[%s5033_s23 + $0x228] sm:$0xff] }
 0x14d   : > { %2185 = vmatprep.mubr.bf16.mxu1 %v5183_v55  ;;  %3736 = vmatpush3.bf16.msra.mxu1 %v4383_v56  ;;  %v5255_v56 = vpack.c.bf16 %v422_v51, %v415_v49  ;;  %v458_v51 = vld [vmem:[%s5033_s23 + $0x260] sm:$0xff] }
 0x14e   : > { %3737 = vmatprep.subr.bf16.mxu1 %v4387_v53  ;;  %v4403_v53 = vld [vmem:[#allocation5 + $0x424] ss:$12 sps:$4 sm:$0xff]  }
 0x14f   : > { %1716 = vmatpush1.bf16.msra.mxu0 %v4346_v57  ;;  %v414_v57 = vld [vmem:[%s5033_s23 + $0x100] sm:$0xff] }
 0x150   : > { %1798 = vmatprep.subr.bf16.mxu0 %v4351_v58  ;;  %v421_v58 = vld [vmem:[%s5033_s23 + $0x138] sm:$0xff] }
 0x151   : > { %3738 = vmatpush3.bf16.msra.mxu1 %v4388_v63  ;;  %v512_v63 = vpack.c.bf16 %v421_v58, %v414_v57  ;;  %v493_v57 = vld [vmem:[%s5033_s23 + $0x378] sm:$0xff] }
 0x152   : > { %1718 = vmatmul.mubr.bf16.vlgmr.msra.gmra.mrb[0].mxu0 %v5145_v10  ;;  %v5205_v10 = vpack.c.bf16 %v461_v7, %v454_v6  ;;  %v450_v6 = vld [vmem:[%s5033_s23 + $0x220] sm:$0xff]  ;;  %v4407_v7 = vld [vmem:[#allocation5 + $0x450] ss:$12 sps:$4 sm:$0xff]  }
 0x153   : > { %2186 = vmatmul.mubr.bf16.gmra.mrb[48].mxu1 %v5193_v1  ;;  %1799 = vmatpush1.bf16.msra.mxu0 %v4349_v62  ;;  %v520_v62 = vpack.c.bf16 %v436_v60, %v429_v59 }
 0x154   : > { %1800 = vmatprep.subr.bf16.mxu0 %v4356_v3  ;;  %1727 = vmatprep.mubr.bf16.mxu0 %v5147_v13  ;;  %v4364_v13 = vld [vmem:[#allocation5 + $0x348] ss:$12 sps:$4 sm:$0xff]  }
 0x155   : > { %2193 = vmatprep.mubr.bf16.mxu1 %v5195_v4  ;;  %v4409_v3 = vld [vmem:[#allocation5 + $0x454] ss:$12 sps:$4 sm:$0xff]  }
 0x157   : > { %1801 = vmatpush1.bf16.msra.mxu0 %v4354_v2  ;;  %v435_v2 = vld [vmem:[%s5033_s23 + $0x1a8] sm:$0xff] }
 0x158   : > { %1802 = vmatprep.subr.bf16.mxu0 %v4361_v5  ;;  %v443_v5 = vld [vmem:[%s5033_s23 + $0x1e8] sm:$0xff] }
 0x15a   : > { %1728 = vmatmul.mubr.bf16.gmra.mrb[4].mxu0 %v5157_v24  ;;  %v4416_v24 = vld [vmem:[#allocation5 + $0x488] ss:$12 sps:$4 sm:$0xff]  }
 0x15b   : > { %2194 = vmatmul.mubr.bf16.gmra.mrb[52].mxu1 %v5205_v10  ;;  %1803 = vmatpush1.bf16.msra.mxu0 %v4359_v11  ;;  %v527_v11 = vpack.c.bf16 %v450_v6, %v443_v5 }
 0x15c   : > { %1804 = vmatprep.subr.bf16.mxu0 %v4366_v12  ;;  %1737 = vmatprep.mubr.bf16.mxu0 %v5159_v27  ;;  %v482_v27 = vld [vmem:[%s5033_s23 + $0x320] sm:$0xff] }
 0x15d   : > { %2201 = vmatprep.mubr.bf16.mxu1 %v5207_v14  ;;  %3892 = vmatprep.subr.bf16.mxu1 %v4416_v24  ;;  %v5229_v32 = vpack.c.bf16 %v489_v28, %v482_v27  ;;  %v4415_v12 = vld [vmem:[#allocation5 + $0x484] ss:$12 sps:$4 sm:$0xff]   ;;  %v477_v27 = vld [vmem:[%s5033_s23 + $0x2f8] sm:$0xff] }
 0x15e   : > { %v485_v28 = vld [vmem:[%s5033_s23 + $0x338] sm:$0xff] }
 0x15f   : > { %1805 = vmatpush1.bf16.msra.mxu0 %v4364_v13  ;;  %v449_v13 = vld [vmem:[%s5033_s23 + $0x218] sm:$0xff] }
 0x160   : > { %1806 = vmatprep.subr.bf16.mxu0 %v4371_v15  ;;  %v457_v15 = vld [vmem:[%s5033_s23 + $0x258] sm:$0xff] }
 0x161   : > { %v534_v19 = vpack.c.bf16 %v464_v16, %v457_v15 }
 0x162   : > { %1738 = vmatmul.mubr.bf16.gmra.mrb[8].mxu0 %v5169_v38  ;;  %v393_v38 = vld [vmem:[%s5033_s23 + $0x58] sm:$0xff] }
 0x163   : > { %2202 = vmatmul.mubr.bf16.gmra.mrb[56].mxu1 %v5217_v21  ;;  %1807 = vmatpush1.bf16.msra.mxu0 %v4369_v20  ;;  %v5241_v44 = vpack.c.bf16 %v393_v38, %v386_v37  ;;  %v456_v20 = vld [vmem:[%s5033_s23 + $0x250] sm:$0xff]  ;;  %v402_v38 = vld [vmem:[%s5033_s23 + $0xa0] sm:$0xff] }
 0x164   : > { %1808 = vmatprep.subr.bf16.mxu0 %v4376_v22  ;;  %1747 = vmatprep.mubr.bf16.mxu0 %v5171_v41  ;;  %v4389_v41 = vld [vmem:[#allocation5 + $0x3c0] ss:$12 sps:$4 sm:$0xff]  }
 0x165   : > { %2209 = vmatprep.mubr.bf16.mxu1 %v5219_v23  ;;  %v471_v22 = vld [vmem:[%s5033_s23 + $0x2c8] sm:$0xff] }
 0x167   : > { %1809 = vmatpush1.bf16.msra.mxu0 %v4374_v25 }
 0x168   : > { %1810 = vmatprep.subr.bf16.mxu0 %v4381_v26  ;;  %v470_v26 = vld [vmem:[%s5033_s23 + $0x2c0] sm:$0xff] }
 0x169   : > { %v540_v30 = vpack.c.bf16 %v477_v27, %v470_v26 }
 0x16a   : > { %1748 = vmatmul.mubr.bf16.gmra.mrb[12].mxu0 %v5181_v50  ;;  %v4400_v50 = vld [vmem:[#allocation5 + $0x40c] ss:$12 sps:$4 sm:$0xff]  }
 0x16b   : > { %2210 = vmatmul.mubr.bf16.gmra.mrb[60].mxu1 %v5229_v32  ;;  %1811 = vmatpush1.bf16.msra.mxu0 %v4379_v29  ;;  %v492_v29 = vld [vmem:[%s5033_s23 + $0x370] sm:$0xff] }
 0x16c   : > { %1812 = vmatprep.subr.bf16.mxu0 %v4386_v33  ;;  %1757 = vmatprep.mubr.bf16.mxu0 %v5183_v55  ;;  %v4398_v55 = vld [vmem:[#allocation5 + $0x408] ss:$12 sps:$4 sm:$0xff]   ;;  %v548_v31 = vpack.c.bf16 %v492_v29, %v485_v28  ;;  %v4417_v28 = vld [vmem:[#allocation8 + $0x80] sm:$0xff]  }
 0x16d   : > { %2250 = vmatprep.mubr.bf16.mxu1 %v5231_v35  ;;  %v491_v33 = vld [vmem:[%s5033_s23 + $0x368] sm:$0xff] }
 0x16f   : > { %1813 = vmatpush1.bf16.msra.mxu0 %v4384_v34  ;;  %v388_v34 = vld [vmem:[%s5033_s23 + $0x30] sm:$0xff] }
 0x170   : > { %1814 = vmatprep.subr.bf16.mxu0 %v4391_v36 }
 0x172   : > { %1758 = vmatmul.mubr.bf16.gmra.mrb[16].mxu0 %v5193_v1  ;;  %v4404_v1 = vld [vmem:[#allocation5 + $0x438] ss:$12 sps:$4 sm:$0xff]  }
 0x173   : > { %2251 = vmatmul.mubr.bf16.vlgmr.msra.gmra.mrb[64].mxu1 %v5241_v44  ;;  %1815 = vmatpush1.bf16.msra.mxu0 %v4389_v41  ;;  %v423_v41 = vld [vmem:[%s5033_s23 + $0x148] sm:$0xff] }
 0x174   : > { %1816 = vmatprep.subr.bf16.mxu0 %v4394_v42  ;;  %1767 = vmatprep.mubr.bf16.mxu0 %v5195_v4  ;;  %v428_v4 = vld [vmem:[%s5033_s23 + $0x170] sm:$0xff]  ;;  %v507_v42 = vpack.c.bf16 %v409_v39, %v402_v38 }
 0x175   : > { %2258 = vmatprep.mubr.bf16.mxu1 %v5243_v43  ;;  %3893 = vmatpush3.bf16.msra.mxu1 %v4416_v24  ;;  %v519_v8 = vpack.c.bf16 %v435_v2, %v428_v4 }
 0x177   : > { %1817 = vmatpush1.bf16.msra.mxu0 %v4392_v45  ;;  %v430_v45 = vld [vmem:[%s5033_s23 + $0x180] sm:$0xff] }
 0x178   : > { %1818 = vmatprep.subr.bf16.mxu0 %v4397_v46  ;;  %v444_v46 = vld [vmem:[%s5033_s23 + $0x1f0] sm:$0xff] }
 0x179   : > { %v5304_v49 = vpack.c.bf16 %v451_v47, %v444_v46  ;;  %v5373_v46 = vld [vmem:[#allocation7] sm:$0x7] }
 0x17a   : > { %1768 = vmatmul.mubr.bf16.gmra.mrb[20].mxu0 %v5205_v10  ;;  %v4410_v10 = vld [vmem:[#allocation5 + $0x468] ss:$12 sps:$4 sm:$0xff]  }
 0x17b   : > { %2259 = vmatmul.mubr.bf16.gmra.mrb[68].mxu1 %v5253_v54  ;;  %1819 = vmatpush1.bf16.msra.mxu0 %v4395_v52  ;;  %v465_v52 = vld [vmem:[%s5033_s23 + $0x298] sm:$0xff] }
 0x17c   : > { %1820 = vmatprep.subr.bf16.mxu0 %v4400_v50  ;;  %1777 = vmatprep.mubr.bf16.mxu0 %v5207_v14  ;;  %v442_v14 = vld [vmem:[%s5033_s23 + $0x1e0] sm:$0xff]  ;;  %v472_v50 = vld [vmem:[%s5033_s23 + $0x2d0] sm:$0xff] }
 0x17d   : > { %2266 = vmatprep.mubr.bf16.mxu1 %v5255_v56  ;;  %v526_v18 = vpack.c.bf16 %v449_v13, %v442_v14 }
 0x17f   : > { %1821 = vmatpush1.bf16.msra.mxu0 %v4398_v55  ;;  %v5313_v55 = vpack.c.bf16 %v465_v52, %v458_v51 }
 0x180   : > { %1822 = vmatprep.subr.bf16.mxu0 %v4403_v53  ;;  %v486_v53 = vld [vmem:[%s5033_s23 + $0x340] sm:$0xff] }
 0x181   : > { %v5323_v59 = vpack.c.bf16 %v493_v57, %v486_v53 }
 0x182   : > { %1778 = vmatmul.mubr.bf16.gmra.mrb[24].mxu0 %v5217_v21  ;;  %v463_v21 = vld [vmem:[%s5033_s23 + $0x288] sm:$0xff] }
 0x183   : > { %2267 = vmatmul.mubr.bf16.gmra.mrb[72].mxu1 %v512_v63  ;;  %1823 = vmatpush1.bf16.msra.mxu0 %v4401_v61  ;;  %v533_v24 = vpack.c.bf16 %v463_v21, %v456_v20 }
 0x184   : > { %1824 = vmatprep.subr.bf16.mxu0 %v4406_v0  ;;  %1787 = vmatprep.mubr.bf16.mxu0 %v5219_v23  ;;  %v478_v23 = vld [vmem:[%s5033_s23 + $0x300] sm:$0xff] }
 0x185   : > { %2274 = vmatprep.mubr.bf16.mxu1 %v520_v62  ;;  %v541_v25 = vpack.c.bf16 %v478_v23, %v471_v22 }
 0x187   : > { %1825 = vmatpush1.bf16.msra.mxu0 %v4404_v1  ;;  %v4740_v1 = vmov 0  }
 0x188   : > { %1826 = vmatprep.subr.bf16.mxu0 %v4409_v3 }
 0x18a   : > { %1788 = vmatmul.mubr.bf16.gmra.mrb[28].mxu0 %v5229_v32  ;;  %v484_v32 = vld [vmem:[%s5033_s23 + $0x330] sm:$0xff] }
 0x18b   : > { %2275 = vmatmul.mubr.bf16.gmra.mrb[76].mxu1 %v519_v8  ;;  %1827 = vmatpush1.bf16.msra.mxu0 %v4407_v7  ;;  %v547_v36 = vpack.c.bf16 %v491_v33, %v484_v32  ;;  %v4418_v33 = vld [vmem:[#allocation8 + $0x88] sm:$0xff]  }
 0x18c   : > { %1828 = vmatprep.subr.bf16.mxu0 %v4412_v9  ;;  %1830 = vmatprep.mubr.bf16.mxu0 %v5231_v35  ;;  %v395_v35 = vld [vmem:[%s5033_s23 + $0x68] sm:$0xff] }
 0x18d   : > { %2282 = vmatprep.mubr.bf16.mxu1 %v527_v11  ;;  %v500_v37 = vpack.c.bf16 %v395_v35, %v388_v34  ;;  %v748_v34 = vlaneseq }
 0x18f   : > { %1829 = vmatpush1.bf16.msra.mxu0 %v4410_v10 }
 0x190   : > { %1911 = vmatprep.subr.bf16.mxu0 %v4415_v12 }
 0x192   : > { %1831 = vmatmul.mubr.bf16.vlgmr.msra.gmra.mrb[0].mxu0 %v5241_v44  ;;  %v514_v44 = vpack.c.bf16 %v423_v41, %v416_v40  ;;  %v5365_v41 = vshrl.u32 %v748_v34, 7 }
 0x193   : > { %2283 = vmatmul.mubr.bf16.gmra.mrb[80].mxu1 %v526_v18  ;;  %1912 = vmatpush1.bf16.msra.mxu0 %v4413_v17 }
 0x194   : > { %1840 = vmatprep.mubr.bf16.mxu0 %v5243_v43  ;;  %2290 = vmatprep.mubr.bf16.mxu1 %v534_v19  ;;  %v437_v43 = vld [vmem:[%s5033_s23 + $0x1b8] sm:$0xff] }
 0x195   : > { %v521_v48 = vpack.c.bf16 %v437_v43, %v430_v45  ;;  %3910 = vmatprep.subr.bf16.mxu0 %v4417_v28  ;;  %v758_v45 = vsub.s32 2, %v5365_v41 }
 0x19a   : > { %1841 = vmatmul.mubr.bf16.gmra.mrb[4].mxu0 %v5253_v54  ;;  %v479_v54 = vld [vmem:[%s5033_s23 + $0x308] sm:$0xff] }
 0x19b   : > { %2291 = vmatmul.mubr.bf16.gmra.mrb[84].mxu1 %v533_v24  ;;  %1850 = vmatprep.mubr.bf16.mxu0 %v5255_v56  ;;  %v5315_v56 = vpack.c.bf16 %v479_v54, %v472_v50  ;;  %v5378_v50 = vrot.slane %v5373_v46, %v758_v45 }
 0x19c   : > { %2298 = vmatprep.mubr.bf16.mxu1 %v541_v25 }
 0x1a2   : > { %1851 = vmatmul.mubr.bf16.gmra.mrb[8].mxu0 %v512_v63 }
 0x1a3   : > { %2299 = vmatmul.mubr.bf16.gmra.mrb[88].mxu1 %v540_v30  ;;  %1860 = vmatprep.mubr.bf16.mxu0 %v520_v62 }
 0x1a4   : > { %2306 = vmatprep.mubr.bf16.mxu1 %v548_v31 }
 0x1aa   : > { %1861 = vmatmul.mubr.bf16.gmra.mrb[12].mxu0 %v519_v8 }
 0x1ab   : > { %2307 = vmatmul.mubr.bf16.gmra.mrb[92].mxu1 %v547_v36  ;;  %1870 = vmatprep.mubr.bf16.mxu0 %v527_v11 }
 0x1ac   : > { %3894 = vmatprep.mubr.msk.bf16.mxu1 %vm1547_vm0, %v500_v37 }
 0x1b2   : > { %1871 = vmatmul.mubr.bf16.gmra.mrb[16].mxu0 %v526_v18 }
 0x1b3   : > { %3895 = vmatmul.mubr.msk.bf16.vlgmr.msra.gmra.mrb[96].mxu1 %vm1547_vm0, %v507_v42  ;;  %1880 = vmatprep.mubr.bf16.mxu0 %v534_v19 }
 0x1b4   : > { %3898 = vmatprep.mubr.msk.bf16.mxu1 %vm1547_vm0, %v514_v44 }
 0x1ba   : > { %1881 = vmatmul.mubr.bf16.gmra.mrb[20].mxu0 %v533_v24 }
 0x1bb   : > { %3899 = vmatmul.mubr.msk.bf16.gmra.mrb[100].mxu1 %vm1547_vm0, %v521_v48  ;;  %1890 = vmatprep.mubr.bf16.mxu0 %v541_v25 }
 0x1bc   : > { %3902 = vmatprep.mubr.msk.bf16.mxu1 %vm1547_vm0, %v5304_v49 }
 0x1c2   : > { %1891 = vmatmul.mubr.bf16.gmra.mrb[24].mxu0 %v540_v30 }
 0x1c3   : > { %3903 = vmatmul.mubr.msk.bf16.gmra.mrb[104].mxu1 %vm1547_vm0, %v5313_v55  ;;  %1900 = vmatprep.mubr.bf16.mxu0 %v548_v31 }
 0x1c4   : > { %3906 = vmatprep.mubr.msk.bf16.mxu1 %vm1547_vm0, %v5315_v56 }
 0x1c5   : > { %v3611_v58 = vpop.f32.mrb[0].mxu1 }
 0x1c6   : > { %v3612_v60 = vpop.f32.mrb[1].mxu1 }
 0x1c7   : > { %v5325_v61 = vadd.f32 %v3612_v60, %v3611_v58  ;;  %v3614_v63 = vpop.f32.mrb[2].mxu1  ;;  %v4423_v60 = vld [vmem:[#allocation8 + $0xb0] sm:$0xff]  }
 0x1c8   : > { %v3615_v0 = vpop.f32.mrb[3].mxu1 }
 0x1c9   : > { %v5327_v62 = vadd.f32 %v3615_v0, %v3614_v63  ;;  %v2059_v53 = vadd.f32 %v5325_v61, %v5378_v50 }
 0x1ca   : > { %1901 = vmatmul.mubr.bf16.gmra.mrb[28].mxu0 %v547_v36 }
 0x1cb   : > { %3907 = vmatmul.mubr.msk.bf16.gmra.mrb[108].mxu1 %vm1547_vm0, %v5323_v59  ;;  %1943 = vmatprep.mubr.bf16.mxu0 %v4740_v1  ;;  %v2062_v63 = vadd.f32 %v5327_v62, %v5378_v50 }
 0x1cd   : > { %v3617_v3 = vpop.f32.mrb[4].mxu1 }
 0x1ce   : > { %v3618_v4 = vpop.f32.mrb[5].mxu1 }
 0x1cf   : > { %v5332_v2 = vadd.f32 %v3618_v4, %v3617_v3  ;;  %v3620_v5 = vpop.f32.mrb[6].mxu1 }
 0x1d0   : > { %v3621_v6 = vpop.f32.mrb[7].mxu1 }
 0x1d1   : > { %v5335_v7 = vadd.f32 %v3621_v6, %v3620_v5  ;;  %v4424_v5 = vld [vmem:[#allocation8 + $0xb8] sm:$0xff]   ;;  %v2067_v6 = vadd.f32 %v5332_v2, %v5378_v50  ;;  %v4428_v2 = vld [vmem:[#allocation8 + $0x8] sm:$0xff]  }
 0x1d2   : > { %3460 = vmatmul.mubr.msk.bf16.vlgmr.msra.gmra.mrb[0].mxu0 %vm1547_vm0, %v500_v37  ;;  %v4419_v37 = vld [vmem:[#allocation8 + $0x90] sm:$0xff]  }
 0x1d3   : > { %1953 = vmatprep.mubr.bf16.mxu0 %v4740_v1  ;;  %3911 = vmatpush3.bf16.msra.mxu0 %v4417_v28 }
 0x1d4   : > { %3912 = vmatprep.subr.bf16.mxu0 %v4418_v33 }
 0x1d5   : > { %v3623_v8 = vpop.f32.mrb[8].mxu1 }
 0x1d6   : > { %v3624_v9 = vpop.f32.mrb[9].mxu1 }
 0x1d7   : > { %v5338_v11 = vadd.f32 %v3624_v9, %v3623_v8  ;;  %v3626_v10 = vpop.f32.mrb[10].mxu1  ;;  %3913 = vmatpush3.bf16.msra.mxu0 %v4418_v33  ;;  %v4425_v9 = vld [vmem:[#allocation8 + $0x40] sm:$0xff]  }
 0x1d8   : > { %v3627_v12 = vpop.f32.mrb[11].mxu1  ;;  %3914 = vmatprep.subr.bf16.mxu0 %v4419_v37  ;;  %3796 = vmatprep.subr.bf16.mxu1 %v4425_v9 }
 0x1d9   : > { %v5341_v14 = vadd.f32 %v3627_v12, %v3626_v10  ;;  %v2070_v10 = vadd.f32 %v5335_v7, %v5378_v50 }
 0x1da   : > { %3461 = vmatmul.mubr.msk.bf16.gmra.mrb[4].mxu0 %vm1547_vm0, %v507_v42 }
 0x1db   : > { %1963 = vmatprep.mubr.bf16.mxu0 %v4740_v1  ;;  %3915 = vmatpush3.bf16.msra.mxu0 %v4419_v37 }
 0x1dd   : > { %v3629_v13 = vpop.f32.mrb[12].mxu1 }
 0x1de   : > { %v3630_v15 = vpop.f32.mrb[13].mxu1 }
 0x1df   : > { %v5344_v16 = vadd.f32 %v3630_v15, %v3629_v13  ;;  %v3632_v17 = vpop.f32.mrb[14].mxu1  ;;  %v4426_v15 = vld [vmem:[#allocation8] sm:$0xff]  }
 0x1e0   : > { %v3633_v18 = vpop.f32.mrb[15].mxu1  ;;  %3797 = vmatpush3.bf16.msra.mxu1 %v4426_v15 }
 0x1e1   : > { %v5347_v19 = vadd.f32 %v3633_v18, %v3632_v17 }
 0x1e2   : > { %3462 = vmatmul.mubr.msk.bf16.gmra.mrb[8].mxu0 %vm1547_vm0, %v514_v44  ;;  %v4420_v44 = vld [vmem:[#allocation8 + $0x98] sm:$0xff]  }
 0x1e3   : > { %1973 = vmatprep.mubr.bf16.mxu0 %v4740_v1  ;;  %3916 = vmatprep.subr.bf16.mxu0 %v4420_v44  ;;  %v2086_v45 = vadd.f32 %v5347_v19, %v5378_v50 }
 0x1e4   : > { %3917 = vmatpush3.bf16.msra.mxu0 %v4420_v44  ;;  %v4433_v44 = vld [vmem:[#allocation8 + $0x60] sm:$0xff]  }
 0x1e5   : > { %v3635_v20 = vpop.f32.mrb[16].mxu1 }
 0x1e6   : > { %v3636_v21 = vpop.f32.mrb[17].mxu1 }
 0x1e7   : > { %v5350_v22 = vadd.f32 %v3636_v21, %v3635_v20  ;;  %v3638_v23 = vpop.f32.mrb[18].mxu1  ;;  %v4427_v20 = vld [vmem:[#allocation8 + $0x48] sm:$0xff]  }
 0x1e8   : > { %v3639_v24 = vpop.f32.mrb[19].mxu1  ;;  %3798 = vmatprep.subr.bf16.mxu1 %v4427_v20 }
 0x1e9   : > { %v5353_v25 = vadd.f32 %v3639_v24, %v3638_v23  ;;  %v2075_v23 = vadd.f32 %v5338_v11, %v5378_v50  ;;  %3799 = vmatpush3.bf16.msra.mxu1 %v4428_v2  ;;  %v4432_v11 = vld [vmem:[#allocation8 + $0x18] sm:$0xff]  }
 0x1ea   : > { %3463 = vmatmul.mubr.msk.bf16.gmra.mrb[12].mxu0 %vm1547_vm0, %v521_v48  ;;  %v4421_v48 = vld [vmem:[#allocation8 + $0xa0] sm:$0xff]  }
 0x1eb   : > { %1983 = vmatprep.mubr.bf16.mxu0 %v4740_v1  ;;  %3918 = vmatprep.subr.bf16.mxu0 %v4421_v48 }
 0x1ec   : > { %3919 = vmatpush3.bf16.msra.mxu0 %v4421_v48  ;;  %v4434_v48 = vld [vmem:[#allocation8 + $0x20] sm:$0xff]  }
 0x1ed   : > { %v3641_v26 = vpop.f32.mrb[20].mxu1 }
 0x1ee   : > { %v3642_v27 = vpop.f32.mrb[21].mxu1 }
 0x1ef   : > { %v5356_v29 = vadd.f32 %v3642_v27, %v3641_v26  ;;  %v3644_v30 = vpop.f32.mrb[22].mxu1  ;;  %v4429_v26 = vld [vmem:[#allocation8 + $0x50] sm:$0xff]   ;;  %v2078_v27 = vadd.f32 %v5341_v14, %v5378_v50 }
 0x1f0   : > { %v3645_v31 = vpop.f32.mrb[23].mxu1  ;;  %3800 = vmatprep.subr.bf16.mxu1 %v4429_v26 }
 0x1f1   : > { %v5360_v32 = vadd.f32 %v3645_v31, %v3644_v30  ;;  %v4430_v31 = vld [vmem:[#allocation8 + $0x10] sm:$0xff]  }
 0x1f2   : > { %3464 = vmatmul.mubr.msk.bf16.gmra.mrb[16].mxu0 %vm1547_vm0, %v5304_v49  ;;  %3801 = vmatpush3.bf16.msra.mxu1 %v4430_v31 }
 0x1f3   : > { %1993 = vmatprep.mubr.bf16.mxu0 %v4740_v1 }
 0x1f5   : > { %v3647_v35 = vpop.f32.mrb[24].mxu1 }
 0x1f6   : > { %v3648_v36 = vpop.f32.mrb[25].mxu1 }
 0x1f7   : > { %v5363_v38 = vadd.f32 %v3648_v36, %v3647_v35  ;;  %v3650_v39 = vpop.f32.mrb[26].mxu1  ;;  %v4431_v36 = vld [vmem:[#allocation8 + $0x58] sm:$0xff]  }
 0x1f8   : > { %v3651_v40 = vpop.f32.mrb[27].mxu1  ;;  %3802 = vmatprep.subr.bf16.mxu1 %v4431_v36 }
 0x1f9   : > { %v5369_v42 = vadd.f32 %v3651_v40, %v3650_v39  ;;  %v2083_v39 = vadd.f32 %v5344_v16, %v5378_v50  ;;  %3803 = vmatpush3.bf16.msra.mxu1 %v4432_v11  ;;  %v4436_v16 = vld [vmem:[#allocation8 + $0x28] sm:$0xff]  }
 0x1fa   : > { %3465 = vmatmul.mubr.msk.bf16.gmra.mrb[20].mxu0 %vm1547_vm0, %v5313_v55  ;;  %v4422_v55 = vld [vmem:[#allocation8 + $0xa8] sm:$0xff]   ;;  %3804 = vmatprep.subr.bf16.mxu1 %v4433_v44 }
 0x1fb   : > { %2003 = vmatprep.mubr.bf16.mxu0 %v4740_v1  ;;  %3920 = vmatprep.subr.bf16.mxu0 %v4422_v55 }
 0x1fc   : > { %3921 = vmatpush3.bf16.msra.mxu0 %v4422_v55 }
 0x1fd   : > { %v3653_v43 = vpop.f32.mrb[28].mxu1  ;;  %3922 = vmatprep.subr.bf16.mxu0 %v4423_v60  ;;  %3805 = vmatpush3.bf16.msra.mxu1 %v4434_v48 }
 0x1fe   : > { %v3654_v47 = vpop.f32.mrb[29].mxu1 }
 0x1ff   : > { %v5375_v49 = vadd.f32 %v3654_v47, %v3653_v43  ;;  %v3656_v51 = vpop.f32.mrb[30].mxu1 }
 0x200   : > { %v3657_v52 = vpop.f32.mrb[31].mxu1  ;;  %3923 = vmatpush3.bf16.msra.mxu0 %v4423_v60 }
 0x201   : > { %v5382_v54 = vadd.f32 %v3657_v52, %v3656_v51  ;;  %3924 = vmatprep.subr.bf16.mxu0 %v4424_v5 }
 0x202   : > { %3466 = vmatmul.mubr.msk.bf16.gmra.mrb[24].mxu0 %vm1547_vm0, %v5315_v56 }
 0x203   : > { %2013 = vmatprep.mubr.bf16.mxu0 %v4740_v1 }
 0x204   : > { %3925 = vmatpush3.bf16.msra.mxu0 %v4424_v5 }
 0x205   : > { %v3675_v57 = vpop.f32.mrb[32].mxu1 }
 0x206   : > { %v3676_v58 = vpop.f32.mrb[33].mxu1 }
 0x207   : > { %v3677_v0 = vadd.f32 %v3676_v58, %v3675_v57  ;;  %v3678_v3 = vpop.f32.mrb[34].mxu1  ;;  %v2091_v58 = vadd.f32 %v5350_v22, %v5378_v50  ;;  %v4440_v22 = vld [vmem:[#allocation8 + $0x38] sm:$0xff]  }
 0x208   : > { %v3679_v56 = vpop.f32.mrb[35].mxu1 }
 0x209   : > { %v5389_v4 = vadd.f32 %v3677_v0, %v2059_v53  ;;  %v3680_v1 = vadd.f32 %v3679_v56, %v3678_v3  ;;  %v4435_v53 = vld [vmem:[#allocation8 + $0x68] sm:$0xff]   ;;  %v2094_v0 = vadd.f32 %v5353_v25, %v5378_v50 }
 0x20a   : > { %3467 = vmatmul.mubr.msk.bf16.gmra.mrb[28].mxu0 %vm1547_vm0, %v5323_v59  ;;  %3806 = vmatprep.subr.bf16.mxu1 %v4435_v53 }
 0x20b   : > { %v5393_v61 = vadd.f32 %v3680_v1, %v2062_v63  ;;  %3807 = vmatpush3.bf16.msra.mxu1 %v4436_v16  ;;  %v4437_v63 = vld [vmem:[#allocation8 + $0x70] sm:$0xff]  }
 0x20c   : > { %v4438_v1 = vld [vmem:[#allocation8 + $0x30] sm:$0xff]   ;;  %3808 = vmatprep.subr.bf16.mxu1 %v4437_v63 }
 0x20e   : > { %v3681_v8 = vpop.f32.mrb[36].mxu1 }
 0x20f   : > { %v3682_v62 = vpop.f32.mrb[37].mxu1  ;;  %3809 = vmatpush3.bf16.msra.mxu1 %v4438_v1 }
 0x210   : > { %v3683_v12 = vadd.f32 %v3682_v62, %v3681_v8  ;;  %v3684_v13 = vpop.f32.mrb[38].mxu1  ;;  %v4439_v62 = vld [vmem:[#allocation8 + $0x78] sm:$0xff]  }
 0x211   : > { %v3685_v59 = vpop.f32.mrb[39].mxu1  ;;  %3810 = vmatprep.subr.bf16.mxu1 %v4439_v62 }
 0x212   : > { %v5399_v17 = vadd.f32 %v3683_v12, %v2067_v6  ;;  %v3686_v18 = vadd.f32 %v3685_v59, %v3684_v13  ;;  %v2102_v13 = vadd.f32 %v5360_v32, %v5378_v50 }
 0x213   : > { %3811 = vmatpush3.bf16.msra.mxu1 %v4440_v22 }
 0x214   : > { %v5401_v21 = vadd.f32 %v3686_v18, %v2070_v10  ;;  %v2099_v10 = vadd.f32 %v5356_v29, %v5378_v50  ;;  %v2110_v29 = vadd.f32 %v5369_v42, %v5378_v50 }
 0x216   : > { %v3687_v24 = vpop.f32.mrb[40].mxu1 }
 0x217   : > { %v3688_v7 = vpop.f32.mrb[41].mxu1 }
 0x218   : > { %v3689_v28 = vadd.f32 %v3688_v7, %v3687_v24  ;;  %v3690_v30 = vpop.f32.mrb[42].mxu1  ;;  %v2107_v24 = vadd.f32 %v5363_v38, %v5378_v50  ;;  %v2118_v38 = vadd.f32 %v5382_v54, %v5378_v50 }
 0x219   : > { %v3691_v33 = vpop.f32.mrb[43].mxu1 }
 0x21a   : > { %v5407_v34 = vadd.f32 %v3689_v28, %v2075_v23  ;;  %v3692_v35 = vadd.f32 %v3691_v33, %v3690_v30 }
 0x21c   : > { %v5409_v37 = vadd.f32 %v3692_v35, %v2078_v27  ;;  %v2115_v35 = vadd.f32 %v5375_v49, %v5378_v50 }
 0x21e   : > { %v3693_v40 = vpop.f32.mrb[44].mxu1 }
 0x21f   : > { %v3694_v14 = vpop.f32.mrb[45].mxu1 }
 0x220   : > { %v3695_v43 = vadd.f32 %v3694_v14, %v3693_v40  ;;  %v3696_v47 = vpop.f32.mrb[46].mxu1 }
 0x221   : > { %v3697_v51 = vpop.f32.mrb[47].mxu1 }
 0x222   : > { %v5415_v52 = vadd.f32 %v3695_v43, %v2083_v39  ;;  %v3698_v55 = vadd.f32 %v3697_v51, %v3696_v47 }
 0x224   : > { %v5417_v57 = vadd.f32 %v3698_v55, %v2086_v45 }
 0x226   : > { %v3699_v60 = vpop.f32.mrb[48].mxu1 }
 0x227   : > { %v3700_v19 = vpop.f32.mrb[49].mxu1 }
 0x228   : > { %v3701_v3 = vadd.f32 %v3700_v19, %v3699_v60  ;;  %v3702_v56 = vpop.f32.mrb[50].mxu1 }
 0x229   : > { %v3703_v5 = vpop.f32.mrb[51].mxu1 }
 0x22a   : > { %v5423_v6 = vadd.f32 %v3701_v3, %v2091_v58  ;;  %v3704_v8 = vadd.f32 %v3703_v5, %v3702_v56 }
 0x22c   : > { %v5425_v9 = vadd.f32 %v3704_v8, %v2094_v0 }
 0x22e   : > { %v3705_v12 = vpop.f32.mrb[52].mxu1 }
 0x22f   : > { %v3706_v25 = vpop.f32.mrb[53].mxu1 }
 0x230   : > { %v3707_v15 = vadd.f32 %v3706_v25, %v3705_v12  ;;  %v3708_v59 = vpop.f32.mrb[54].mxu1 }
 0x231   : > { %v3709_v18 = vpop.f32.mrb[55].mxu1 }
 0x232   : > { %v5431_v20 = vadd.f32 %v3707_v15, %v2099_v10  ;;  %v3710_v2 = vadd.f32 %v3709_v18, %v3708_v59 }
 0x234   : > { %v5433_v23 = vadd.f32 %v3710_v2, %v2102_v13 }
 0x236   : > { %v3711_v7 = vpop.f32.mrb[56].mxu1 }
 0x237   : > { %v3712_v26 = vpop.f32.mrb[57].mxu1 }
 0x238   : > { %v3713_v27 = vadd.f32 %v3712_v26, %v3711_v7  ;;  %v3714_v28 = vpop.f32.mrb[58].mxu1 }
 0x239   : > { %v3715_v30 = vpop.f32.mrb[59].mxu1 }
 0x23a   : > { %v5439_v32 = vadd.f32 %v3713_v27, %v2107_v24  ;;  %v3716_v31 = vadd.f32 %v3715_v30, %v3714_v28 }
 0x23c   : > { %v5441_v33 = vadd.f32 %v3716_v31, %v2110_v29 }
 0x23e   : > { %v3717_v36 = vpop.f32.mrb[60].mxu1 }
 0x23f   : > { %v3718_v11 = vpop.f32.mrb[61].mxu1 }
 0x240   : > { %v3719_v39 = vadd.f32 %v3718_v11, %v3717_v36  ;;  %v3720_v40 = vpop.f32.mrb[62].mxu1 }
 0x241   : > { %v3721_v14 = vpop.f32.mrb[63].mxu1 }
 0x242   : > { %v5447_v42 = vadd.f32 %v3719_v39, %v2115_v35  ;;  %v3722_v44 = vadd.f32 %v3721_v14, %v3720_v40 }
 0x244   : > { %v5449_v45 = vadd.f32 %v3722_v44, %v2118_v38 }
 0x246   : > { %v3739_v43 = vpop.f32.mrb[64].mxu1 }
 0x247   : > { %v3740_v47 = vpop.f32.mrb[65].mxu1 }
 0x248   : > { %v3741_v48 = vadd.f32 %v3740_v47, %v3739_v43  ;;  %v3742_v51 = vpop.f32.mrb[66].mxu1 }
 0x249   : > { %v3743_v55 = vpop.f32.mrb[67].mxu1 }
 0x24a   : > { %v3744_v53 = vadd.f32 %v3743_v55, %v3742_v51  ;;  %v2253_v49 = vadd.f32 %v3741_v48, %v5389_v4 }
 0x24c   : > { %v5453_v16 = vadd.f32 %v3744_v53, %v5393_v61 }
 0x24e   : > { %v3745_v50 = vpop.f32.mrb[68].mxu1 }
 0x24f   : > { %v3746_v54 = vpop.f32.mrb[69].mxu1 }
 0x250   : > { %v3747_v58 = vadd.f32 %v3746_v54, %v3745_v50  ;;  %v3748_v60 = vpop.f32.mrb[70].mxu1 }
 0x251   : > { %v3749_v19 = vpop.f32.mrb[71].mxu1 }
 0x252   : > { %v3750_v63 = vadd.f32 %v3749_v19, %v3748_v60  ;;  %v2261_v0 = vadd.f32 %v3747_v58, %v5399_v17 }
 0x254   : > { %v2264_v3 = vadd.f32 %v3750_v63, %v5401_v21 }
 0x256   : > { %v3751_v56 = vpop.f32.mrb[72].mxu1 }
 0x257   : > { %v3752_v1 = vpop.f32.mrb[73].mxu1 }
 0x258   : > { %v3753_v5 = vadd.f32 %v3752_v1, %v3751_v56  ;;  %v3754_v8 = vpop.f32.mrb[74].mxu1 }
 0x259   : > { %v3755_v62 = vpop.f32.mrb[75].mxu1 }
 0x25a   : > { %v3756_v22 = vadd.f32 %v3755_v62, %v3754_v8  ;;  %v2269_v4 = vadd.f32 %v3753_v5, %v5407_v34 }
 0x25c   : > { %v5459_v61 = vadd.f32 %v3756_v22, %v5409_v37 }
 0x25e   : > { %v3757_v10 = vpop.f32.mrb[76].mxu1 }
 0x25f   : > { %v3758_v12 = vpop.f32.mrb[77].mxu1 }
 0x260   : > { %v3759_v25 = vadd.f32 %v3758_v12, %v3757_v10  ;;  %v3760_v13 = vpop.f32.mrb[78].mxu1 }
 0x261   : > { %v3761_v15 = vpop.f32.mrb[79].mxu1 }
 0x262   : > { %v3762_v59 = vadd.f32 %v3761_v15, %v3760_v13  ;;  %v2277_v17 = vadd.f32 %v3759_v25, %v5415_v52 }
 0x264   : > { %v2280_v21 = vadd.f32 %v3762_v59, %v5417_v57 }
 0x266   : > { %v3763_v18 = vpop.f32.mrb[80].mxu1 }
 0x267   : > { %v3764_v2 = vpop.f32.mrb[81].mxu1 }
 0x268   : > { %v3765_v24 = vadd.f32 %v3764_v2, %v3763_v18  ;;  %v3766_v7 = vpop.f32.mrb[82].mxu1 }
 0x269   : > { %v3767_v26 = vpop.f32.mrb[83].mxu1 }
 0x26a   : > { %v3768_v29 = vadd.f32 %v3767_v26, %v3766_v7  ;;  %v2285_v34 = vadd.f32 %v3765_v24, %v5423_v6 }
 0x26c   : > { %v5465_v37 = vadd.f32 %v3768_v29, %v5425_v9 }
 0x26e   : > { %v3769_v27 = vpop.f32.mrb[84].mxu1 }
 0x26f   : > { %v3770_v28 = vpop.f32.mrb[85].mxu1 }
 0x270   : > { %v3771_v30 = vadd.f32 %v3770_v28, %v3769_v27  ;;  %v3772_v31 = vpop.f32.mrb[86].mxu1 }
 0x271   : > { %v3773_v35 = vpop.f32.mrb[87].mxu1 }
 0x272   : > { %v3774_v36 = vadd.f32 %v3773_v35, %v3772_v31  ;;  %v2293_v52 = vadd.f32 %v3771_v30, %v5431_v20 }
 0x274   : > { %v2296_v57 = vadd.f32 %v3774_v36, %v5433_v23 }
 0x276   : > { %v3775_v11 = vpop.f32.mrb[88].mxu1 }
 0x277   : > { %v3776_v38 = vpop.f32.mrb[89].mxu1 }
 0x278   : > { %v3777_v39 = vadd.f32 %v3776_v38, %v3775_v11  ;;  %v3778_v40 = vpop.f32.mrb[90].mxu1  ;;  %v750_v38 = vsub.s32 0, %v5365_v41 }
 0x279   : > { %v3779_v14 = vpop.f32.mrb[91].mxu1 }
 0x27a   : > { %v3780_v44 = vadd.f32 %v3779_v14, %v3778_v40  ;;  %v2301_v6 = vadd.f32 %v3777_v39, %v5439_v32 }
 0x27c   : > { %v5471_v9 = vadd.f32 %v3780_v44, %v5441_v33 }
 0x27e   : > { %v3781_v43 = vpop.f32.mrb[92].mxu1 }
 0x27f   : > { %v3782_v47 = vpop.f32.mrb[93].mxu1 }
 0x280   : > { %v3783_v48 = vadd.f32 %v3782_v47, %v3781_v43  ;;  %v3784_v51 = vpop.f32.mrb[94].mxu1  ;;  %v5482_v43 = vrot.slane %v5373_v46, %v750_v38 }
 0x281   : > { %v3785_v55 = vpop.f32.mrb[95].mxu1 }
 0x282   : > { %v3786_v53 = vadd.f32 %v3785_v55, %v3784_v51  ;;  %v2309_v20 = vadd.f32 %v3783_v48, %v5447_v42 }
 0x284   : > { %v2312_v23 = vadd.f32 %v3786_v53, %v5449_v45 }
 0x286   : > { %v3896_v50 = vpop.f32.mrb[96].mxu1 }
 0x287   : > { %v2358_v54 = vadd.f32 %v3896_v50, %v2261_v0  ;;  %v2349_v58 = vpop.f32.mrb[97].mxu1 }
 0x288   : > { %v2350_v60 = vadd.f32 %v2349_v58, %v2253_v49  ;;  %v3897_v19 = vpop.f32.mrb[98].mxu1 }
 0x289   : > { %v2361_v63 = vadd.f32 %v3897_v19, %v2264_v3  ;;  %v2352_v32 = vpop.f32.mrb[99].mxu1  ;;  %v2420_v56 = vmax.f32 %v2358_v54, 0.0 }
 0x28a   : > { %v2353_v33 = vadd.f32 %v2352_v32, %v5453_v16  ;;  %v2414_v5 = vmax.f32 %v2350_v60, 0.0 }
 0x28b   : > { %v2423_v1 = vmax.f32 %v2361_v63, 0.0 }
 0x28c   : > { %v2417_v8 = vmax.f32 %v2353_v33, 0.0 }
 0x28d   : > { %v2465_v62 = vpack.c.bf16 %v2423_v1, %v2420_v56 }
 0x28e   : > { %v2462_v22 = vpack.c.bf16 %v2417_v8, %v2414_v5  ;;  %v3900_v10 = vpop.f32.mrb[100].mxu1 }
 0x28f   : > { %v2374_v12 = vadd.f32 %v3900_v10, %v2277_v17  ;;  %v2365_v42 = vpop.f32.mrb[101].mxu1 }
 0x290   : > { %v2366_v25 = vadd.f32 %v2365_v42, %v2269_v4  ;;  %v3901_v45 = vpop.f32.mrb[102].mxu1  ;;  %3926 = vmatprep.mubr.bf16.mxu0 %v2462_v22 }
 0x291   : > { %v2377_v0 = vadd.f32 %v3901_v45, %v2280_v21  ;;  %v2368_v13 = vpop.f32.mrb[103].mxu1  ;;  %3927 = vmatmul.mubr.bf16.vlgmr.msra.gmra.mrb[32].mxu0 %v2465_v62  ;;  %v2432_v3 = vmax.f32 %v2374_v12, 0.0 }
 0x292   : > { %v2369_v49 = vadd.f32 %v2368_v13, %v5459_v61  ;;  %v2426_v16 = vmax.f32 %v2366_v25, 0.0 }
 0x293   : > { %v2435_v15 = vmax.f32 %v2377_v0, 0.0 }
 0x294   : > { %v2429_v59 = vmax.f32 %v2369_v49, 0.0 }
 0x295   : > { %v2471_v18 = vpack.c.bf16 %v2435_v15, %v2432_v3 }
 0x296   : > { %v2468_v2 = vpack.c.bf16 %v2429_v59, %v2426_v16  ;;  %v3904_v24 = vpop.f32.mrb[104].mxu1 }
 0x297   : > { %v2390_v7 = vadd.f32 %v3904_v24, %v2293_v52  ;;  %v2381_v26 = vpop.f32.mrb[105].mxu1 }
 0x298   : > { %v2382_v29 = vadd.f32 %v2381_v26, %v2285_v34  ;;  %v3905_v17 = vpop.f32.mrb[106].mxu1  ;;  %3930 = vmatprep.mubr.bf16.mxu0 %v2468_v2  ;;  %v754_v34 = vsub.s32 1, %v5365_v41 }
 0x299   : > { %v2393_v4 = vadd.f32 %v3905_v17, %v2296_v57  ;;  %v2384_v27 = vpop.f32.mrb[107].mxu1  ;;  %3931 = vmatmul.mubr.bf16.gmra.mrb[36].mxu0 %v2471_v18  ;;  %v2444_v28 = vmax.f32 %v2390_v7, 0.0 }
 0x29a   : > { %v2385_v21 = vadd.f32 %v2384_v27, %v5465_v37  ;;  %v2438_v61 = vmax.f32 %v2382_v29, 0.0  ;;  %v5485_v51 = vrot.slane %v5373_v46, %v754_v34 }
 0x29b   : > { %v2447_v30 = vmax.f32 %v2393_v4, 0.0 }
 0x29c   : > { %v2441_v31 = vmax.f32 %v2385_v21, 0.0 }
 0x29d   : > { %v2477_v35 = vpack.c.bf16 %v2447_v30, %v2444_v28 }
 0x29e   : > { %v2474_v36 = vpack.c.bf16 %v2441_v31, %v2438_v61  ;;  %v3908_v11 = vpop.f32.mrb[108].mxu1 }
 0x29f   : > { %v2406_v39 = vadd.f32 %v3908_v11, %v2309_v20  ;;  %v2397_v52 = vpop.f32.mrb[109].mxu1 }
 0x2a0   : > { %v2398_v40 = vadd.f32 %v2397_v52, %v2301_v6  ;;  %v3909_v14 = vpop.f32.mrb[110].mxu1  ;;  %3934 = vmatprep.mubr.bf16.mxu0 %v2474_v36 }
 0x2a1   : > { %v2409_v57 = vadd.f32 %v3909_v14, %v2312_v23  ;;  %v2400_v44 = vpop.f32.mrb[111].mxu1  ;;  %3935 = vmatmul.mubr.bf16.gmra.mrb[40].mxu0 %v2477_v35  ;;  %v2456_v47 = vmax.f32 %v2406_v39, 0.0 }
 0x2a2   : > { %v2401_v37 = vadd.f32 %v2400_v44, %v5471_v9  ;;  %v2450_v55 = vmax.f32 %v2398_v40, 0.0 }
 0x2a3   : > { %v2459_v48 = vmax.f32 %v2409_v57, 0.0 }
 0x2a4   : > { %v2453_v53 = vmax.f32 %v2401_v37, 0.0 }
 0x2a5   : > { %v2483_v20 = vpack.c.bf16 %v2459_v48, %v2456_v47  ;;  %v1945_v41 = vpop.f32.mrb[0].mxu0 }
 0x2a6   : > { %v2480_v6 = vpack.c.bf16 %v2453_v53, %v2450_v55  ;;  %v3974_v50 = vadd.f32 %v1945_v41, %v5482_v43  ;;  %v1947_v23 = vpop.f32.mrb[1].mxu0 }
 0x2a7   : > { %v3975_v54 = vadd.f32 %v1947_v23, %v5485_v51  ;;  %v1949_v58 = vpop.f32.mrb[2].mxu0 }
 0x2a8   : > { %v3976_v9 = vadd.f32 %v1949_v58, %v5482_v43  ;;  %3938 = vmatprep.mubr.bf16.mxu0 %v2480_v6  ;;  %v1951_v60 = vpop.f32.mrb[3].mxu0  ;;  %v2412_v46 = vmax.f32 %v3974_v50, 0.0 }
 0x2a9   : > { %v3977_v19 = vadd.f32 %v1951_v60, %v5485_v51  ;;  %3939 = vmatmul.mubr.bf16.gmra.mrb[44].mxu0 %v2483_v20  ;;  %v2413_v32 = vmax.f32 %v3975_v54, 0.0 }
 0x2aa   : > { %v2415_v63 = vmax.f32 %v3976_v9, 0.0 }
 0x2ab   : > { %v2416_v33 = vmax.f32 %v3977_v19, 0.0 }
 0x2ac   : > { %v2460_v56 = vpack.c.bf16 %v2415_v63, %v2412_v46 }
 0x2ad   : > { %v2461_v1 = vpack.c.bf16 %v2416_v33, %v2413_v32  ;;  %v1955_v5 = vpop.f32.mrb[4].mxu0 }
 0x2ae   : > { %v3978_v8 = vadd.f32 %v1955_v5, %v5482_v43  ;;  %v1957_v62 = vpop.f32.mrb[5].mxu0 }
 0x2af   : > { %v3979_v22 = vadd.f32 %v1957_v62, %v5485_v51  ;;  %v1959_v10 = vpop.f32.mrb[6].mxu0  ;;  %2715 = vmatprep.mubr.bf16.mxu1 %v2461_v1 }
 0x2b0   : > { %v3980_v12 = vadd.f32 %v1959_v10, %v5482_v43  ;;  %v1961_v42 = vpop.f32.mrb[7].mxu0  ;;  %2716 = vmatmul.mubr.bf16.vlgmr.msra.gmra.mrb[112].mxu1 %v2460_v56  ;;  %v2418_v45 = vmax.f32 %v3978_v8, 0.0 }
 0x2b1   : > { %v3981_v25 = vadd.f32 %v1961_v42, %v5485_v51  ;;  %v2419_v13 = vmax.f32 %v3979_v22, 0.0 }
 0x2b2   : > { %v2421_v0 = vmax.f32 %v3980_v12, 0.0 }
 0x2b3   : > { %v2422_v49 = vmax.f32 %v3981_v25, 0.0 }
 0x2b4   : > { %v2463_v3 = vpack.c.bf16 %v2421_v0, %v2418_v45 }
 0x2b5   : > { %v2464_v15 = vpack.c.bf16 %v2422_v49, %v2419_v13  ;;  %v1965_v16 = vpop.f32.mrb[8].mxu0 }
 0x2b6   : > { %v3982_v59 = vadd.f32 %v1965_v16, %v5482_v43  ;;  %v1967_v18 = vpop.f32.mrb[9].mxu0 }
 0x2b7   : > { %v3983_v2 = vadd.f32 %v1967_v18, %v5485_v51  ;;  %v1969_v24 = vpop.f32.mrb[10].mxu0  ;;  %2723 = vmatprep.mubr.bf16.mxu1 %v2464_v15 }
 0x2b8   : > { %v3984_v7 = vadd.f32 %v1969_v24, %v5482_v43  ;;  %v1971_v26 = vpop.f32.mrb[11].mxu0  ;;  %2724 = vmatmul.mubr.bf16.gmra.mrb[116].mxu1 %v2463_v3  ;;  %v2424_v17 = vmax.f32 %v3982_v59, 0.0 }
 0x2b9   : > { %v3985_v29 = vadd.f32 %v1971_v26, %v5485_v51  ;;  %v2425_v27 = vmax.f32 %v3983_v2, 0.0 }
 0x2ba   : > { %v2427_v4 = vmax.f32 %v3984_v7, 0.0 }
 0x2bb   : > { %v2428_v21 = vmax.f32 %v3985_v29, 0.0 }
 0x2bc   : > { %v2466_v28 = vpack.c.bf16 %v2427_v4, %v2424_v17 }
 0x2bd   : > { %v2467_v30 = vpack.c.bf16 %v2428_v21, %v2425_v27  ;;  %v1975_v61 = vpop.f32.mrb[12].mxu0 }
 0x2be   : > { %v3986_v31 = vadd.f32 %v1975_v61, %v5482_v43  ;;  %v1977_v35 = vpop.f32.mrb[13].mxu0 }
 0x2bf   : > { %v3987_v36 = vadd.f32 %v1977_v35, %v5485_v51  ;;  %v1979_v11 = vpop.f32.mrb[14].mxu0  ;;  %2731 = vmatprep.mubr.bf16.mxu1 %v2467_v30 }
 0x2c0   : > { %v3988_v38 = vadd.f32 %v1979_v11, %v5482_v43  ;;  %v1981_v39 = vpop.f32.mrb[15].mxu0  ;;  %2732 = vmatmul.mubr.bf16.gmra.mrb[120].mxu1 %v2466_v28  ;;  %v2430_v34 = vmax.f32 %v3986_v31, 0.0 }
 0x2c1   : > { %v3989_v52 = vadd.f32 %v1981_v39, %v5485_v51  ;;  %v2431_v14 = vmax.f32 %v3987_v36, 0.0 }
 0x2c2   : > { %v2433_v40 = vmax.f32 %v3988_v38, 0.0 }
 0x2c3   : > { %v2434_v57 = vmax.f32 %v3989_v52, 0.0 }
 0x2c4   : > { %v2469_v44 = vpack.c.bf16 %v2433_v40, %v2430_v34  ;;  %v4441_v34 = vld [vmem:[#allocation11] sm:$0xff]   ;;  %v4442_v40 = vld [vmem:[#allocation11 + $0x8] sm:$0xff]  }
 0x2c5   : > { %v2470_v37 = vpack.c.bf16 %v2434_v57, %v2431_v14  ;;  %v1985_v47 = vpop.f32.mrb[16].mxu0  ;;  %3942 = vmatprep.subr.bf16.mxu1 %v4441_v34  ;;  %v4443_v14 = vld [vmem:[#allocation11 + $0x10] sm:$0xff]   ;;  %v4446_v57 = vld [vmem:[#allocation11 + $0x28] sm:$0xff]  }
 0x2c6   : > { %v3990_v48 = vadd.f32 %v1985_v47, %v5482_v43  ;;  %v1987_v55 = vpop.f32.mrb[17].mxu0  ;;  %3943 = vmatpush3.bf16.msra.mxu1 %v4441_v34 }
 0x2c7   : > { %v3991_v53 = vadd.f32 %v1987_v55, %v5485_v51  ;;  %v1989_v20 = vpop.f32.mrb[18].mxu0  ;;  %2739 = vmatprep.mubr.bf16.mxu1 %v2470_v37  ;;  %3944 = vmatprep.subr.bf16.mxu1 %v4442_v40  ;;  %v4448_v37 = vld [vmem:[#allocation11 + $0x38] sm:$0xff]  }
 0x2c8   : > { %v3992_v41 = vadd.f32 %v1989_v20, %v5482_v43  ;;  %v1991_v6 = vpop.f32.mrb[19].mxu0  ;;  %2740 = vmatmul.mubr.bf16.gmra.mrb[124].mxu1 %v2469_v44  ;;  %v2436_v23 = vmax.f32 %v3990_v48, 0.0  ;;  %v4447_v44 = vld [vmem:[#allocation11 + $0x30] sm:$0xff]  }
 0x2c9   : > { %v3993_v50 = vadd.f32 %v1991_v6, %v5485_v51  ;;  %v2437_v58 = vmax.f32 %v3991_v53, 0.0 }
 0x2ca   : > { %v2439_v54 = vmax.f32 %v3992_v41, 0.0  ;;  %3945 = vmatpush3.bf16.msra.mxu1 %v4442_v40 }
 0x2cb   : > { %v2440_v9 = vmax.f32 %v3993_v50, 0.0  ;;  %3946 = vmatprep.subr.bf16.mxu1 %v4443_v14 }
 0x2cc   : > { %v2472_v60 = vpack.c.bf16 %v2439_v54, %v2436_v23 }
 0x2cd   : > { %v2473_v19 = vpack.c.bf16 %v2440_v9, %v2437_v58  ;;  %v1995_v46 = vpop.f32.mrb[20].mxu0 }
 0x2ce   : > { %v3994_v63 = vadd.f32 %v1995_v46, %v5482_v43  ;;  %v1997_v32 = vpop.f32.mrb[21].mxu0  ;;  %3947 = vmatpush3.bf16.msra.mxu1 %v4443_v14 }
 0x2cf   : > { %v3995_v33 = vadd.f32 %v1997_v32, %v5485_v51  ;;  %v1999_v56 = vpop.f32.mrb[22].mxu0  ;;  %2747 = vmatprep.mubr.bf16.mxu1 %v2473_v19 }
 0x2d0   : > { %v3996_v1 = vadd.f32 %v1999_v56, %v5482_v43  ;;  %v2001_v5 = vpop.f32.mrb[23].mxu0  ;;  %2748 = vmatmul.mubr.bf16.gmra.mrb[128].mxu1 %v2472_v60  ;;  %v2442_v62 = vmax.f32 %v3994_v63, 0.0 }
 0x2d1   : > { %v3997_v8 = vadd.f32 %v2001_v5, %v5485_v51  ;;  %v2443_v10 = vmax.f32 %v3995_v33, 0.0  ;;  %v5535_v33 = vld [vmem:[#allocation10] ss:$0 sm:$0xff] }
 0x2d2   : > { %v2445_v22 = vmax.f32 %v3996_v1, 0.0 }
 0x2d3   : > { %v2446_v12 = vmax.f32 %v3997_v8, 0.0 }
 0x2d4   : > { %v2475_v42 = vpack.c.bf16 %v2445_v22, %v2442_v62 }
 0x2d5   : > { %v2476_v25 = vpack.c.bf16 %v2446_v12, %v2443_v10  ;;  %v2005_v45 = vpop.f32.mrb[24].mxu0 }
 0x2d6   : > { %v3998_v0 = vadd.f32 %v2005_v45, %v5482_v43  ;;  %v2007_v13 = vpop.f32.mrb[25].mxu0 }
 0x2d7   : > { %v3999_v49 = vadd.f32 %v2007_v13, %v5485_v51  ;;  %v2009_v3 = vpop.f32.mrb[26].mxu0  ;;  %2755 = vmatprep.mubr.bf16.mxu1 %v2476_v25 }
 0x2d8   : > { %v4000_v15 = vadd.f32 %v2009_v3, %v5482_v43  ;;  %v2011_v16 = vpop.f32.mrb[27].mxu0  ;;  %2756 = vmatmul.mubr.bf16.gmra.mrb[132].mxu1 %v2475_v42  ;;  %v2448_v18 = vmax.f32 %v3998_v0, 0.0 }
 0x2d9   : > { %v4001_v59 = vadd.f32 %v2011_v16, %v5485_v51  ;;  %v2449_v24 = vmax.f32 %v3999_v49, 0.0 }
 0x2da   : > { %v2451_v2 = vmax.f32 %v4000_v15, 0.0 }
 0x2db   : > { %v2452_v7 = vmax.f32 %v4001_v59, 0.0 }
 0x2dc   : > { %v2478_v26 = vpack.c.bf16 %v2451_v2, %v2448_v18 }
 0x2dd   : > { %v2479_v29 = vpack.c.bf16 %v2452_v7, %v2449_v24  ;;  %v2015_v17 = vpop.f32.mrb[28].mxu0 }
 0x2de   : > { %v4002_v4 = vadd.f32 %v2015_v17, %v5482_v43  ;;  %v2017_v27 = vpop.f32.mrb[29].mxu0 }
 0x2df   : > { %v4003_v21 = vadd.f32 %v2017_v27, %v5485_v51  ;;  %v2019_v28 = vpop.f32.mrb[30].mxu0  ;;  %2763 = vmatprep.mubr.bf16.mxu1 %v2479_v29 }
 0x2e0   : > { %v4004_v30 = vadd.f32 %v2019_v28, %v5482_v43  ;;  %v2021_v61 = vpop.f32.mrb[31].mxu0  ;;  %2764 = vmatmul.mubr.bf16.gmra.mrb[136].mxu1 %v2478_v26  ;;  %v2454_v35 = vmax.f32 %v4002_v4, 0.0  ;;  %v4444_v43 = vld [vmem:[#allocation11 + $0x18] sm:$0xff]  }
 0x2e1   : > { %v4005_v31 = vadd.f32 %v2021_v61, %v5485_v51  ;;  %v2455_v11 = vmax.f32 %v4003_v21, 0.0  ;;  %3948 = vmatprep.subr.bf16.mxu1 %v4444_v43  ;;  %v4445_v51 = vld [vmem:[#allocation11 + $0x20] sm:$0xff]  }
 0x2e2   : > { %v2457_v36 = vmax.f32 %v4004_v30, 0.0  ;;  %3949 = vmatpush3.bf16.msra.mxu1 %v4444_v43 }
 0x2e3   : > { %v2458_v38 = vmax.f32 %v4005_v31, 0.0  ;;  %3950 = vmatprep.subr.bf16.mxu1 %v4445_v51 }
 0x2e4   : > { %v2481_v39 = vpack.c.bf16 %v2457_v36, %v2454_v35 }
 0x2e5   : > { %v2482_v52 = vpack.c.bf16 %v2458_v38, %v2455_v11 }
 0x2e6   : > { %3951 = vmatpush3.bf16.msra.mxu1 %v4445_v51 }
 0x2e7   : > { %2771 = vmatprep.mubr.bf16.mxu1 %v2482_v52  ;;  %3952 = vmatprep.subr.bf16.mxu1 %v4446_v57 }
 0x2e8   : > { %2772 = vmatmul.mubr.bf16.gmra.mrb[140].mxu1 %v2481_v39 }
 0x2ea   : > { %3953 = vmatpush3.bf16.msra.mxu1 %v4446_v57 }
 0x2eb   : > { %3954 = vmatprep.subr.bf16.mxu1 %v4447_v44 }
 0x2ee   : > { %3955 = vmatpush3.bf16.msra.mxu1 %v4447_v44 }
 0x2ef   : > { %3956 = vmatprep.subr.bf16.mxu1 %v4448_v37 }
 0x2f2   : > { %3957 = vmatpush3.bf16.msra.mxu1 %v4448_v37 }
 0x364   : > { %v3928_v47 = vpop.f32.mrb[32].mxu0 }
 0x365   : > { %v2814_v48 = vpop.f32.mrb[33].mxu0 }
 0x366   : > { %v3929_v55 = vpop.f32.mrb[34].mxu0 }
 0x367   : > { %v2817_v53 = vpop.f32.mrb[35].mxu0 }
 0x36c   : > { %v3932_v20 = vpop.f32.mrb[36].mxu0 }
 0x36d   : > { %v2830_v41 = vpop.f32.mrb[37].mxu0 }
 0x36e   : > { %v3933_v6 = vpop.f32.mrb[38].mxu0 }
 0x36f   : > { %v2833_v50 = vpop.f32.mrb[39].mxu0 }
 0x374   : > { %v5519_v23 = vpop.f32.mrb[40].mxu0 }
 0x375   : > { %v5521_v54 = vpop.f32.mrb[41].mxu0 }
 0x376   : > { %v5523_v58 = vpop.f32.mrb[42].mxu0 }
 0x377   : > { %v5525_v9 = vpop.f32.mrb[43].mxu0 }
 0x37c   : > { %v5527_v60 = vpop.f32.mrb[44].mxu0 }
 0x37d   : > { %v5529_v19 = vpop.f32.mrb[45].mxu0 }
 0x37e   : > { %v5531_v46 = vpop.f32.mrb[46].mxu0 }
 0x37f   : > { %v5533_v63 = vpop.f32.mrb[47].mxu0 }
 0x383   : > { %v3812_v32 = vpop.f32.mrb[112].mxu1 }
 0x384   : > { %v3813_v56 = vpop.f32.mrb[113].mxu1 }
 0x385   : > { %v3814_v1 = vadd.f32 %v3813_v56, %v3812_v32  ;;  %v3815_v5 = vpop.f32.mrb[114].mxu1 }
 0x386   : > { %v3816_v8 = vpop.f32.mrb[115].mxu1 }
 0x387   : > { %v2718_v62 = vadd.f32 %v3814_v1, %v5535_v33  ;;  %v3817_v22 = vadd.f32 %v3816_v8, %v3815_v5 }
 0x389   : > { %v2815_v10 = vadd.f32 %v2814_v48, %v2718_v62  ;;  %v2721_v12 = vadd.f32 %v3817_v22, %v5535_v33 }
 0x38b   : > { %v2818_v42 = vadd.f32 %v2817_v53, %v2721_v12  ;;  %v3818_v25 = vpop.f32.mrb[116].mxu1  ;;  %v2877_v0 = vmax.f32 %v2815_v10, 0.0 }
 0x38c   : > { %v3819_v45 = vpop.f32.mrb[117].mxu1 }
 0x38d   : > { %v2878_v13 = vmax.f32 %v2818_v42, 0.0  ;;  %v3820_v49 = vadd.f32 %v3819_v45, %v3818_v25  ;;  %v3821_v3 = vpop.f32.mrb[118].mxu1 }
 0x38e   : > { %v3822_v15 = vpop.f32.mrb[119].mxu1 }
 0x38f   : > { %v2726_v16 = vadd.f32 %v3820_v49, %v5535_v33  ;;  %v3823_v59 = vadd.f32 %v3822_v15, %v3821_v3  ;;  %v2893_v18 = vpack.c.bf16 %v2878_v13, %v2877_v0 }
 0x391   : > { %v2823_v2 = vadd.f32 %v3928_v47, %v2726_v16  ;;  %v2729_v24 = vadd.f32 %v3823_v59, %v5535_v33  ;;  %3958 = vmatprep.mubr.bf16.mxu1 %v2893_v18 }
 0x393   : > { %v2826_v7 = vadd.f32 %v3929_v55, %v2729_v24  ;;  %v3824_v26 = vpop.f32.mrb[120].mxu1  ;;  %v2879_v17 = vmax.f32 %v2823_v2, 0.0 }
 0x394   : > { %v3825_v29 = vpop.f32.mrb[121].mxu1 }
 0x395   : > { %v2880_v4 = vmax.f32 %v2826_v7, 0.0  ;;  %v3826_v27 = vadd.f32 %v3825_v29, %v3824_v26  ;;  %v3827_v21 = vpop.f32.mrb[122].mxu1 }
 0x396   : > { %v3828_v28 = vpop.f32.mrb[123].mxu1 }
 0x397   : > { %v2894_v30 = vpack.c.bf16 %v2880_v4, %v2879_v17  ;;  %v2734_v61 = vadd.f32 %v3826_v27, %v5535_v33  ;;  %v3829_v31 = vadd.f32 %v3828_v28, %v3827_v21 }
 0x399   : > { %v2831_v35 = vadd.f32 %v2830_v41, %v2734_v61  ;;  %v2737_v36 = vadd.f32 %v3829_v31, %v5535_v33  ;;  %3959 = vmatmul.mubr.bf16.vlgmr.msra.gmra.mrb[144].mxu1 %v2894_v30 }
 0x39b   : > { %v2834_v11 = vadd.f32 %v2833_v50, %v2737_v36  ;;  %v3830_v38 = vpop.f32.mrb[124].mxu1  ;;  %v2881_v52 = vmax.f32 %v2831_v35, 0.0 }
 0x39c   : > { %v3831_v39 = vpop.f32.mrb[125].mxu1 }
 0x39d   : > { %v2882_v34 = vmax.f32 %v2834_v11, 0.0  ;;  %v3832_v40 = vadd.f32 %v3831_v39, %v3830_v38  ;;  %v3833_v14 = vpop.f32.mrb[126].mxu1 }
 0x39e   : > { %v3834_v43 = vpop.f32.mrb[127].mxu1 }
 0x39f   : > { %v2742_v51 = vadd.f32 %v3832_v40, %v5535_v33  ;;  %v3835_v57 = vadd.f32 %v3834_v43, %v3833_v14  ;;  %v2895_v44 = vpack.c.bf16 %v2882_v34, %v2881_v52 }
 0x3a1   : > { %v2839_v37 = vadd.f32 %v3932_v20, %v2742_v51  ;;  %v2745_v47 = vadd.f32 %v3835_v57, %v5535_v33  ;;  %3962 = vmatprep.mubr.bf16.mxu1 %v2895_v44  ;;  %v3501_v57 = vld [vmem:[#allocation13] ss:$0 sm:$0xff] }
 0x3a3   : > { %v2842_v48 = vadd.f32 %v3933_v6, %v2745_v47  ;;  %v3836_v55 = vpop.f32.mrb[128].mxu1  ;;  %v2883_v41 = vmax.f32 %v2839_v37, 0.0 }
 0x3a4   : > { %v3837_v53 = vpop.f32.mrb[129].mxu1 }
 0x3a5   : > { %v2884_v50 = vmax.f32 %v2842_v48, 0.0  ;;  %v3838_v32 = vadd.f32 %v3837_v53, %v3836_v55  ;;  %v3839_v56 = vpop.f32.mrb[130].mxu1 }
 0x3a6   : > { %v3840_v1 = vpop.f32.mrb[131].mxu1 }
 0x3a7   : > { %v2750_v5 = vadd.f32 %v3838_v32, %v5535_v33  ;;  %v3841_v8 = vadd.f32 %v3840_v1, %v3839_v56  ;;  %v2896_v62 = vpack.c.bf16 %v2884_v50, %v2883_v41 }
 0x3a9   : > { %v2847_v22 = vadd.f32 %v5521_v54, %v2750_v5  ;;  %v2753_v10 = vadd.f32 %v3841_v8, %v5535_v33  ;;  %3963 = vmatmul.mubr.bf16.gmra.mrb[148].mxu1 %v2896_v62 }
 0x3ab   : > { %v2850_v20 = vadd.f32 %v5525_v9, %v2753_v10  ;;  %v3842_v12 = vpop.f32.mrb[132].mxu1  ;;  %v2885_v42 = vmax.f32 %v2847_v22, 0.0 }
 0x3ac   : > { %v3843_v6 = vpop.f32.mrb[133].mxu1 }
 0x3ad   : > { %v2886_v25 = vmax.f32 %v2850_v20, 0.0  ;;  %v3844_v45 = vadd.f32 %v3843_v6, %v3842_v12  ;;  %v3845_v0 = vpop.f32.mrb[134].mxu1 }
 0x3ae   : > { %v3846_v13 = vpop.f32.mrb[135].mxu1 }
 0x3af   : > { %v2758_v49 = vadd.f32 %v3844_v45, %v5535_v33  ;;  %v3847_v3 = vadd.f32 %v3846_v13, %v3845_v0  ;;  %v2897_v15 = vpack.c.bf16 %v2886_v25, %v2885_v42 }
 0x3b1   : > { %v2855_v16 = vadd.f32 %v5519_v23, %v2758_v49  ;;  %v2761_v54 = vadd.f32 %v3847_v3, %v5535_v33  ;;  %3966 = vmatprep.mubr.bf16.mxu1 %v2897_v15 }
 0x3b3   : > { %v2858_v59 = vadd.f32 %v5523_v58, %v2761_v54  ;;  %v3848_v18 = vpop.f32.mrb[136].mxu1  ;;  %v2887_v2 = vmax.f32 %v2855_v16, 0.0 }
 0x3b4   : > { %v3849_v9 = vpop.f32.mrb[137].mxu1 }
 0x3b5   : > { %v2888_v24 = vmax.f32 %v2858_v59, 0.0  ;;  %v3850_v7 = vadd.f32 %v3849_v9, %v3848_v18  ;;  %v3851_v26 = vpop.f32.mrb[138].mxu1 }
 0x3b6   : > { %v3852_v29 = vpop.f32.mrb[139].mxu1 }
 0x3b7   : > { %v2766_v17 = vadd.f32 %v3850_v7, %v5535_v33  ;;  %v3853_v4 = vadd.f32 %v3852_v29, %v3851_v26  ;;  %v2898_v27 = vpack.c.bf16 %v2888_v24, %v2887_v2 }
 0x3b9   : > { %v2863_v21 = vadd.f32 %v5529_v19, %v2766_v17  ;;  %v2769_v23 = vadd.f32 %v3853_v4, %v5535_v33  ;;  %3967 = vmatmul.mubr.bf16.gmra.mrb[152].mxu1 %v2898_v27 }
 0x3bb   : > { %v2866_v28 = vadd.f32 %v5533_v63, %v2769_v23  ;;  %v3854_v30 = vpop.f32.mrb[140].mxu1  ;;  %v2889_v61 = vmax.f32 %v2863_v21, 0.0 }
 0x3bc   : > { %v3855_v58 = vpop.f32.mrb[141].mxu1 }
 0x3bd   : > { %v2890_v31 = vmax.f32 %v2866_v28, 0.0  ;;  %v3856_v35 = vadd.f32 %v3855_v58, %v3854_v30  ;;  %v3857_v36 = vpop.f32.mrb[142].mxu1 }
 0x3be   : > { %v3858_v11 = vpop.f32.mrb[143].mxu1 }
 0x3bf   : > { %v2774_v38 = vadd.f32 %v3856_v35, %v5535_v33  ;;  %v3859_v39 = vadd.f32 %v3858_v11, %v3857_v36  ;;  %v2899_v52 = vpack.c.bf16 %v2890_v31, %v2889_v61 }
 0x3c1   : > { %v2871_v34 = vadd.f32 %v5527_v60, %v2774_v38  ;;  %v2777_v19 = vadd.f32 %v3859_v39, %v5535_v33  ;;  %3970 = vmatprep.mubr.bf16.mxu1 %v2899_v52 }
 0x3c3   : > { %v2874_v40 = vadd.f32 %v5531_v46, %v2777_v19  ;;  %v2891_v63 = vmax.f32 %v2871_v34, 0.0 }
 0x3c5   : > { %v2892_v14 = vmax.f32 %v2874_v40, 0.0 }
 0x3c7   : > { %v2900_v43 = vpack.c.bf16 %v2892_v14, %v2891_v63 }
 0x3c9   : > { %3971 = vmatmul.mubr.bf16.gmra.mrb[156].mxu1 %v2900_v43 }
 0x46c   : > { %v3960_v51 = vpop.f32.mrb[144].mxu1 }
 0x46d   : > { %v3006_v44 = vpop.f32.mrb[145].mxu1  ;;  %v3015_v47 = vadd.f32 %v3960_v51, %v3501_v57 }
 0x46e   : > { %v3961_v37 = vpop.f32.mrb[146].mxu1  ;;  %v3007_v53 = vadd.f32 %v3501_v57, %v3006_v44 }
 0x46f   : > { %v3018_v48 = vadd.f32 %v3961_v37, %v3501_v57  ;;  %v3009_v55 = vpop.f32.mrb[147].mxu1 }
 0x470   : > { %v3010_v41 = vadd.f32 %v3501_v57, %v3009_v55 }
 0x471   : > { %v3556_v60 = vpack.c.bf16 %v3018_v48, %v3015_v47 }
 0x472   : > { %v3551_v50 = vpack.c.bf16 %v3010_v41, %v3007_v53 }
 0x473   : > { %3588 = vst [vmem:[%s5562_s29 + $0x8] sm:$0xff] %v3556_v60  }
 0x474   : > { %3552 = vst [vmem:[%s5562_s29] sm:$0xff] %v3551_v50  }
 0x47c   : > { %v3964_v46 = vpop.f32.mrb[148].mxu1 }
 0x47d   : > { %v3022_v33 = vpop.f32.mrb[149].mxu1  ;;  %v3031_v56 = vadd.f32 %v3964_v46, %v3501_v57 }
 0x47e   : > { %v3965_v32 = vpop.f32.mrb[150].mxu1  ;;  %v3023_v8 = vadd.f32 %v3501_v57, %v3022_v33 }
 0x47f   : > { %v3034_v1 = vadd.f32 %v3965_v32, %v3501_v57  ;;  %v3025_v5 = vpop.f32.mrb[151].mxu1 }
 0x480   : > { %v3026_v62 = vadd.f32 %v3501_v57, %v3025_v5 }
 0x481   : > { %v3566_v22 = vpack.c.bf16 %v3034_v1, %v3031_v56 }
 0x482   : > { %v3561_v10 = vpack.c.bf16 %v3026_v62, %v3023_v8 }
 0x483   : > { %3590 = vst [vmem:[%s5562_s29 + $0x18] sm:$0xff] %v3566_v22  }
 0x484   : > { %3589 = vst [vmem:[%s5562_s29 + $0x10] sm:$0xff] %v3561_v10  }
 0x48c   : > { %v3968_v20 = vpop.f32.mrb[152].mxu1 }
 0x48d   : > { %v3038_v12 = vpop.f32.mrb[153].mxu1  ;;  %v3047_v42 = vadd.f32 %v3968_v20, %v3501_v57 }
 0x48e   : > { %v3969_v6 = vpop.f32.mrb[154].mxu1  ;;  %v3039_v0 = vadd.f32 %v3501_v57, %v3038_v12 }
 0x48f   : > { %v3050_v25 = vadd.f32 %v3969_v6, %v3501_v57  ;;  %v3041_v45 = vpop.f32.mrb[155].mxu1 }
 0x490   : > { %v3042_v13 = vadd.f32 %v3501_v57, %v3041_v45 }
 0x491   : > { %v3576_v49 = vpack.c.bf16 %v3050_v25, %v3047_v42 }
 0x492   : > { %v3571_v3 = vpack.c.bf16 %v3042_v13, %v3039_v0 }
 0x493   : > { %3592 = vst [vmem:[%s5562_s29 + $0x28] sm:$0xff] %v3576_v49  }
 0x494   : > { %3591 = vst [vmem:[%s5562_s29 + $0x20] sm:$0xff] %v3571_v3  }
 0x49c   : > { %v3972_v15 = vpop.f32.mrb[156].mxu1 }
 0x49d   : > { %v3054_v16 = vpop.f32.mrb[157].mxu1  ;;  %v3063_v59 = vadd.f32 %v3972_v15, %v3501_v57 }
 0x49e   : > { %v3973_v54 = vpop.f32.mrb[158].mxu1  ;;  %v3055_v2 = vadd.f32 %v3501_v57, %v3054_v16 }
 0x49f   : > { %v3066_v18 = vadd.f32 %v3973_v54, %v3501_v57  ;;  %v3057_v9 = vpop.f32.mrb[159].mxu1 }
 0x4a0   : > { %v3058_v24 = vadd.f32 %v3501_v57, %v3057_v9 }
 0x4a1   : > { %v3586_v7 = vpack.c.bf16 %v3066_v18, %v3063_v59 }
 0x4a2   : > { %v3581_v26 = vpack.c.bf16 %v3058_v24, %v3055_v2 }
 0x4a3   : > { %3594 = vst [vmem:[%s5562_s29 + $0x38] sm:$0xff] %v3586_v7  }
 0x4a4   : > { %3593 = vst [vmem:[%s5562_s29 + $0x30] sm:$0xff] %v3581_v26  }
 0x4a5   : > { %4660 = shalt.err (!%p4657_p8)
}
 0x4a6   : > { %s4661_s18 = scalar_lea.hbm %s5577_s15, 1024  ;;  %s4665_s8 = scalar_lea.hbm %s5630_s7, 2048 }
 0x4a7   : > { %p4662_p7 = scmp.ne.s32.totalorder %s5577_s15, %s4661_s18  ;;  %p4666_p3 = scmp.lt.u32.totalorder %s5577_s15, %s5630_s7 }
 0x4a8   : > { %p4667_p6 = scmp.lt.u32.totalorder %s4665_s8, %s4661_s18  ;;  %p4669_p0 = scmp.lt.u32.totalorder %s4661_s18, %s5577_s15 }
 0x4a9   : > { %p4663_p9 = pnand %p4662_p7, %p5651_p5 }
 0x4aa   : > { %p4668_p2 = por %p4667_p6, %p4666_p3 }
 0x4ab   : > { %p4664_p4 = pneg %p4663_p9 }
 0x4ac   : > { %p4670_p10 = por %p4669_p0, %p4668_p2 }
 0x4ae   : > { %p4671_p1 = pnand %p4670_p10, %p4664_p4 }
 0x4b0   : > { %4674 = shalt.err (!%p4671_p1)
}
 0x4b1   : > { %s4742_s9 = smov 64   ;;  %s4743_s19 = smov 4  }
 0x4b2   : > { %4131 = dma.vmem_to_hbm [thread:$0]  (%p5651_p5), %s5572_s17, 1024, %s5577_s15, %s3150_s30, %s4742_s9, %s4742_s9, %s4743_s19  }
 0x4b3 PF: > { %s3178_s21 = sand.u32 1, %s4713_s24   ;;  %p5652_p11 = scmp.ne.s32.totalorder %s5642_s12, 0 }
 0x4b4   : > { %p5653_p12 = scmp.ge.s32.totalorder %s4725_s27, 2  ;;  %s3179_s1 = scalar_lea.sflag [#allocation4], %s3178_s21 }
 0x4b6   : > { %p4157_p13 = pnand %p5653_p12, %p5652_p11 }
 0x4b8   : > { %4708 = dma.done.wait (!%p4157_p13), %s3179_s1, 1024  }
 0x4b9   : > { %4710 = vsyncadd (!%p4157_p13), %s3179_s1, 4294966272  ;;  %p23_p8 = scmp.ge.s32.totalorder %s4956_s11, 4   ;;  %s5654_s24 = smov %s4717_s25 }
 0x4ba   : > { %s5655_s25 = smov %s4721_s26  ;;  %s5656_s26 = smov %s4967_s22 }
 0x4bb   : > { %s5657_s27 = smov %s4956_s11  ;;  %25 = sbr.rel (!%p23_p8) target bundleno = 10 (0xa), region = 117 }
 0x4c2   :  { %3184 = vsyncpa [#allocation3], 1 }
 0x4c3   :  { %3186 = vsyncpa [#allocation3 + $0x1], 1 }
 0x4c4   :  { %3187 = vsyncpa [#allocation6], 1 }
 0x4c5   :  { %3188 = vsyncpa [#allocation9], 1 }
 0x4c6   :  { %3189 = vsyncpa [#allocation12], 1 }
 0x4c7   :  { %3190 = vsyncpa [#allocation4], 1 }
 0x4c8   :  { %3192 = vsyncpa [#allocation4 + $0x1], 1 }

// kernel: tpu_custom_call.1
= control target key start
LH: loop header
LB: loop body
LE: loop exit
PB: predicated region body
PF: predicated region fallthrough
CT: control target
= control target key end

     0   :  { %s5623_s0 = inlined_call_operand.hbm [shape: f32[256,784], index: 0, kind: input, shape index: {}]   ;;  %s5624_s1 = inlined_call_operand.hbm [shape: bf16[784,384], index: 1, kind: input, shape index: {}]   ;;  %s5625_s2 = inlined_call_operand.hbm [shape: f32[1,384], index: 2, kind: input, shape index: {}]   ;;  %s5626_s3 = inlined_call_operand.hbm [shape: bf16[384,128], index: 3, kind: input, shape index: {}]   ;;  %s5627_s4 = inlined_call_operand.hbm [shape: f32[1,128], index: 4, kind: input, shape index: {}]   ;;  %s5628_s5 = inlined_call_operand.hbm [shape: bf16[128,128], index: 5, kind: input, shape index: {}]   ;;  %s5629_s6 = inlined_call_operand.hbm [shape: f32[1,128], index: 6, kind: input, shape index: {}]   ;;  %s5630_s7 = inlined_call_operand.hbm [shape: bf16[256,128], index: 7, kind: output, shape index: {}]  }
   0x1   :  { %5634 = sst [smem:[#allocation20_spill]] %s5624_s1 }
   0x2   :  { %12 = vsyncpa [#allocation3], 0 }
   0x3   :  { %14 = vsyncpa [#allocation3 + $0x1], 0 }
   0x4   :  { %15 = vsyncpa [#allocation6], 0 }
   0x5   :  { %16 = vsyncpa [#allocation9], 0 }
   0x6   :  { %17 = vsyncpa [#allocation12], 0 }
   0x7   :  { %18 = vsyncpa [#allocation4], 0 }
   0x8   :  { %20 = vsyncpa [#allocation4 + $0x1], 0  ;;  %s4784_s24 = smov 0   ;;  %s4786_s25 = smov 0  }
   0x9   :  { %s4788_s26 = smov 0   ;;  %s4790_s27 = smov 0  }
   0xa LB: > { %s4727_s28 = smov [#allocation5]   ;;  %s4805_s30 = sadd.s32 4294967295, %s4725_s27   ;;  %s4725_s27 = sphi %s4790_s27, %s5657_s27   ;;  %s4721_s26 = sphi %s4788_s26, %s5656_s26   ;;  %s4717_s25 = sphi %s4786_s25, %s5655_s25   ;;  %s4713_s24 = sphi %s4784_s24, %s5654_s24  }
   0xb   : > { %s221_s29 = sshll.u32 %s4727_s28, 4  ;;  %p3294_p0 = scmp.ge.s32.totalorder %s4725_s27, 1  ;;  %s4810_s29 = int_to_ptr.vmem [resolvable:$true] %s221_s29 }
   0xc   : > { %p5631_p1 = scmp.eq.s32.totalorder %s4805_s30, 0  ;;  %p209_p2 = scmp.lt.s32.totalorder %s4725_s27, 3 }
   0xd   : > { %s4728_s9 = smov [#allocation8]   ;;  %s4729_s12 = smov [#allocation11]  }
   0xe   : > { %p4812_p3 = pnand %p3294_p0, %p209_p2  ;;  %s245_s10 = sshll.u32 %s4728_s9, 4  ;;  %s4825_s10 = int_to_ptr.vmem [resolvable:$true] %s245_s10 }
   0xf   : > { %s4827_s13 = sshll.u32 %s4729_s12, 4  ;;  %s5637_s1 = sld [smem:[#allocation20_spill]]  ;;  %s270_s13 = int_to_ptr.vmem [resolvable:$true] %s4827_s13 }
  0x10   : > { %s5635_s8 = scalar_select %p4812_p3, 1, 0 }
  0x11   : > { %p4133_p5 = pneg %p4812_p3 }
  0x13   : > { %p4821_p6 = pnand %p4133_p5, %p5631_p1 }
  0x15   : > { %s4449_s16 = scalar_lea.hbm %s5637_s1, 18816  ;;  %p4837_p8 = pneg %p4821_p6 }
  0x16   : > { %p4450_p7 = scmp.ne.s32.totalorder %s5637_s1, %s4449_s16  ;;  %p4456_p11 = scmp.lt.u32.totalorder %s4449_s16, %s5637_s1 }
  0x18   : > { %p4452_p9 = pnand %p4837_p8, %p4450_p7 }
  0x1a   : > { %p4453_p10 = pneg %p4452_p9 }
  0x1c   : > { %p4458_p12 = pnand %p4456_p11, %p4453_p10 }
  0x1e   : > { %4461 = shalt.err (!%p4458_p12)
}
  0x1f   : > { %s4462_s22 = scalar_lea.vmem %s4810_s29, 18816  ;;  %p4470_p5 = scmp.lt.s32.totalorder %s4810_s29, %s4810_s29 }
  0x20   : > { %p4463_p13 = scmp.ne.s32.totalorder %s4810_s29, %s4462_s22  ;;  %p4471_p4 = scmp.lt.s32.totalorder %s4462_s22, %s4462_s22 }
  0x22   : > { %p4465_p0 = pnand %p4463_p13, %p4837_p8  ;;  %p4472_p7 = por %p4471_p4, %p4470_p5 }
  0x24   : > { %p4466_p2 = pneg %p4465_p0 }
  0x26   : > { %p4473_p9 = pnand %p4472_p7, %p4466_p2 }
  0x28   : > { %4476 = shalt.err (!%p4473_p9)
}
  0x29   : > { %s4730_s23 = smov 192   ;;  %s4731_s28 = smov 12  }
  0x2a   : > { %4136 = dma.hbm_to_vmem [thread:$0]  (!%p4821_p6), %s5637_s1, 18816, %s4810_s29, [#allocation6], %s4730_s23, %s4730_s23, %s4731_s28  }
  0x2b   : > { %s4477_s16 = scalar_lea.hbm %s5626_s3, 3072 }
  0x2c   : > { %p4478_p4 = scmp.ne.s32.totalorder %s5626_s3, %s4477_s16  ;;  %p4484_p12 = scmp.lt.u32.totalorder %s4477_s16, %s5626_s3 }
  0x2e   : > { %p4480_p10 = pnand %p4478_p4, %p4837_p8 }
  0x30   : > { %p4481_p11 = pneg %p4480_p10 }
  0x32   : > { %p4486_p13 = pnand %p4484_p12, %p4481_p11 }
  0x34   : > { %4489 = shalt.err (!%p4486_p13)
}
  0x35   : > { %s4490_s29 = scalar_lea.vmem %s4825_s10, 3072  ;;  %p4498_p7 = scmp.lt.s32.totalorder %s4825_s10, %s4825_s10 }
  0x36   : > { %p4491_p0 = scmp.ne.s32.totalorder %s4825_s10, %s4490_s29  ;;  %p4499_p9 = scmp.lt.s32.totalorder %s4490_s29, %s4490_s29 }
  0x38   : > { %p4493_p2 = pnand %p4491_p0, %p4837_p8  ;;  %p4500_p4 = por %p4499_p9, %p4498_p7 }
  0x3a   : > { %p4494_p5 = pneg %p4493_p2 }
  0x3c   : > { %p4501_p10 = pnand %p4500_p4, %p4494_p5 }
  0x3e   : > { %4504 = shalt.err (!%p4501_p10)
}
  0x3f   : > { %s4732_s22 = smov 64   ;;  %s4733_s23 = smov 4  }
  0x40   : > { %4142 = dma.hbm_to_vmem [thread:$0]  (!%p4821_p6), %s5626_s3, 3072, %s4825_s10, [#allocation9], %s4732_s22, %s4732_s22, %s4733_s23  }
  0x41   : > { %s4505_s15 = scalar_lea.hbm %s5628_s5, 1024 }
  0x42   : > { %p4506_p11 = scmp.ne.s32.totalorder %s5628_s5, %s4505_s15  ;;  %p4512_p0 = scmp.lt.u32.totalorder %s4505_s15, %s5628_s5 }
  0x44   : > { %p4508_p12 = pnand %p4506_p11, %p4837_p8 }
  0x46   : > { %p4509_p13 = pneg %p4508_p12 }
  0x48   : > { %p4514_p2 = pnand %p4512_p0, %p4509_p13 }
  0x4a   : > { %4517 = shalt.err (!%p4514_p2)
}
  0x4b   : > { %s4518_s21 = scalar_lea.vmem %s270_s13, 1024  ;;  %p4526_p4 = scmp.lt.s32.totalorder %s270_s13, %s270_s13 }
  0x4c   : > { %p4519_p5 = scmp.ne.s32.totalorder %s270_s13, %s4518_s21  ;;  %p4527_p10 = scmp.lt.s32.totalorder %s4518_s21, %s4518_s21 }
  0x4e   : > { %p4521_p7 = pnand %p4519_p5, %p4837_p8  ;;  %p4528_p1 = por %p4527_p10, %p4526_p4 }
  0x50   : > { %p4522_p9 = pneg %p4521_p7 }
  0x52   : > { %p4529_p3 = pnand %p4528_p1, %p4522_p9 }
  0x54   : > { %4532 = shalt.err (!%p4529_p3)
}
  0x55   : > { %4148 = dma.hbm_to_vmem [thread:$0]  (!%p4821_p6), %s5628_s5, 1024, %s270_s13, [#allocation12], %s4732_s22, %s4732_s22, %s4733_s23  }
  0x56   : > { %s4734_s28 = smov [#allocation7]   ;;  %s4735_s12 = smov [#allocation10]  }
  0x57   : > { %s235_s9 = sshll.u32 %s4734_s28, 4  ;;  %s259_s14 = sshll.u32 %s4735_s12, 4  ;;  %s236_s9 = int_to_ptr.vmem [resolvable:$true] %s235_s9  ;;  %s260_s14 = int_to_ptr.vmem [resolvable:$true] %s259_s14 }
  0x58   : > { %s4533_s17 = scalar_lea.hbm %s5625_s2, 48 }
  0x59   : > { %p4534_p1 = scmp.ne.s32.totalorder %s5625_s2, %s4533_s17  ;;  %p4540_p12 = scmp.lt.u32.totalorder %s4533_s17, %s5625_s2 }
  0x5b   : > { %p4536_p3 = pnand %p4534_p1, %p4837_p8 }
  0x5d   : > { %p4537_p11 = pneg %p4536_p3 }
  0x5f   : > { %p4542_p13 = pnand %p4540_p12, %p4537_p11 }
  0x61   : > { %4545 = shalt.err (!%p4542_p13)
}
  0x62   : > { %s4546_s13 = scalar_lea.vmem %s236_s9, 48  ;;  %s4553_s22 = scalar_lea.vmem %s236_s9, 64 }
  0x63   : > { %p4547_p0 = scmp.ne.s32.totalorder %s236_s9, %s4546_s13  ;;  %p4554_p7 = scmp.lt.s32.totalorder %s236_s9, %s236_s9 }
  0x64   : > { %p4555_p9 = scmp.lt.s32.totalorder %s4553_s22, %s4546_s13 }
  0x65   : > { %p4549_p2 = pnand %p4547_p0, %p4837_p8 }
  0x66   : > { %p4556_p4 = por %p4555_p9, %p4554_p7 }
  0x67   : > { %p4550_p5 = pneg %p4549_p2 }
  0x69   : > { %p4557_p10 = pnand %p4556_p4, %p4550_p5 }
  0x6b   : > { %4560 = shalt.err (!%p4557_p10)
}
  0x6c   : > { %4139 = dma.hbm_to_vmem [thread:$0]  (!%p4821_p6), %s5625_s2, 48, %s236_s9, [#allocation6]  }
  0x6d   : > { %s4561_s15 = scalar_lea.hbm %s5627_s4, 16 }
  0x6e   : > { %p4562_p1 = scmp.ne.s32.totalorder %s5627_s4, %s4561_s15  ;;  %p4568_p12 = scmp.lt.u32.totalorder %s4561_s15, %s5627_s4 }
  0x70   : > { %p4564_p3 = pnand %p4562_p1, %p4837_p8 }
  0x72   : > { %p4565_p11 = pneg %p4564_p3 }
  0x74   : > { %p4570_p13 = pnand %p4568_p12, %p4565_p11 }
  0x76   : > { %4573 = shalt.err (!%p4570_p13)
}
  0x77   : > { %s4574_s21 = scalar_lea.vmem %s260_s14, 16  ;;  %s4581_s9 = scalar_lea.vmem %s260_s14, 32 }
  0x78   : > { %p4575_p0 = scmp.ne.s32.totalorder %s260_s14, %s4574_s21  ;;  %p4582_p7 = scmp.lt.s32.totalorder %s260_s14, %s260_s14 }
  0x79   : > { %p4583_p9 = scmp.lt.s32.totalorder %s4581_s9, %s4574_s21 }
  0x7a   : > { %p4577_p2 = pnand %p4575_p0, %p4837_p8 }
  0x7b   : > { %p4584_p4 = por %p4583_p9, %p4582_p7 }
  0x7c   : > { %p4578_p5 = pneg %p4577_p2 }
  0x7e   : > { %p4585_p10 = pnand %p4584_p4, %p4578_p5 }
  0x80   : > { %4588 = shalt.err (!%p4585_p10)
}
  0x81   : > { %4145 = dma.hbm_to_vmem [thread:$0]  (!%p4821_p6), %s5627_s4, 16, %s260_s14, [#allocation9]  }
  0x82   : > { %s4736_s22 = smov [#allocation13]   ;;  %s4589_s12 = scalar_lea.hbm %s5629_s6, 16 }
  0x83   : > { %s283_s23 = sshll.u32 %s4736_s22, 4  ;;  %p4590_p1 = scmp.ne.s32.totalorder %s5629_s6, %s4589_s12  ;;  %s284_s23 = int_to_ptr.vmem [resolvable:$true] %s283_s23 }
  0x84   : > { %p4596_p12 = scmp.lt.u32.totalorder %s4589_s12, %s5629_s6 }
  0x85   : > { %p4592_p3 = pnand %p4590_p1, %p4837_p8 }
  0x87   : > { %p4593_p11 = pneg %p4592_p3 }
  0x89   : > { %p4598_p13 = pnand %p4596_p12, %p4593_p11 }
  0x8b   : > { %4601 = shalt.err (!%p4598_p13)
}
  0x8c   : > { %s4602_s14 = scalar_lea.vmem %s284_s23, 16  ;;  %s4609_s20 = scalar_lea.vmem %s284_s23, 32 }
  0x8d   : > { %p4603_p0 = scmp.ne.s32.totalorder %s284_s23, %s4602_s14  ;;  %p4610_p7 = scmp.lt.s32.totalorder %s284_s23, %s284_s23 }
  0x8e   : > { %p4611_p9 = scmp.lt.s32.totalorder %s4609_s20, %s4602_s14 }
  0x8f   : > { %p4605_p2 = pnand %p4603_p0, %p4837_p8 }
  0x90   : > { %p4612_p4 = por %p4611_p9, %p4610_p7 }
  0x91   : > { %p4606_p5 = pneg %p4605_p2 }
  0x93   : > { %p4613_p10 = pnand %p4612_p4, %p4606_p5 }
  0x95   : > { %4616 = shalt.err (!%p4613_p10)
}
  0x96   : > { %4151 = dma.hbm_to_vmem [thread:$0]  (!%p4821_p6), %s5629_s6, 16, %s284_s23, [#allocation12]  }
  0x97   : > { %s3293_s19 = sadd.s32 4294967294, %s4725_s27   ;;  %s4956_s11 = sadd.s32 1, %s4725_s27  }
  0x98   : > { %s30_s10 = ssub.s32 %s4725_s27, %s4956_s11  ;;  %s33_s13 = sadd.s32 1, %s4721_s26 }
  0x99   : > { %p31_p8 = scmp.eq.s32.totalorder %s30_s10, 0  ;;  %p40_p1 = scmp.ne.s32.totalorder %s4721_s26, %s4717_s25 }
  0x9a   : > { %p41_p3 = scmp.eq.s32.totalorder %s4725_s27, 0  ;;  %p46_p11 = scmp.ne.s32.totalorder %s4717_s25, %s4713_s24 }
  0x9b   : > { %s4967_s22 = scalar_select %p31_p8, %s4721_s26, %s33_s13  }
  0x9c   : > { %p42_p12 = por %p41_p3, %p40_p1  ;;  %p5639_p13 = scmp.eq.s32.totalorder %s4805_s30, 0 }
  0x9d   : > { %p196_p6 = scmp.eq.s32.totalorder %s4805_s30, 1  ;;  %p202_p2 = scmp.eq.s32.totalorder %s3293_s19, 1 }
  0x9e   : > { %p4971_p0 = por %p5639_p13, %p46_p11  ;;  %p4166_p5 = scmp.lt.s32.totalorder %s4725_s27, 2 }
  0x9f   : > { %s294_s23 = sand.u32 1, %s4721_s26   ;;  %p4978_p7 = por %p196_p6, %p40_p1 }
  0xa0   : > { %p4982_p9 = por %p202_p2, %p46_p11  ;;  %s4102_s15 = smul.u32 896, %s294_s23 }
  0xa1   : > { %s5641_s28 = scalar_select %p4978_p7, 1, 0 }
  0xa2   : > { %s5642_s12 = scalar_select %p4982_p9, 1, 0 }
  0xa3   : > { %s4103_s16 = smul.u32 14336, %s4725_s27  ;;  %p4987_p4 = pnand %p4166_p5, %p42_p12 }
  0xa4   : > { %s298_s21 = scalar_lea.vmem [#allocation2], %s4102_s15  ;;  %s4998_s19 = scalar_lea.sflag [#allocation3], %s294_s23 }
  0xa5   : > { %s4994_s20 = scalar_lea.hbm %s5623_s0, %s4103_s16  ;;  %s306_s9 = sshll.u32 %s298_s21, 4  ;;  %s4996_s9 = int_to_ptr.vmem [resolvable:$true] %s306_s9 }
  0xa6   : > { %s4617_s10 = scalar_lea.hbm %s4994_s20, 14336  ;;  %p4619_p8 = pneg %p4987_p4 }
  0xa7   : > { %p4618_p10 = scmp.ne.s32.totalorder %s4994_s20, %s4617_s10  ;;  %s4622_s18 = scalar_lea.hbm %s5623_s0, 28672 }
  0xa8   : > { %p4623_p11 = scmp.lt.u32.totalorder %s4994_s20, %s5623_s0  ;;  %p4624_p12 = scmp.lt.u32.totalorder %s4622_s18, %s4617_s10 }
  0xa9   : > { %p4620_p1 = pnand %p4619_p8, %p4618_p10  ;;  %p4626_p6 = scmp.lt.u32.totalorder %s4617_s10, %s4994_s20 }
  0xaa   : > { %p4625_p13 = por %p4624_p12, %p4623_p11 }
  0xab   : > { %p4621_p3 = pneg %p4620_p1 }
  0xac   : > { %p4627_p2 = por %p4626_p6, %p4625_p13 }
  0xae   : > { %p4628_p5 = pnand %p4627_p2, %p4621_p3 }
  0xb0   : > { %4631 = shalt.err (!%p4628_p5)
}
  0xb1   : > { %s4632_s23 = scalar_lea.vmem %s4996_s9, 14336  ;;  %s4737_s15 = smov [#allocation2]  }
  0xb2   : > { %p4633_p10 = scmp.ne.s32.totalorder %s4996_s9, %s4632_s23  ;;  %s4637_s21 = sshll.u32 %s4737_s15, 4  ;;  %s4638_s21 = int_to_ptr.vmem [resolvable:$false] %s4637_s21 }
  0xb3   : > { %s4639_s1 = scalar_lea.vmem %s4638_s21, 28672  ;;  %p4640_p7 = scmp.lt.s32.totalorder %s4996_s9, %s4638_s21 }
  0xb4   : > { %p4635_p1 = pnand %p4633_p10, %p4619_p8  ;;  %p4641_p11 = scmp.lt.s32.totalorder %s4639_s1, %s4632_s23 }
  0xb6   : > { %p4636_p9 = pneg %p4635_p1  ;;  %p4642_p12 = por %p4641_p11, %p4640_p7 }
  0xb8   : > { %p4643_p13 = pnand %p4642_p12, %p4636_p9 }
  0xba   : > { %4646 = shalt.err (!%p4643_p13)
}
  0xbb   : > { %s4738_s10 = smov 896   ;;  %s4739_s13 = smov 56  }
  0xbc   : > { %4155 = dma.hbm_to_vmem [thread:$0]  (!%p4987_p4), %s4994_s20, 14336, %s4996_s9, %s4998_s19, %s4738_s10, %s4738_s10, %s4739_s13  }
  0xbd   : > { %p5644_p8 = scmp.ne.s32.totalorder %s5635_s8, 0 }
  0xbe   : > { %s5029_s16 = sand.u32 (!%p5644_p8), 1, %s4717_s25  }
  0xbf   : > { %318 = sbr.rel (%p5644_p8) target bundleno = 1203 (0x4b3), region = 48  ;;  %s321_s14 = scalar_lea.sflag (!%p5644_p8), [#allocation3], %s5029_s16 }
  0xc0   : > { %s4104_s18 = smul.u32 (!%p5644_p8), 896, %s5029_s16 }
  0xc2   : > { %s5033_s23 = scalar_lea.vmem (!%p5644_p8), [#allocation2], %s4104_s18 }
  0xc6   : > { %4692 = dma.done.wait (%p4971_p0), %s321_s14, 14336  }
  0xc7   : > { %4694 = vsyncadd (%p4971_p0), %s321_s14, 4294952960  ;;  %p5645_p7 = scmp.eq.s32.totalorder %s4805_s30, 0 }
  0xc9   : > { %4696 = dma.done.wait (%p5645_p7), [#allocation6], 18864   ;;  %p5646_p9 = pmov %p5645_p7 }
  0xca   : > { %p5647_p4 = pmov %p5645_p7 }
  0xcb   : > { %4698 = vsyncadd (%p5646_p9), [#allocation6], 4294948432 }
  0xcc   : > { %4700 = dma.done.wait (%p5647_p4), [#allocation9], 3088   ;;  %p5648_p3 = pmov %p5647_p4 }
  0xce   : > { %4702 = vsyncadd (%p5648_p3), [#allocation9], 4294964208  ;;  %p5649_p6 = pmov %p5648_p3 }
  0xcf   : > { %p5650_p2 = pmov %p5648_p3 }
  0xd0   : > { %4704 = dma.done.wait (%p5649_p6), [#allocation12], 1040  }
  0xd1   : > { %4706 = vsyncadd (%p5650_p2), [#allocation12], 4294966256  ;;  %v4221_v0 = vld [vmem:[#allocation5 + $0x4] ss:$12 sps:$4 sm:$0xff]   ;;  %v4223_v1 = vld [vmem:[#allocation5 + $0xc8] ss:$12 sps:$4 sm:$0xff]  }
  0xd2   : > { %1572 = vmatprep.subr.bf16.mxu0 %v4221_v0  ;;  %v4224_v2 = vld [vmem:[#allocation5] ss:$12 sps:$4 sm:$0xff]   ;;  %3595 = vmatprep.subr.bf16.mxu1 %v4223_v1  ;;  %v4225_v3 = vld [vmem:[#allocation5 + $0x8] ss:$12 sps:$4 sm:$0xff]   ;;  %v4229_v6 = vld [vmem:[#allocation5 + $0x18] ss:$12 sps:$4 sm:$0xff]  }
  0xd3   : > { %1573 = vmatpush1.bf16.msra.mxu0 %v4224_v2  ;;  %v4226_v4 = vld [vmem:[#allocation5 + $0x1c] ss:$12 sps:$4 sm:$0xff]   ;;  %3596 = vmatpush3.bf16.msra.mxu1 %v4225_v3  ;;  %v4228_v5 = vld [vmem:[#allocation5 + $0xe0] ss:$12 sps:$4 sm:$0xff]   ;;  %v4233_v9 = vld [vmem:[#allocation5 + $0xf8] ss:$12 sps:$4 sm:$0xff]  }
  0xd4   : > { %1574 = vmatprep.subr.bf16.mxu0 %v4226_v4  ;;  %v4230_v7 = vld [vmem:[#allocation5 + $0x20] ss:$12 sps:$4 sm:$0xff]   ;;  %3597 = vmatprep.subr.bf16.mxu1 %v4228_v5  ;;  %v4234_v10 = vld [vmem:[#allocation5 + $0x30] ss:$12 sps:$4 sm:$0xff]   ;;  %v4235_v11 = vld [vmem:[#allocation5 + $0x38] ss:$12 sps:$4 sm:$0xff]  }
  0xd5   : > { %v4231_v8 = vld [vmem:[#allocation5 + $0x34] ss:$12 sps:$4 sm:$0xff]   ;;  %v4236_v12 = vld [vmem:[#allocation5 + $0x4c] ss:$12 sps:$4 sm:$0xff]   ;;  %v4238_v13 = vld [vmem:[#allocation5 + $0x110] ss:$12 sps:$4 sm:$0xff]  }
  0xd6   : > { %v4239_v14 = vld [vmem:[#allocation5 + $0x48] ss:$12 sps:$4 sm:$0xff]   ;;  %v4240_v15 = vld [vmem:[#allocation5 + $0x50] ss:$12 sps:$4 sm:$0xff]   ;;  %v4244_v18 = vld [vmem:[#allocation5 + $0x60] ss:$12 sps:$4 sm:$0xff]  }
  0xd7   : > { %1575 = vmatpush1.bf16.msra.mxu0 %v4229_v6  ;;  %3598 = vmatpush3.bf16.msra.mxu1 %v4230_v7  ;;  %v4241_v16 = vld [vmem:[#allocation5 + $0x64] ss:$12 sps:$4 sm:$0xff]   ;;  %v4243_v17 = vld [vmem:[#allocation5 + $0x128] ss:$12 sps:$4 sm:$0xff]   ;;  %v4248_v21 = vld [vmem:[#allocation5 + $0x140] ss:$12 sps:$4 sm:$0xff]  }
  0xd8   : > { %1576 = vmatprep.subr.bf16.mxu0 %v4231_v8  ;;  %3599 = vmatprep.subr.bf16.mxu1 %v4233_v9  ;;  %v4245_v19 = vld [vmem:[#allocation5 + $0x68] ss:$12 sps:$4 sm:$0xff]   ;;  %v4249_v22 = vld [vmem:[#allocation5 + $0x78] ss:$12 sps:$4 sm:$0xff]   ;;  %v4250_v23 = vld [vmem:[#allocation5 + $0x80] ss:$12 sps:$4 sm:$0xff]  }
  0xd9   : > { %v4246_v20 = vld [vmem:[#allocation5 + $0x7c] ss:$12 sps:$4 sm:$0xff]   ;;  %v4251_v24 = vld [vmem:[#allocation5 + $0x94] ss:$12 sps:$4 sm:$0xff]   ;;  %v4253_v25 = vld [vmem:[#allocation5 + $0x158] ss:$12 sps:$4 sm:$0xff]  }
  0xda   : > { %v4254_v26 = vld [vmem:[#allocation5 + $0x90] ss:$12 sps:$4 sm:$0xff]   ;;  %v4255_v27 = vld [vmem:[#allocation5 + $0x98] ss:$12 sps:$4 sm:$0xff]   ;;  %v4259_v30 = vld [vmem:[#allocation5 + $0xa8] ss:$12 sps:$4 sm:$0xff]  }
  0xdb   : > { %1577 = vmatpush1.bf16.msra.mxu0 %v4234_v10  ;;  %3600 = vmatpush3.bf16.msra.mxu1 %v4235_v11  ;;  %v4256_v28 = vld [vmem:[#allocation5 + $0xac] ss:$12 sps:$4 sm:$0xff]   ;;  %v4258_v29 = vld [vmem:[#allocation5 + $0x170] ss:$12 sps:$4 sm:$0xff]   ;;  %v390_v32 = vld [vmem:[%s5033_s23 + $0x40] sm:$0xff]  ;;  %vm1547_vm0 = vcmask 130048  }
  0xdc   : > { %1578 = vmatprep.subr.bf16.mxu0 %v4236_v12  ;;  %3601 = vmatprep.subr.bf16.mxu1 %v4238_v13  ;;  %v383_v31 = vld [vmem:[%s5033_s23 + $0x8] sm:$0xff]  ;;  %v4260_v33 = vld [vmem:[#allocation5 + $0xb0] ss:$12 sps:$4 sm:$0xff]   ;;  %v382_v36 = vld [vmem:[%s5033_s23] sm:$0xff]  ;;  %s3312_s8 = sshll.u32 %s5029_s16, 6  ;;  %s3547_s20 = sshll.u32 %s4805_s30, 10 }
  0xdd   : > { %v495_v34 = vpack.c.bf16 %v390_v32, %v383_v31  ;;  %v4261_v35 = vld [vmem:[#allocation5 + $0xc4] ss:$12 sps:$4 sm:$0xff]   ;;  %v389_v37 = vld [vmem:[%s5033_s23 + $0x38] sm:$0xff]  ;;  %v4263_v41 = vld [vmem:[#allocation5 + $0xc0] ss:$12 sps:$4 sm:$0xff]   ;;  %s5562_s29 = scalar_lea.vmem [#allocation14], %s3312_s8  ;;  %s5577_s15 = scalar_lea.hbm %s5630_s7, %s3547_s20 }
  0xde   : > { %v397_v38 = vld [vmem:[%s5033_s23 + $0x78] sm:$0xff]  ;;  %v404_v39 = vld [vmem:[%s5033_s23 + $0xb0] sm:$0xff]  ;;  %v5057_v40 = vpack.c.bf16 %v389_v37, %v382_v36  ;;  %v403_v47 = vld [vmem:[%s5033_s23 + $0xa8] sm:$0xff]  ;;  %s3163_s17 = sshll.u32 %s5562_s29, 4  ;;  %s3150_s30 = scalar_lea.sflag [#allocation4], %s5029_s16  ;;  %s5572_s17 = int_to_ptr.vmem [resolvable:$true] %s3163_s17 }
  0xdf   : > { %1579 = vmatpush1.bf16.msra.mxu0 %v4239_v14  ;;  %3602 = vmatpush3.bf16.msra.mxu1 %v4240_v15  ;;  %v4264_v42 = vld [vmem:[#allocation5 + $0xdc] ss:$12 sps:$4 sm:$0xff]   ;;  %v5059_v43 = vpack.c.bf16 %v404_v39, %v397_v38  ;;  %v4266_v44 = vld [vmem:[#allocation5 + $0xd8] ss:$12 sps:$4 sm:$0xff]   ;;  %v4267_v45 = vld [vmem:[#allocation5 + $0xf4] ss:$12 sps:$4 sm:$0xff]  }
  0xe0   : > { %1580 = vmatprep.subr.bf16.mxu0 %v4241_v16  ;;  %3603 = vmatprep.subr.bf16.mxu1 %v4243_v17  ;;  %v396_v46 = vld [vmem:[%s5033_s23 + $0x70] sm:$0xff]  ;;  %v411_v48 = vld [vmem:[%s5033_s23 + $0xe8] sm:$0xff]  ;;  %v418_v49 = vld [vmem:[%s5033_s23 + $0x120] sm:$0xff]  ;;  %s4647_s21 = scalar_lea.vmem %s5572_s17, 1024  ;;  %p5651_p5 = scmp.ne.s32.totalorder %s5641_s28, 0 }
  0xe1   : > { %2056 = vmatprep.mubr.bf16.mxu1 %v495_v34  ;;  %1604 = vmatprep.mubr.bf16.mxu0 %v495_v34  ;;  %v5067_v50 = vpack.c.bf16 %v403_v47, %v396_v46  ;;  %v4269_v51 = vld [vmem:[#allocation5 + $0xf0] ss:$12 sps:$4 sm:$0xff]   ;;  %v4270_v52 = vld [vmem:[#allocation5 + $0x10c] ss:$12 sps:$4 sm:$0xff]   ;;  %v5069_v53 = vpack.c.bf16 %v418_v49, %v411_v48  ;;  %v4272_v54 = vld [vmem:[#allocation5 + $0x108] ss:$12 sps:$4 sm:$0xff]   ;;  %p4648_p0 = scmp.ne.s32.totalorder %s5572_s17, %s4647_s21 }
  0xe2   : > { %v4273_v55 = vld [vmem:[#allocation5 + $0x124] ss:$12 sps:$4 sm:$0xff]   ;;  %v417_v57 = vld [vmem:[%s5033_s23 + $0x118] sm:$0xff]  ;;  %v4288_v60 = vld [vmem:[#allocation5 + $0x248] ss:$12 sps:$4 sm:$0xff]   ;;  %s4741_s1 = smov [#allocation14]  }
  0xe3   : > { %1581 = vmatpush1.bf16.msra.mxu0 %v4244_v18  ;;  %3604 = vmatpush3.bf16.msra.mxu1 %v4245_v19  ;;  %v410_v56 = vld [vmem:[%s5033_s23 + $0xe0] sm:$0xff]  ;;  %v425_v58 = vld [vmem:[%s5033_s23 + $0x158] sm:$0xff]  ;;  %v432_v59 = vld [vmem:[%s5033_s23 + $0x190] sm:$0xff]  ;;  %p4649_p10 = pnand %p4648_p0, %p5651_p5  ;;  %s4651_s10 = sshll.u32 %s4741_s1, 4  ;;  %s4652_s10 = int_to_ptr.vmem [resolvable:$false] %s4651_s10 }
  0xe4   : > { %1582 = vmatprep.subr.bf16.mxu0 %v4246_v20  ;;  %3605 = vmatprep.subr.bf16.mxu1 %v4248_v21  ;;  %v4289_v61 = vld [vmem:[#allocation5 + $0x188] ss:$12 sps:$4 sm:$0xff]   ;;  %v5077_v62 = vpack.c.bf16 %v417_v57, %v410_v56  ;;  %v4275_v63 = vld [vmem:[#allocation5 + $0x120] ss:$12 sps:$4 sm:$0xff]   ;;  %v5079_v1 = vpack.c.bf16 %v432_v59, %v425_v58  ;;  %v4278_v3 = vld [vmem:[#allocation5 + $0x138] ss:$12 sps:$4 sm:$0xff]   ;;  %p4654_p11 = scmp.lt.s32.totalorder %s5572_s17, %s4652_s10 }
  0xe5   : > { %v4276_v0 = vld [vmem:[#allocation5 + $0x13c] ss:$12 sps:$4 sm:$0xff]   ;;  %v4293_v2 = vld [vmem:[#allocation5 + $0x260] ss:$12 sps:$4 sm:$0xff]   ;;  %v424_v6 = vld [vmem:[%s5033_s23 + $0x150] sm:$0xff]  ;;  %p4650_p1 = pneg %p4649_p10  ;;  %s4653_s13 = scalar_lea.vmem %s4652_s10, 2048 }
  0xe6   : > { %v4294_v4 = vld [vmem:[#allocation5 + $0x1a0] ss:$12 sps:$4 sm:$0xff]   ;;  %v4298_v10 = vld [vmem:[#allocation5 + $0x278] ss:$12 sps:$4 sm:$0xff]   ;;  %v4281_v13 = vld [vmem:[#allocation5 + $0x150] ss:$12 sps:$4 sm:$0xff]   ;;  %p4655_p12 = scmp.lt.s32.totalorder %s4653_s13, %s4647_s21 }
  0xe7   : > { %1583 = vmatpush1.bf16.msra.mxu0 %v4249_v22  ;;  %3606 = vmatpush3.bf16.msra.mxu1 %v4250_v23  ;;  %v4279_v5 = vld [vmem:[#allocation5 + $0x154] ss:$12 sps:$4 sm:$0xff]   ;;  %v431_v7 = vld [vmem:[%s5033_s23 + $0x188] sm:$0xff]  ;;  %v4299_v11 = vld [vmem:[#allocation5 + $0x1b8] ss:$12 sps:$4 sm:$0xff]  }
  0xe8   : > { %1584 = vmatprep.subr.bf16.mxu0 %v4251_v24  ;;  %3607 = vmatprep.subr.bf16.mxu1 %v4253_v25  ;;  %v439_v8 = vld [vmem:[%s5033_s23 + $0x1c8] sm:$0xff]  ;;  %v446_v9 = vld [vmem:[%s5033_s23 + $0x200] sm:$0xff]  ;;  %v5087_v12 = vpack.c.bf16 %v431_v7, %v424_v6  ;;  %v4303_v16 = vld [vmem:[#allocation5 + $0x290] ss:$12 sps:$4 sm:$0xff]   ;;  %p4656_p13 = por %p4655_p12, %p4654_p11 }
  0xe9   : > { %v4282_v14 = vld [vmem:[#allocation5 + $0x16c] ss:$12 sps:$4 sm:$0xff]   ;;  %v5089_v15 = vpack.c.bf16 %v446_v9, %v439_v8  ;;  %v4304_v17 = vld [vmem:[#allocation5 + $0x1d0] ss:$12 sps:$4 sm:$0xff]   ;;  %v4284_v18 = vld [vmem:[#allocation5 + $0x168] ss:$12 sps:$4 sm:$0xff]  }
  0xea   : > { %v4287_v19 = vld [vmem:[#allocation5 + $0x184] ss:$12 sps:$4 sm:$0xff]   ;;  %v445_v21 = vld [vmem:[%s5033_s23 + $0x1f8] sm:$0xff]  ;;  %v4308_v24 = vld [vmem:[#allocation5 + $0x2a8] ss:$12 sps:$4 sm:$0xff]   ;;  %p4657_p8 = pnand %p4656_p13, %p4650_p1 }
  0xeb   : > { %1585 = vmatpush1.bf16.msra.mxu0 %v4254_v26  ;;  %3608 = vmatpush3.bf16.msra.mxu1 %v4255_v27  ;;  %v438_v20 = vld [vmem:[%s5033_s23 + $0x1c0] sm:$0xff]  ;;  %v453_v22 = vld [vmem:[%s5033_s23 + $0x238] sm:$0xff]  ;;  %v460_v23 = vld [vmem:[%s5033_s23 + $0x270] sm:$0xff] }
  0xec   : > { %1586 = vmatprep.subr.bf16.mxu0 %v4256_v28  ;;  %3609 = vmatprep.subr.bf16.mxu1 %v4258_v29  ;;  %v4309_v25 = vld [vmem:[#allocation5 + $0x1e8] ss:$12 sps:$4 sm:$0xff]   ;;  %v4285_v26 = vld [vmem:[#allocation5 + $0x180] ss:$12 sps:$4 sm:$0xff]   ;;  %v5097_v27 = vpack.c.bf16 %v445_v21, %v438_v20  ;;  %v4290_v32 = vld [vmem:[#allocation5 + $0x198] ss:$12 sps:$4 sm:$0xff]  }
  0xed   : > { %v4292_v28 = vld [vmem:[#allocation5 + $0x19c] ss:$12 sps:$4 sm:$0xff]   ;;  %v4313_v29 = vld [vmem:[#allocation5 + $0x2c0] ss:$12 sps:$4 sm:$0xff]   ;;  %v452_v34 = vld [vmem:[%s5033_s23 + $0x230] sm:$0xff] }
  0xee   : > { %v4314_v31 = vld [vmem:[#allocation5 + $0x200] ss:$12 sps:$4 sm:$0xff]   ;;  %v4318_v38 = vld [vmem:[#allocation5 + $0x2d8] ss:$12 sps:$4 sm:$0xff]   ;;  %v4300_v46 = vld [vmem:[#allocation5 + $0x1c8] ss:$12 sps:$4 sm:$0xff]  }
  0xef   : > { %1587 = vmatpush1.bf16.msra.mxu0 %v4259_v30  ;;  %3610 = vmatpush3.bf16.msra.mxu1 %v4260_v33  ;;  %v5099_v30 = vpack.c.bf16 %v460_v23, %v453_v22  ;;  %v4297_v33 = vld [vmem:[#allocation5 + $0x1b4] ss:$12 sps:$4 sm:$0xff]   ;;  %v467_v36 = vld [vmem:[%s5033_s23 + $0x2a8] sm:$0xff]  ;;  %v4319_v39 = vld [vmem:[#allocation5 + $0x218] ss:$12 sps:$4 sm:$0xff]  }
  0xf0   : > { %1588 = vmatprep.subr.bf16.mxu0 %v4261_v35  ;;  %3659 = vmatprep.subr.bf16.mxu1 %v4288_v60  ;;  %v459_v35 = vld [vmem:[%s5033_s23 + $0x268] sm:$0xff]  ;;  %v474_v37 = vld [vmem:[%s5033_s23 + $0x2e0] sm:$0xff]  ;;  %v473_v49 = vld [vmem:[%s5033_s23 + $0x2d8] sm:$0xff] }
  0xf1   : > { %v4307_v47 = vld [vmem:[#allocation5 + $0x1e4] ss:$12 sps:$4 sm:$0xff]   ;;  %v4317_v57 = vld [vmem:[#allocation5 + $0x214] ss:$12 sps:$4 sm:$0xff]   ;;  %v487_v59 = vld [vmem:[%s5033_s23 + $0x348] sm:$0xff] }
  0xf2   : > { %2057 = vmatmul.mubr.bf16.vlgmr.msra.gmra.mrb[0].mxu1 %v5057_v40  ;;  %v466_v48 = vld [vmem:[%s5033_s23 + $0x2a0] sm:$0xff]  ;;  %v480_v58 = vld [vmem:[%s5033_s23 + $0x310] sm:$0xff]  ;;  %v385_v60 = vld [vmem:[%s5033_s23 + $0x18] sm:$0xff] }
  0xf3   : > { %1589 = vmatpush1.bf16.msra.mxu0 %v4263_v41  ;;  %2064 = vmatprep.mubr.bf16.mxu1 %v5059_v43  ;;  %v5109_v41 = vpack.c.bf16 %v459_v35, %v452_v34  ;;  %v399_v6 = vld [vmem:[%s5033_s23 + $0x88] sm:$0xff]  ;;  %v406_v8 = vld [vmem:[%s5033_s23 + $0xc0] sm:$0xff]  ;;  %v420_v20 = vld [vmem:[%s5033_s23 + $0x130] sm:$0xff] }
  0xf4   : > { %1590 = vmatprep.subr.bf16.mxu0 %v4264_v42  ;;  %3660 = vmatpush3.bf16.msra.mxu1 %v4289_v61  ;;  %v4302_v42 = vld [vmem:[#allocation5 + $0x1cc] ss:$12 sps:$4 sm:$0xff]   ;;  %v392_v61 = vld [vmem:[%s5033_s23 + $0x50] sm:$0xff]  ;;  %v434_v34 = vld [vmem:[%s5033_s23 + $0x1a0] sm:$0xff] }
  0xf5   : > { %3661 = vmatprep.subr.bf16.mxu1 %v4293_v2  ;;  %v5135_v2 = vpack.c.bf16 %v392_v61, %v385_v60  ;;  %v4352_v7 = vld [vmem:[#allocation5 + $0x3c8] ss:$12 sps:$4 sm:$0xff]   ;;  %v4325_v9 = vld [vmem:[#allocation5 + $0x240] ss:$12 sps:$4 sm:$0xff]   ;;  %v4362_v22 = vld [vmem:[#allocation5 + $0x3f8] ss:$12 sps:$4 sm:$0xff]  }
  0xf6   : > { %v4358_v21 = vld [vmem:[#allocation5 + $0x320] ss:$12 sps:$4 sm:$0xff]   ;;  %v4331_v23 = vld [vmem:[#allocation5 + $0x270] ss:$12 sps:$4 sm:$0xff]  }
  0xf7   : > { %1591 = vmatpush1.bf16.msra.mxu0 %v4266_v44  ;;  %v4323_v44 = vld [vmem:[#allocation5 + $0x2f0] ss:$12 sps:$4 sm:$0xff]   ;;  %v447_v60 = vld [vmem:[%s5033_s23 + $0x208] sm:$0xff] }
  0xf8   : > { %1592 = vmatprep.subr.bf16.mxu0 %v4267_v45  ;;  %3662 = vmatpush3.bf16.msra.mxu1 %v4294_v4  ;;  %v5111_v45 = vpack.c.bf16 %v474_v37, %v467_v36  ;;  %v384_v4 = vld [vmem:[%s5033_s23 + $0x10] sm:$0xff]  ;;  %v4337_v37 = vld [vmem:[#allocation5 + $0x2a0] ss:$12 sps:$4 sm:$0xff]  }
  0xf9   : > { %3663 = vmatprep.subr.bf16.mxu1 %v4298_v10  ;;  %v4368_v35 = vld [vmem:[#allocation5 + $0x350] ss:$12 sps:$4 sm:$0xff]   ;;  %v4372_v36 = vld [vmem:[#allocation5 + $0x428] ss:$12 sps:$4 sm:$0xff]  }
  0xfa   : > { %2065 = vmatmul.mubr.bf16.gmra.mrb[4].mxu1 %v5067_v50  ;;  %v455_v61 = vld [vmem:[%s5033_s23 + $0x248] sm:$0xff] }
  0xfb   : > { %1593 = vmatpush1.bf16.msra.mxu0 %v4269_v51  ;;  %2072 = vmatprep.mubr.bf16.mxu1 %v5069_v53  ;;  %v481_v51 = vld [vmem:[%s5033_s23 + $0x318] sm:$0xff] }
  0xfc   : > { %1594 = vmatprep.subr.bf16.mxu0 %v4270_v52  ;;  %3664 = vmatpush3.bf16.msra.mxu1 %v4299_v11  ;;  %v488_v52 = vld [vmem:[%s5033_s23 + $0x350] sm:$0xff]  ;;  %v4330_v11 = vld [vmem:[#allocation5 + $0x25c] ss:$12 sps:$4 sm:$0xff]  }
  0xfd   : > { %3665 = vmatprep.subr.bf16.mxu1 %v4303_v16  ;;  %v5123_v56 = vpack.c.bf16 %v488_v52, %v481_v51  ;;  %v4333_v16 = vld [vmem:[#allocation5 + $0x274] ss:$12 sps:$4 sm:$0xff]   ;;  %v4382_v51 = vld [vmem:[#allocation5 + $0x458] ss:$12 sps:$4 sm:$0xff]   ;;  %v4343_v52 = vld [vmem:[#allocation5 + $0x2d0] ss:$12 sps:$4 sm:$0xff]  }
  0xff   : > { %1595 = vmatpush1.bf16.msra.mxu0 %v4272_v54  ;;  %v5121_v54 = vpack.c.bf16 %v473_v49, %v466_v48  ;;  %v448_v48 = vld [vmem:[%s5033_s23 + $0x210] sm:$0xff]  ;;  %v4378_v49 = vld [vmem:[#allocation5 + $0x380] ss:$12 sps:$4 sm:$0xff]  }
 0x100   : > { %1596 = vmatprep.subr.bf16.mxu0 %v4273_v55  ;;  %3666 = vmatpush3.bf16.msra.mxu1 %v4304_v17  ;;  %v4312_v55 = vld [vmem:[#allocation5 + $0x1fc] ss:$12 sps:$4 sm:$0xff]   ;;  %v398_v17 = vld [vmem:[%s5033_s23 + $0x80] sm:$0xff] }
 0x101   : > { %3667 = vmatprep.subr.bf16.mxu1 %v4308_v24 }
 0x102   : > { %2073 = vmatmul.mubr.bf16.gmra.mrb[8].mxu1 %v5077_v62 }
 0x103   : > { %1597 = vmatpush1.bf16.msra.mxu0 %v4275_v63  ;;  %2080 = vmatprep.mubr.bf16.mxu1 %v5079_v1  ;;  %v4315_v63 = vld [vmem:[#allocation5 + $0x210] ss:$12 sps:$4 sm:$0xff]  }
 0x104   : > { %1598 = vmatprep.subr.bf16.mxu0 %v4276_v0  ;;  %3668 = vmatpush3.bf16.msra.mxu1 %v4309_v25  ;;  %v4322_v0 = vld [vmem:[#allocation5 + $0x22c] ss:$12 sps:$4 sm:$0xff]  }
 0x105   : > { %3669 = vmatprep.subr.bf16.mxu1 %v4313_v29  ;;  %v4336_v25 = vld [vmem:[#allocation5 + $0x28c] ss:$12 sps:$4 sm:$0xff]   ;;  %v4367_v29 = vld [vmem:[#allocation5 + $0x410] ss:$12 sps:$4 sm:$0xff]  }
 0x107   : > { %1599 = vmatpush1.bf16.msra.mxu0 %v4278_v3  ;;  %v4327_v3 = vld [vmem:[#allocation5 + $0x244] ss:$12 sps:$4 sm:$0xff]  }
 0x108   : > { %1600 = vmatprep.subr.bf16.mxu0 %v4279_v5  ;;  %3670 = vmatpush3.bf16.msra.mxu1 %v4314_v31  ;;  %v391_v5 = vld [vmem:[%s5033_s23 + $0x48] sm:$0xff]  ;;  %v412_v31 = vld [vmem:[%s5033_s23 + $0xf0] sm:$0xff] }
 0x109   : > { %3671 = vmatprep.subr.bf16.mxu1 %v4318_v38  ;;  %v5145_v10 = vpack.c.bf16 %v391_v5, %v384_v4  ;;  %v4361_v5 = vld [vmem:[#allocation5 + $0x334] ss:$12 sps:$4 sm:$0xff]  }
 0x10a   : > { %2081 = vmatmul.mubr.bf16.gmra.mrb[12].mxu1 %v5087_v12 }
 0x10b   : > { %1601 = vmatpush1.bf16.msra.mxu0 %v4281_v13  ;;  %2088 = vmatprep.mubr.bf16.mxu1 %v5089_v15  ;;  %v5147_v13 = vpack.c.bf16 %v406_v8, %v399_v6  ;;  %v454_v6 = vld [vmem:[%s5033_s23 + $0x240] sm:$0xff]  ;;  %v469_v8 = vld [vmem:[%s5033_s23 + $0x2b8] sm:$0xff] }
 0x10c   : > { %1602 = vmatprep.subr.bf16.mxu0 %v4282_v14  ;;  %3672 = vmatpush3.bf16.msra.mxu1 %v4319_v39  ;;  %v4353_v14 = vld [vmem:[#allocation5 + $0x308] ss:$12 sps:$4 sm:$0xff]  }
 0x10d   : > { %3673 = vmatprep.subr.bf16.mxu1 %v4323_v44  ;;  %v4342_v39 = vld [vmem:[#allocation5 + $0x2bc] ss:$12 sps:$4 sm:$0xff]   ;;  %v4377_v44 = vld [vmem:[#allocation5 + $0x440] ss:$12 sps:$4 sm:$0xff]  }
 0x10f   : > { %1603 = vmatpush1.bf16.msra.mxu0 %v4284_v18  ;;  %v405_v18 = vld [vmem:[%s5033_s23 + $0xb8] sm:$0xff] }
 0x110   : > { %1685 = vmatprep.subr.bf16.mxu0 %v4287_v19  ;;  %v413_v19 = vld [vmem:[%s5033_s23 + $0xf8] sm:$0xff]  ;;  %v5157_v24 = vpack.c.bf16 %v405_v18, %v398_v17  ;;  %v475_v17 = vld [vmem:[%s5033_s23 + $0x2e8] sm:$0xff] }
 0x111   : > { %v483_v18 = vld [vmem:[%s5033_s23 + $0x328] sm:$0xff] }
 0x112   : > { %1605 = vmatmul.mubr.bf16.vlgmr.msra.gmra.mrb[0].mxu0 %v5057_v40  ;;  %2089 = vmatmul.mubr.bf16.gmra.mrb[16].mxu1 %v5097_v27  ;;  %v4295_v40 = vld [vmem:[#allocation5 + $0x1b0] ss:$12 sps:$4 sm:$0xff]  }
 0x113   : > { %1686 = vmatpush1.bf16.msra.mxu0 %v4285_v26  ;;  %1614 = vmatprep.mubr.bf16.mxu0 %v5059_v43  ;;  %v4324_v43 = vld [vmem:[#allocation5 + $0x230] ss:$12 sps:$4 sm:$0xff]   ;;  %v4334_v26 = vld [vmem:[#allocation5 + $0x288] ss:$12 sps:$4 sm:$0xff]  }
 0x114   : > { %1687 = vmatprep.subr.bf16.mxu0 %v4292_v28  ;;  %2096 = vmatprep.mubr.bf16.mxu1 %v5099_v30  ;;  %v4363_v28 = vld [vmem:[#allocation5 + $0x338] ss:$12 sps:$4 sm:$0xff]  }
 0x115   : > { %3674 = vmatpush3.bf16.msra.mxu1 %v4324_v43  ;;  %v426_v43 = vld [vmem:[%s5033_s23 + $0x160] sm:$0xff] }
 0x116   : > { %3723 = vmatprep.subr.bf16.mxu1 %v4352_v7  ;;  %v461_v7 = vld [vmem:[%s5033_s23 + $0x278] sm:$0xff] }
 0x117   : > { %1688 = vmatpush1.bf16.msra.mxu0 %v4290_v32  ;;  %v419_v32 = vld [vmem:[%s5033_s23 + $0x128] sm:$0xff] }
 0x118   : > { %1689 = vmatprep.subr.bf16.mxu0 %v4297_v33  ;;  %v427_v33 = vld [vmem:[%s5033_s23 + $0x168] sm:$0xff]  ;;  %v5169_v38 = vpack.c.bf16 %v419_v32, %v412_v31  ;;  %v394_v31 = vld [vmem:[%s5033_s23 + $0x60] sm:$0xff] }
 0x11a   : > { %1615 = vmatmul.mubr.bf16.gmra.mrb[4].mxu0 %v5067_v50  ;;  %2097 = vmatmul.mubr.bf16.gmra.mrb[20].mxu1 %v5109_v41  ;;  %v4305_v50 = vld [vmem:[#allocation5 + $0x1e0] ss:$12 sps:$4 sm:$0xff]  }
 0x11b   : > { %1690 = vmatpush1.bf16.msra.mxu0 %v4295_v40  ;;  %1624 = vmatprep.mubr.bf16.mxu0 %v5069_v53  ;;  %v4310_v53 = vld [vmem:[#allocation5 + $0x1f8] ss:$12 sps:$4 sm:$0xff]  }
 0x11c   : > { %1691 = vmatprep.subr.bf16.mxu0 %v4302_v42  ;;  %2104 = vmatprep.mubr.bf16.mxu1 %v5111_v45  ;;  %v4340_v40 = vld [vmem:[#allocation5 + $0x2b8] ss:$12 sps:$4 sm:$0xff]   ;;  %v4373_v42 = vld [vmem:[#allocation5 + $0x368] ss:$12 sps:$4 sm:$0xff]  }
 0x11f   : > { %1692 = vmatpush1.bf16.msra.mxu0 %v4300_v46  ;;  %v433_v46 = vld [vmem:[%s5033_s23 + $0x198] sm:$0xff] }
 0x120   : > { %1693 = vmatprep.subr.bf16.mxu0 %v4307_v47  ;;  %v441_v47 = vld [vmem:[%s5033_s23 + $0x1d8] sm:$0xff] }
 0x122   : > { %1625 = vmatmul.mubr.bf16.gmra.mrb[8].mxu0 %v5077_v62  ;;  %2105 = vmatmul.mubr.bf16.gmra.mrb[24].mxu1 %v5121_v54  ;;  %v5133_v62 = vpack.c.bf16 %v487_v59, %v480_v58  ;;  %v4351_v58 = vld [vmem:[#allocation5 + $0x304] ss:$12 sps:$4 sm:$0xff]  }
 0x123   : > { %1694 = vmatpush1.bf16.msra.mxu0 %v4305_v50  ;;  %1634 = vmatprep.mubr.bf16.mxu0 %v5079_v1  ;;  %v4320_v1 = vld [vmem:[#allocation5 + $0x228] ss:$12 sps:$4 sm:$0xff]   ;;  %v5181_v50 = vpack.c.bf16 %v433_v46, %v426_v43 }
 0x124   : > { %1695 = vmatprep.subr.bf16.mxu0 %v4312_v55  ;;  %2112 = vmatprep.mubr.bf16.mxu1 %v5123_v56  ;;  %v5183_v55 = vpack.c.bf16 %v448_v48, %v441_v47  ;;  %v440_v59 = vld [vmem:[%s5033_s23 + $0x1d0] sm:$0xff]  ;;  %v407_v48 = vld [vmem:[%s5033_s23 + $0xc8] sm:$0xff] }
 0x125   : > { %v4397_v46 = vld [vmem:[#allocation5 + $0x3f4] ss:$12 sps:$4 sm:$0xff]  }
 0x126   : > { %v400_v47 = vld [vmem:[%s5033_s23 + $0x90] sm:$0xff] }
 0x127   : > { %1696 = vmatpush1.bf16.msra.mxu0 %v4310_v53  ;;  %v4387_v53 = vld [vmem:[#allocation5 + $0x470] ss:$12 sps:$4 sm:$0xff]  }
 0x128   : > { %1697 = vmatprep.subr.bf16.mxu0 %v4317_v57  ;;  %v4346_v57 = vld [vmem:[#allocation5 + $0x2e8] ss:$12 sps:$4 sm:$0xff]  }
 0x12a   : > { %1635 = vmatmul.mubr.bf16.gmra.mrb[12].mxu0 %v5087_v12  ;;  %2113 = vmatmul.mubr.bf16.gmra.mrb[28].mxu1 %v5133_v62  ;;  %v4328_v12 = vld [vmem:[#allocation5 + $0x258] ss:$12 sps:$4 sm:$0xff]  }
 0x12b   : > { %1698 = vmatpush1.bf16.msra.mxu0 %v4315_v63  ;;  %1644 = vmatprep.mubr.bf16.mxu0 %v5089_v15  ;;  %v4357_v15 = vld [vmem:[#allocation5 + $0x3e0] ss:$12 sps:$4 sm:$0xff]   ;;  %v4388_v63 = vld [vmem:[#allocation5 + $0x3b0] ss:$12 sps:$4 sm:$0xff]  }
 0x12c   : > { %1699 = vmatprep.subr.bf16.mxu0 %v4322_v0  ;;  %2153 = vmatprep.mubr.bf16.mxu1 %v5135_v2  ;;  %v462_v0 = vld [vmem:[%s5033_s23 + $0x280] sm:$0xff] }
 0x12d   : > { %v5195_v4 = vpack.c.bf16 %v462_v0, %v455_v61  ;;  %v4401_v61 = vld [vmem:[#allocation5 + $0x420] ss:$12 sps:$4 sm:$0xff]   ;;  %v4406_v0 = vld [vmem:[#allocation5 + $0x43c] ss:$12 sps:$4 sm:$0xff]  }
 0x12f   : > { %1700 = vmatpush1.bf16.msra.mxu0 %v4320_v1  ;;  %v5193_v1 = vpack.c.bf16 %v447_v60, %v440_v59  ;;  %v429_v59 = vld [vmem:[%s5033_s23 + $0x178] sm:$0xff]  ;;  %v436_v60 = vld [vmem:[%s5033_s23 + $0x1b0] sm:$0xff] }
 0x130   : > { %1701 = vmatprep.subr.bf16.mxu0 %v4327_v3  ;;  %v4356_v3 = vld [vmem:[#allocation5 + $0x31c] ss:$12 sps:$4 sm:$0xff]  }
 0x132   : > { %1645 = vmatmul.mubr.bf16.gmra.mrb[16].mxu0 %v5097_v27  ;;  %2154 = vmatmul.mubr.bf16.vlgmr.msra.gmra.mrb[32].mxu1 %v5145_v10  ;;  %v5159_v27 = vpack.c.bf16 %v420_v20, %v413_v19  ;;  %v490_v19 = vld [vmem:[%s5033_s23 + $0x360] sm:$0xff] }
 0x133   : > { %1702 = vmatpush1.bf16.msra.mxu0 %v4325_v9  ;;  %1654 = vmatprep.mubr.bf16.mxu0 %v5099_v30  ;;  %v4339_v30 = vld [vmem:[#allocation5 + $0x2a4] ss:$12 sps:$4 sm:$0xff]   ;;  %v4369_v20 = vld [vmem:[#allocation5 + $0x360] ss:$12 sps:$4 sm:$0xff]  }
 0x134   : > { %1703 = vmatprep.subr.bf16.mxu0 %v4330_v11  ;;  %2161 = vmatprep.mubr.bf16.mxu1 %v5147_v13  ;;  %v476_v9 = vld [vmem:[%s5033_s23 + $0x2f0] sm:$0xff] }
 0x135   : > { %3724 = vmatpush3.bf16.msra.mxu1 %v4353_v14  ;;  %v4359_v11 = vld [vmem:[#allocation5 + $0x330] ss:$12 sps:$4 sm:$0xff]   ;;  %v5207_v14 = vpack.c.bf16 %v476_v9, %v469_v8  ;;  %v4412_v9 = vld [vmem:[#allocation5 + $0x46c] ss:$12 sps:$4 sm:$0xff]  }
 0x136   : > { %3725 = vmatprep.subr.bf16.mxu1 %v4357_v15  ;;  %v4371_v15 = vld [vmem:[#allocation5 + $0x364] ss:$12 sps:$4 sm:$0xff]  }
 0x137   : > { %1704 = vmatpush1.bf16.msra.mxu0 %v4328_v12  ;;  %v4366_v12 = vld [vmem:[#allocation5 + $0x34c] ss:$12 sps:$4 sm:$0xff]  }
 0x138   : > { %1705 = vmatprep.subr.bf16.mxu0 %v4333_v16  ;;  %v468_v16 = vld [vmem:[%s5033_s23 + $0x2b0] sm:$0xff] }
 0x139   : > { %3726 = vmatpush3.bf16.msra.mxu1 %v4358_v21  ;;  %v5217_v21 = vpack.c.bf16 %v475_v17, %v468_v16  ;;  %v464_v16 = vld [vmem:[%s5033_s23 + $0x290] sm:$0xff]  ;;  %v4413_v17 = vld [vmem:[#allocation5 + $0x480] ss:$12 sps:$4 sm:$0xff]  }
 0x13a   : > { %1655 = vmatmul.mubr.bf16.gmra.mrb[20].mxu0 %v5109_v41  ;;  %3727 = vmatprep.subr.bf16.mxu1 %v4362_v22  ;;  %v5171_v41 = vpack.c.bf16 %v434_v34, %v427_v33  ;;  %v4376_v22 = vld [vmem:[#allocation5 + $0x37c] ss:$12 sps:$4 sm:$0xff]   ;;  %v4386_v33 = vld [vmem:[#allocation5 + $0x3ac] ss:$12 sps:$4 sm:$0xff]  }
 0x13b   : > { %2162 = vmatmul.mubr.bf16.gmra.mrb[36].mxu1 %v5157_v24  ;;  %1706 = vmatpush1.bf16.msra.mxu0 %v4331_v23  ;;  %v5219_v23 = vpack.c.bf16 %v490_v19, %v483_v18  ;;  %v4384_v34 = vld [vmem:[#allocation5 + $0x3a8] ss:$12 sps:$4 sm:$0xff]  }
 0x13c   : > { %1707 = vmatprep.subr.bf16.mxu0 %v4336_v25  ;;  %1664 = vmatprep.mubr.bf16.mxu0 %v5111_v45  ;;  %v4345_v45 = vld [vmem:[#allocation5 + $0x2d4] ss:$12 sps:$4 sm:$0xff]   ;;  %v4374_v25 = vld [vmem:[#allocation5 + $0x378] ss:$12 sps:$4 sm:$0xff]  }
 0x13d   : > { %2169 = vmatprep.mubr.bf16.mxu1 %v5159_v27  ;;  %3728 = vmatpush3.bf16.msra.mxu1 %v4363_v28  ;;  %v489_v28 = vld [vmem:[%s5033_s23 + $0x358] sm:$0xff] }
 0x13e   : > { %3729 = vmatprep.subr.bf16.mxu1 %v4367_v29  ;;  %v4379_v29 = vld [vmem:[#allocation5 + $0x390] ss:$12 sps:$4 sm:$0xff]  }
 0x13f   : > { %1708 = vmatpush1.bf16.msra.mxu0 %v4334_v26  ;;  %v4381_v26 = vld [vmem:[#allocation5 + $0x394] ss:$12 sps:$4 sm:$0xff]  }
 0x140   : > { %1709 = vmatprep.subr.bf16.mxu0 %v4339_v30  ;;  %v387_v30 = vld [vmem:[%s5033_s23 + $0x28] sm:$0xff] }
 0x141   : > { %3730 = vmatpush3.bf16.msra.mxu1 %v4368_v35  ;;  %v5231_v35 = vpack.c.bf16 %v394_v31, %v387_v30 }
 0x142   : > { %1665 = vmatmul.mubr.bf16.gmra.mrb[24].mxu0 %v5121_v54  ;;  %3731 = vmatprep.subr.bf16.mxu1 %v4372_v36  ;;  %v4348_v54 = vld [vmem:[#allocation5 + $0x2ec] ss:$12 sps:$4 sm:$0xff]   ;;  %v4391_v36 = vld [vmem:[#allocation5 + $0x3c4] ss:$12 sps:$4 sm:$0xff]  }
 0x143   : > { %2170 = vmatmul.mubr.bf16.gmra.mrb[40].mxu1 %v5169_v38  ;;  %1710 = vmatpush1.bf16.msra.mxu0 %v4337_v37  ;;  %v386_v37 = vld [vmem:[%s5033_s23 + $0x20] sm:$0xff] }
 0x144   : > { %1711 = vmatprep.subr.bf16.mxu0 %v4342_v39  ;;  %1674 = vmatprep.mubr.bf16.mxu0 %v5123_v56  ;;  %v4383_v56 = vld [vmem:[#allocation5 + $0x398] ss:$12 sps:$4 sm:$0xff]  }
 0x145   : > { %2177 = vmatprep.mubr.bf16.mxu1 %v5171_v41  ;;  %3732 = vmatpush3.bf16.msra.mxu1 %v4373_v42  ;;  %v401_v39 = vld [vmem:[%s5033_s23 + $0x98] sm:$0xff] }
 0x146   : > { %3733 = vmatprep.subr.bf16.mxu1 %v4377_v44  ;;  %v4394_v42 = vld [vmem:[#allocation5 + $0x3dc] ss:$12 sps:$4 sm:$0xff]  }
 0x147   : > { %1712 = vmatpush1.bf16.msra.mxu0 %v4340_v40  ;;  %v408_v40 = vld [vmem:[%s5033_s23 + $0xd0] sm:$0xff] }
 0x148   : > { %1713 = vmatprep.subr.bf16.mxu0 %v4345_v45  ;;  %v4392_v45 = vld [vmem:[#allocation5 + $0x3d8] ss:$12 sps:$4 sm:$0xff]   ;;  %v5243_v43 = vpack.c.bf16 %v408_v40, %v401_v39  ;;  %v416_v40 = vld [vmem:[%s5033_s23 + $0x110] sm:$0xff] }
 0x149   : > { %3734 = vmatpush3.bf16.msra.mxu1 %v4378_v49  ;;  %v415_v49 = vld [vmem:[%s5033_s23 + $0x108] sm:$0xff]  ;;  %v409_v39 = vld [vmem:[%s5033_s23 + $0xd8] sm:$0xff] }
 0x14a   : > { %1675 = vmatmul.mubr.bf16.gmra.mrb[28].mxu0 %v5133_v62  ;;  %3735 = vmatprep.subr.bf16.mxu1 %v4382_v51  ;;  %v4349_v62 = vld [vmem:[#allocation5 + $0x300] ss:$12 sps:$4 sm:$0xff]  }
 0x14b   : > { %2178 = vmatmul.mubr.bf16.gmra.mrb[44].mxu1 %v5181_v50  ;;  %1714 = vmatpush1.bf16.msra.mxu0 %v4343_v52  ;;  %v422_v51 = vld [vmem:[%s5033_s23 + $0x140] sm:$0xff]  ;;  %v4395_v52 = vld [vmem:[#allocation5 + $0x3f0] ss:$12 sps:$4 sm:$0xff]  }
 0x14c   : > { %1715 = vmatprep.subr.bf16.mxu0 %v4348_v54  ;;  %1717 = vmatprep.mubr.bf16.mxu0 %v5135_v2  ;;  %v4354_v2 = vld [vmem:[#allocation5 + $0x318] ss:$12 sps:$4 sm:$0xff]   ;;  %v5253_v54 = vpack.c.bf16 %v407_v48, %v400_v47  ;;  %v451_v47 = vld [vmem:[%s5033_s23 + $0x228] sm:$0xff] }
 0x14d   : > { %2185 = vmatprep.mubr.bf16.mxu1 %v5183_v55  ;;  %3736 = vmatpush3.bf16.msra.mxu1 %v4383_v56  ;;  %v5255_v56 = vpack.c.bf16 %v422_v51, %v415_v49  ;;  %v458_v51 = vld [vmem:[%s5033_s23 + $0x260] sm:$0xff] }
 0x14e   : > { %3737 = vmatprep.subr.bf16.mxu1 %v4387_v53  ;;  %v4403_v53 = vld [vmem:[#allocation5 + $0x424] ss:$12 sps:$4 sm:$0xff]  }
 0x14f   : > { %1716 = vmatpush1.bf16.msra.mxu0 %v4346_v57  ;;  %v414_v57 = vld [vmem:[%s5033_s23 + $0x100] sm:$0xff] }
 0x150   : > { %1798 = vmatprep.subr.bf16.mxu0 %v4351_v58  ;;  %v421_v58 = vld [vmem:[%s5033_s23 + $0x138] sm:$0xff] }
 0x151   : > { %3738 = vmatpush3.bf16.msra.mxu1 %v4388_v63  ;;  %v512_v63 = vpack.c.bf16 %v421_v58, %v414_v57  ;;  %v493_v57 = vld [vmem:[%s5033_s23 + $0x378] sm:$0xff] }
 0x152   : > { %1718 = vmatmul.mubr.bf16.vlgmr.msra.gmra.mrb[0].mxu0 %v5145_v10  ;;  %v5205_v10 = vpack.c.bf16 %v461_v7, %v454_v6  ;;  %v450_v6 = vld [vmem:[%s5033_s23 + $0x220] sm:$0xff]  ;;  %v4407_v7 = vld [vmem:[#allocation5 + $0x450] ss:$12 sps:$4 sm:$0xff]  }
 0x153   : > { %2186 = vmatmul.mubr.bf16.gmra.mrb[48].mxu1 %v5193_v1  ;;  %1799 = vmatpush1.bf16.msra.mxu0 %v4349_v62  ;;  %v520_v62 = vpack.c.bf16 %v436_v60, %v429_v59 }
 0x154   : > { %1800 = vmatprep.subr.bf16.mxu0 %v4356_v3  ;;  %1727 = vmatprep.mubr.bf16.mxu0 %v5147_v13  ;;  %v4364_v13 = vld [vmem:[#allocation5 + $0x348] ss:$12 sps:$4 sm:$0xff]  }
 0x155   : > { %2193 = vmatprep.mubr.bf16.mxu1 %v5195_v4  ;;  %v4409_v3 = vld [vmem:[#allocation5 + $0x454] ss:$12 sps:$4 sm:$0xff]  }
 0x157   : > { %1801 = vmatpush1.bf16.msra.mxu0 %v4354_v2  ;;  %v435_v2 = vld [vmem:[%s5033_s23 + $0x1a8] sm:$0xff] }
 0x158   : > { %1802 = vmatprep.subr.bf16.mxu0 %v4361_v5  ;;  %v443_v5 = vld [vmem:[%s5033_s23 + $0x1e8] sm:$0xff] }
 0x15a   : > { %1728 = vmatmul.mubr.bf16.gmra.mrb[4].mxu0 %v5157_v24  ;;  %v4416_v24 = vld [vmem:[#allocation5 + $0x488] ss:$12 sps:$4 sm:$0xff]  }
 0x15b   : > { %2194 = vmatmul.mubr.bf16.gmra.mrb[52].mxu1 %v5205_v10  ;;  %1803 = vmatpush1.bf16.msra.mxu0 %v4359_v11  ;;  %v527_v11 = vpack.c.bf16 %v450_v6, %v443_v5 }
 0x15c   : > { %1804 = vmatprep.subr.bf16.mxu0 %v4366_v12  ;;  %1737 = vmatprep.mubr.bf16.mxu0 %v5159_v27  ;;  %v482_v27 = vld [vmem:[%s5033_s23 + $0x320] sm:$0xff] }
 0x15d   : > { %2201 = vmatprep.mubr.bf16.mxu1 %v5207_v14  ;;  %3892 = vmatprep.subr.bf16.mxu1 %v4416_v24  ;;  %v5229_v32 = vpack.c.bf16 %v489_v28, %v482_v27  ;;  %v4415_v12 = vld [vmem:[#allocation5 + $0x484] ss:$12 sps:$4 sm:$0xff]   ;;  %v477_v27 = vld [vmem:[%s5033_s23 + $0x2f8] sm:$0xff] }
 0x15e   : > { %v485_v28 = vld [vmem:[%s5033_s23 + $0x338] sm:$0xff] }
 0x15f   : > { %1805 = vmatpush1.bf16.msra.mxu0 %v4364_v13  ;;  %v449_v13 = vld [vmem:[%s5033_s23 + $0x218] sm:$0xff] }
 0x160   : > { %1806 = vmatprep.subr.bf16.mxu0 %v4371_v15  ;;  %v457_v15 = vld [vmem:[%s5033_s23 + $0x258] sm:$0xff] }
 0x161   : > { %v534_v19 = vpack.c.bf16 %v464_v16, %v457_v15 }
 0x162   : > { %1738 = vmatmul.mubr.bf16.gmra.mrb[8].mxu0 %v5169_v38  ;;  %v393_v38 = vld [vmem:[%s5033_s23 + $0x58] sm:$0xff] }
 0x163   : > { %2202 = vmatmul.mubr.bf16.gmra.mrb[56].mxu1 %v5217_v21  ;;  %1807 = vmatpush1.bf16.msra.mxu0 %v4369_v20  ;;  %v5241_v44 = vpack.c.bf16 %v393_v38, %v386_v37  ;;  %v456_v20 = vld [vmem:[%s5033_s23 + $0x250] sm:$0xff]  ;;  %v402_v38 = vld [vmem:[%s5033_s23 + $0xa0] sm:$0xff] }
 0x164   : > { %1808 = vmatprep.subr.bf16.mxu0 %v4376_v22  ;;  %1747 = vmatprep.mubr.bf16.mxu0 %v5171_v41  ;;  %v4389_v41 = vld [vmem:[#allocation5 + $0x3c0] ss:$12 sps:$4 sm:$0xff]  }
 0x165   : > { %2209 = vmatprep.mubr.bf16.mxu1 %v5219_v23  ;;  %v471_v22 = vld [vmem:[%s5033_s23 + $0x2c8] sm:$0xff] }
 0x167   : > { %1809 = vmatpush1.bf16.msra.mxu0 %v4374_v25 }
 0x168   : > { %1810 = vmatprep.subr.bf16.mxu0 %v4381_v26  ;;  %v470_v26 = vld [vmem:[%s5033_s23 + $0x2c0] sm:$0xff] }
 0x169   : > { %v540_v30 = vpack.c.bf16 %v477_v27, %v470_v26 }
 0x16a   : > { %1748 = vmatmul.mubr.bf16.gmra.mrb[12].mxu0 %v5181_v50  ;;  %v4400_v50 = vld [vmem:[#allocation5 + $0x40c] ss:$12 sps:$4 sm:$0xff]  }
 0x16b   : > { %2210 = vmatmul.mubr.bf16.gmra.mrb[60].mxu1 %v5229_v32  ;;  %1811 = vmatpush1.bf16.msra.mxu0 %v4379_v29  ;;  %v492_v29 = vld [vmem:[%s5033_s23 + $0x370] sm:$0xff] }
 0x16c   : > { %1812 = vmatprep.subr.bf16.mxu0 %v4386_v33  ;;  %1757 = vmatprep.mubr.bf16.mxu0 %v5183_v55  ;;  %v4398_v55 = vld [vmem:[#allocation5 + $0x408] ss:$12 sps:$4 sm:$0xff]   ;;  %v548_v31 = vpack.c.bf16 %v492_v29, %v485_v28  ;;  %v4417_v28 = vld [vmem:[#allocation8 + $0x80] sm:$0xff]  }
 0x16d   : > { %2250 = vmatprep.mubr.bf16.mxu1 %v5231_v35  ;;  %v491_v33 = vld [vmem:[%s5033_s23 + $0x368] sm:$0xff] }
 0x16f   : > { %1813 = vmatpush1.bf16.msra.mxu0 %v4384_v34  ;;  %v388_v34 = vld [vmem:[%s5033_s23 + $0x30] sm:$0xff] }
 0x170   : > { %1814 = vmatprep.subr.bf16.mxu0 %v4391_v36 }
 0x172   : > { %1758 = vmatmul.mubr.bf16.gmra.mrb[16].mxu0 %v5193_v1  ;;  %v4404_v1 = vld [vmem:[#allocation5 + $0x438] ss:$12 sps:$4 sm:$0xff]  }
 0x173   : > { %2251 = vmatmul.mubr.bf16.vlgmr.msra.gmra.mrb[64].mxu1 %v5241_v44  ;;  %1815 = vmatpush1.bf16.msra.mxu0 %v4389_v41  ;;  %v423_v41 = vld [vmem:[%s5033_s23 + $0x148] sm:$0xff] }
 0x174   : > { %1816 = vmatprep.subr.bf16.mxu0 %v4394_v42  ;;  %1767 = vmatprep.mubr.bf16.mxu0 %v5195_v4  ;;  %v428_v4 = vld [vmem:[%s5033_s23 + $0x170] sm:$0xff]  ;;  %v507_v42 = vpack.c.bf16 %v409_v39, %v402_v38 }
 0x175   : > { %2258 = vmatprep.mubr.bf16.mxu1 %v5243_v43  ;;  %3893 = vmatpush3.bf16.msra.mxu1 %v4416_v24  ;;  %v519_v8 = vpack.c.bf16 %v435_v2, %v428_v4 }
 0x177   : > { %1817 = vmatpush1.bf16.msra.mxu0 %v4392_v45  ;;  %v430_v45 = vld [vmem:[%s5033_s23 + $0x180] sm:$0xff] }
 0x178   : > { %1818 = vmatprep.subr.bf16.mxu0 %v4397_v46  ;;  %v444_v46 = vld [vmem:[%s5033_s23 + $0x1f0] sm:$0xff] }
 0x179   : > { %v5304_v49 = vpack.c.bf16 %v451_v47, %v444_v46  ;;  %v5373_v46 = vld [vmem:[#allocation7] sm:$0x7] }
 0x17a   : > { %1768 = vmatmul.mubr.bf16.gmra.mrb[20].mxu0 %v5205_v10  ;;  %v4410_v10 = vld [vmem:[#allocation5 + $0x468] ss:$12 sps:$4 sm:$0xff]  }
 0x17b   : > { %2259 = vmatmul.mubr.bf16.gmra.mrb[68].mxu1 %v5253_v54  ;;  %1819 = vmatpush1.bf16.msra.mxu0 %v4395_v52  ;;  %v465_v52 = vld [vmem:[%s5033_s23 + $0x298] sm:$0xff] }
 0x17c   : > { %1820 = vmatprep.subr.bf16.mxu0 %v4400_v50  ;;  %1777 = vmatprep.mubr.bf16.mxu0 %v5207_v14  ;;  %v442_v14 = vld [vmem:[%s5033_s23 + $0x1e0] sm:$0xff]  ;;  %v472_v50 = vld [vmem:[%s5033_s23 + $0x2d0] sm:$0xff] }
 0x17d   : > { %2266 = vmatprep.mubr.bf16.mxu1 %v5255_v56  ;;  %v526_v18 = vpack.c.bf16 %v449_v13, %v442_v14 }
 0x17f   : > { %1821 = vmatpush1.bf16.msra.mxu0 %v4398_v55  ;;  %v5313_v55 = vpack.c.bf16 %v465_v52, %v458_v51 }
 0x180   : > { %1822 = vmatprep.subr.bf16.mxu0 %v4403_v53  ;;  %v486_v53 = vld [vmem:[%s5033_s23 + $0x340] sm:$0xff] }
 0x181   : > { %v5323_v59 = vpack.c.bf16 %v493_v57, %v486_v53 }
 0x182   : > { %1778 = vmatmul.mubr.bf16.gmra.mrb[24].mxu0 %v5217_v21  ;;  %v463_v21 = vld [vmem:[%s5033_s23 + $0x288] sm:$0xff] }
 0x183   : > { %2267 = vmatmul.mubr.bf16.gmra.mrb[72].mxu1 %v512_v63  ;;  %1823 = vmatpush1.bf16.msra.mxu0 %v4401_v61  ;;  %v533_v24 = vpack.c.bf16 %v463_v21, %v456_v20 }
 0x184   : > { %1824 = vmatprep.subr.bf16.mxu0 %v4406_v0  ;;  %1787 = vmatprep.mubr.bf16.mxu0 %v5219_v23  ;;  %v478_v23 = vld [vmem:[%s5033_s23 + $0x300] sm:$0xff] }
 0x185   : > { %2274 = vmatprep.mubr.bf16.mxu1 %v520_v62  ;;  %v541_v25 = vpack.c.bf16 %v478_v23, %v471_v22 }
 0x187   : > { %1825 = vmatpush1.bf16.msra.mxu0 %v4404_v1  ;;  %v4740_v1 = vmov 0  }
 0x188   : > { %1826 = vmatprep.subr.bf16.mxu0 %v4409_v3 }
 0x18a   : > { %1788 = vmatmul.mubr.bf16.gmra.mrb[28].mxu0 %v5229_v32  ;;  %v484_v32 = vld [vmem:[%s5033_s23 + $0x330] sm:$0xff] }
 0x18b   : > { %2275 = vmatmul.mubr.bf16.gmra.mrb[76].mxu1 %v519_v8  ;;  %1827 = vmatpush1.bf16.msra.mxu0 %v4407_v7  ;;  %v547_v36 = vpack.c.bf16 %v491_v33, %v484_v32  ;;  %v4418_v33 = vld [vmem:[#allocation8 + $0x88] sm:$0xff]  }
 0x18c   : > { %1828 = vmatprep.subr.bf16.mxu0 %v4412_v9  ;;  %1830 = vmatprep.mubr.bf16.mxu0 %v5231_v35  ;;  %v395_v35 = vld [vmem:[%s5033_s23 + $0x68] sm:$0xff] }
 0x18d   : > { %2282 = vmatprep.mubr.bf16.mxu1 %v527_v11  ;;  %v500_v37 = vpack.c.bf16 %v395_v35, %v388_v34  ;;  %v748_v34 = vlaneseq }
 0x18f   : > { %1829 = vmatpush1.bf16.msra.mxu0 %v4410_v10 }
 0x190   : > { %1911 = vmatprep.subr.bf16.mxu0 %v4415_v12 }
 0x192   : > { %1831 = vmatmul.mubr.bf16.vlgmr.msra.gmra.mrb[0].mxu0 %v5241_v44  ;;  %v514_v44 = vpack.c.bf16 %v423_v41, %v416_v40  ;;  %v5365_v41 = vshrl.u32 %v748_v34, 7 }
 0x193   : > { %2283 = vmatmul.mubr.bf16.gmra.mrb[80].mxu1 %v526_v18  ;;  %1912 = vmatpush1.bf16.msra.mxu0 %v4413_v17 }
 0x194   : > { %1840 = vmatprep.mubr.bf16.mxu0 %v5243_v43  ;;  %2290 = vmatprep.mubr.bf16.mxu1 %v534_v19  ;;  %v437_v43 = vld [vmem:[%s5033_s23 + $0x1b8] sm:$0xff] }
 0x195   : > { %v521_v48 = vpack.c.bf16 %v437_v43, %v430_v45  ;;  %3910 = vmatprep.subr.bf16.mxu0 %v4417_v28  ;;  %v758_v45 = vsub.s32 2, %v5365_v41 }
 0x19a   : > { %1841 = vmatmul.mubr.bf16.gmra.mrb[4].mxu0 %v5253_v54  ;;  %v479_v54 = vld [vmem:[%s5033_s23 + $0x308] sm:$0xff] }
 0x19b   : > { %2291 = vmatmul.mubr.bf16.gmra.mrb[84].mxu1 %v533_v24  ;;  %1850 = vmatprep.mubr.bf16.mxu0 %v5255_v56  ;;  %v5315_v56 = vpack.c.bf16 %v479_v54, %v472_v50  ;;  %v5378_v50 = vrot.slane %v5373_v46, %v758_v45 }
 0x19c   : > { %2298 = vmatprep.mubr.bf16.mxu1 %v541_v25 }
 0x1a2   : > { %1851 = vmatmul.mubr.bf16.gmra.mrb[8].mxu0 %v512_v63 }
 0x1a3   : > { %2299 = vmatmul.mubr.bf16.gmra.mrb[88].mxu1 %v540_v30  ;;  %1860 = vmatprep.mubr.bf16.mxu0 %v520_v62 }
 0x1a4   : > { %2306 = vmatprep.mubr.bf16.mxu1 %v548_v31 }
 0x1aa   : > { %1861 = vmatmul.mubr.bf16.gmra.mrb[12].mxu0 %v519_v8 }
 0x1ab   : > { %2307 = vmatmul.mubr.bf16.gmra.mrb[92].mxu1 %v547_v36  ;;  %1870 = vmatprep.mubr.bf16.mxu0 %v527_v11 }
 0x1ac   : > { %3894 = vmatprep.mubr.msk.bf16.mxu1 %vm1547_vm0, %v500_v37 }
 0x1b2   : > { %1871 = vmatmul.mubr.bf16.gmra.mrb[16].mxu0 %v526_v18 }
 0x1b3   : > { %3895 = vmatmul.mubr.msk.bf16.vlgmr.msra.gmra.mrb[96].mxu1 %vm1547_vm0, %v507_v42  ;;  %1880 = vmatprep.mubr.bf16.mxu0 %v534_v19 }
 0x1b4   : > { %3898 = vmatprep.mubr.msk.bf16.mxu1 %vm1547_vm0, %v514_v44 }
 0x1ba   : > { %1881 = vmatmul.mubr.bf16.gmra.mrb[20].mxu0 %v533_v24 }
 0x1bb   : > { %3899 = vmatmul.mubr.msk.bf16.gmra.mrb[100].mxu1 %vm1547_vm0, %v521_v48  ;;  %1890 = vmatprep.mubr.bf16.mxu0 %v541_v25 }
 0x1bc   : > { %3902 = vmatprep.mubr.msk.bf16.mxu1 %vm1547_vm0, %v5304_v49 }
 0x1c2   : > { %1891 = vmatmul.mubr.bf16.gmra.mrb[24].mxu0 %v540_v30 }
 0x1c3   : > { %3903 = vmatmul.mubr.msk.bf16.gmra.mrb[104].mxu1 %vm1547_vm0, %v5313_v55  ;;  %1900 = vmatprep.mubr.bf16.mxu0 %v548_v31 }
 0x1c4   : > { %3906 = vmatprep.mubr.msk.bf16.mxu1 %vm1547_vm0, %v5315_v56 }
 0x1c5   : > { %v3611_v58 = vpop.f32.mrb[0].mxu1 }
 0x1c6   : > { %v3612_v60 = vpop.f32.mrb[1].mxu1 }
 0x1c7   : > { %v5325_v61 = vadd.f32 %v3612_v60, %v3611_v58  ;;  %v3614_v63 = vpop.f32.mrb[2].mxu1  ;;  %v4423_v60 = vld [vmem:[#allocation8 + $0xb0] sm:$0xff]  }
 0x1c8   : > { %v3615_v0 = vpop.f32.mrb[3].mxu1 }
 0x1c9   : > { %v5327_v62 = vadd.f32 %v3615_v0, %v3614_v63  ;;  %v2059_v53 = vadd.f32 %v5325_v61, %v5378_v50 }
 0x1ca   : > { %1901 = vmatmul.mubr.bf16.gmra.mrb[28].mxu0 %v547_v36 }
 0x1cb   : > { %3907 = vmatmul.mubr.msk.bf16.gmra.mrb[108].mxu1 %vm1547_vm0, %v5323_v59  ;;  %1943 = vmatprep.mubr.bf16.mxu0 %v4740_v1  ;;  %v2062_v63 = vadd.f32 %v5327_v62, %v5378_v50 }
 0x1cd   : > { %v3617_v3 = vpop.f32.mrb[4].mxu1 }
 0x1ce   : > { %v3618_v4 = vpop.f32.mrb[5].mxu1 }
 0x1cf   : > { %v5332_v2 = vadd.f32 %v3618_v4, %v3617_v3  ;;  %v3620_v5 = vpop.f32.mrb[6].mxu1 }
 0x1d0   : > { %v3621_v6 = vpop.f32.mrb[7].mxu1 }
 0x1d1   : > { %v5335_v7 = vadd.f32 %v3621_v6, %v3620_v5  ;;  %v4424_v5 = vld [vmem:[#allocation8 + $0xb8] sm:$0xff]   ;;  %v2067_v6 = vadd.f32 %v5332_v2, %v5378_v50  ;;  %v4428_v2 = vld [vmem:[#allocation8 + $0x8] sm:$0xff]  }
 0x1d2   : > { %3460 = vmatmul.mubr.msk.bf16.vlgmr.msra.gmra.mrb[0].mxu0 %vm1547_vm0, %v500_v37  ;;  %v4419_v37 = vld [vmem:[#allocation8 + $0x90] sm:$0xff]  }
 0x1d3   : > { %1953 = vmatprep.mubr.bf16.mxu0 %v4740_v1  ;;  %3911 = vmatpush3.bf16.msra.mxu0 %v4417_v28 }
 0x1d4   : > { %3912 = vmatprep.subr.bf16.mxu0 %v4418_v33 }
 0x1d5   : > { %v3623_v8 = vpop.f32.mrb[8].mxu1 }
 0x1d6   : > { %v3624_v9 = vpop.f32.mrb[9].mxu1 }
 0x1d7   : > { %v5338_v11 = vadd.f32 %v3624_v9, %v3623_v8  ;;  %v3626_v10 = vpop.f32.mrb[10].mxu1  ;;  %3913 = vmatpush3.bf16.msra.mxu0 %v4418_v33  ;;  %v4425_v9 = vld [vmem:[#allocation8 + $0x40] sm:$0xff]  }
 0x1d8   : > { %v3627_v12 = vpop.f32.mrb[11].mxu1  ;;  %3914 = vmatprep.subr.bf16.mxu0 %v4419_v37  ;;  %3796 = vmatprep.subr.bf16.mxu1 %v4425_v9 }
 0x1d9   : > { %v5341_v14 = vadd.f32 %v3627_v12, %v3626_v10  ;;  %v2070_v10 = vadd.f32 %v5335_v7, %v5378_v50 }
 0x1da   : > { %3461 = vmatmul.mubr.msk.bf16.gmra.mrb[4].mxu0 %vm1547_vm0, %v507_v42 }
 0x1db   : > { %1963 = vmatprep.mubr.bf16.mxu0 %v4740_v1  ;;  %3915 = vmatpush3.bf16.msra.mxu0 %v4419_v37 }
 0x1dd   : > { %v3629_v13 = vpop.f32.mrb[12].mxu1 }
 0x1de   : > { %v3630_v15 = vpop.f32.mrb[13].mxu1 }
 0x1df   : > { %v5344_v16 = vadd.f32 %v3630_v15, %v3629_v13  ;;  %v3632_v17 = vpop.f32.mrb[14].mxu1  ;;  %v4426_v15 = vld [vmem:[#allocation8] sm:$0xff]  }
 0x1e0   : > { %v3633_v18 = vpop.f32.mrb[15].mxu1  ;;  %3797 = vmatpush3.bf16.msra.mxu1 %v4426_v15 }
 0x1e1   : > { %v5347_v19 = vadd.f32 %v3633_v18, %v3632_v17 }
 0x1e2   : > { %3462 = vmatmul.mubr.msk.bf16.gmra.mrb[8].mxu0 %vm1547_vm0, %v514_v44  ;;  %v4420_v44 = vld [vmem:[#allocation8 + $0x98] sm:$0xff]  }
 0x1e3   : > { %1973 = vmatprep.mubr.bf16.mxu0 %v4740_v1  ;;  %3916 = vmatprep.subr.bf16.mxu0 %v4420_v44  ;;  %v2086_v45 = vadd.f32 %v5347_v19, %v5378_v50 }
 0x1e4   : > { %3917 = vmatpush3.bf16.msra.mxu0 %v4420_v44  ;;  %v4433_v44 = vld [vmem:[#allocation8 + $0x60] sm:$0xff]  }
 0x1e5   : > { %v3635_v20 = vpop.f32.mrb[16].mxu1 }
 0x1e6   : > { %v3636_v21 = vpop.f32.mrb[17].mxu1 }
 0x1e7   : > { %v5350_v22 = vadd.f32 %v3636_v21, %v3635_v20  ;;  %v3638_v23 = vpop.f32.mrb[18].mxu1  ;;  %v4427_v20 = vld [vmem:[#allocation8 + $0x48] sm:$0xff]  }
 0x1e8   : > { %v3639_v24 = vpop.f32.mrb[19].mxu1  ;;  %3798 = vmatprep.subr.bf16.mxu1 %v4427_v20 }
 0x1e9   : > { %v5353_v25 = vadd.f32 %v3639_v24, %v3638_v23  ;;  %v2075_v23 = vadd.f32 %v5338_v11, %v5378_v50  ;;  %3799 = vmatpush3.bf16.msra.mxu1 %v4428_v2  ;;  %v4432_v11 = vld [vmem:[#allocation8 + $0x18] sm:$0xff]  }
 0x1ea   : > { %3463 = vmatmul.mubr.msk.bf16.gmra.mrb[12].mxu0 %vm1547_vm0, %v521_v48  ;;  %v4421_v48 = vld [vmem:[#allocation8 + $0xa0] sm:$0xff]  }
 0x1eb   : > { %1983 = vmatprep.mubr.bf16.mxu0 %v4740_v1  ;;  %3918 = vmatprep.subr.bf16.mxu0 %v4421_v48 }
 0x1ec   : > { %3919 = vmatpush3.bf16.msra.mxu0 %v4421_v48  ;;  %v4434_v48 = vld [vmem:[#allocation8 + $0x20] sm:$0xff]  }
 0x1ed   : > { %v3641_v26 = vpop.f32.mrb[20].mxu1 }
 0x1ee   : > { %v3642_v27 = vpop.f32.mrb[21].mxu1 }
 0x1ef   : > { %v5356_v29 = vadd.f32 %v3642_v27, %v3641_v26  ;;  %v3644_v30 = vpop.f32.mrb[22].mxu1  ;;  %v4429_v26 = vld [vmem:[#allocation8 + $0x50] sm:$0xff]   ;;  %v2078_v27 = vadd.f32 %v5341_v14, %v5378_v50 }
 0x1f0   : > { %v3645_v31 = vpop.f32.mrb[23].mxu1  ;;  %3800 = vmatprep.subr.bf16.mxu1 %v4429_v26 }
 0x1f1   : > { %v5360_v32 = vadd.f32 %v3645_v31, %v3644_v30  ;;  %v4430_v31 = vld [vmem:[#allocation8 + $0x10] sm:$0xff]  }
 0x1f2   : > { %3464 = vmatmul.mubr.msk.bf16.gmra.mrb[16].mxu0 %vm1547_vm0, %v5304_v49  ;;  %3801 = vmatpush3.bf16.msra.mxu1 %v4430_v31 }
 0x1f3   : > { %1993 = vmatprep.mubr.bf16.mxu0 %v4740_v1 }
 0x1f5   : > { %v3647_v35 = vpop.f32.mrb[24].mxu1 }
 0x1f6   : > { %v3648_v36 = vpop.f32.mrb[25].mxu1 }
 0x1f7   : > { %v5363_v38 = vadd.f32 %v3648_v36, %v3647_v35  ;;  %v3650_v39 = vpop.f32.mrb[26].mxu1  ;;  %v4431_v36 = vld [vmem:[#allocation8 + $0x58] sm:$0xff]  }
 0x1f8   : > { %v3651_v40 = vpop.f32.mrb[27].mxu1  ;;  %3802 = vmatprep.subr.bf16.mxu1 %v4431_v36 }
 0x1f9   : > { %v5369_v42 = vadd.f32 %v3651_v40, %v3650_v39  ;;  %v2083_v39 = vadd.f32 %v5344_v16, %v5378_v50  ;;  %3803 = vmatpush3.bf16.msra.mxu1 %v4432_v11  ;;  %v4436_v16 = vld [vmem:[#allocation8 + $0x28] sm:$0xff]  }
 0x1fa   : > { %3465 = vmatmul.mubr.msk.bf16.gmra.mrb[20].mxu0 %vm1547_vm0, %v5313_v55  ;;  %v4422_v55 = vld [vmem:[#allocation8 + $0xa8] sm:$0xff]   ;;  %3804 = vmatprep.subr.bf16.mxu1 %v4433_v44 }
 0x1fb   : > { %2003 = vmatprep.mubr.bf16.mxu0 %v4740_v1  ;;  %3920 = vmatprep.subr.bf16.mxu0 %v4422_v55 }
 0x1fc   : > { %3921 = vmatpush3.bf16.msra.mxu0 %v4422_v55 }
 0x1fd   : > { %v3653_v43 = vpop.f32.mrb[28].mxu1  ;;  %3922 = vmatprep.subr.bf16.mxu0 %v4423_v60  ;;  %3805 = vmatpush3.bf16.msra.mxu1 %v4434_v48 }
 0x1fe   : > { %v3654_v47 = vpop.f32.mrb[29].mxu1 }
 0x1ff   : > { %v5375_v49 = vadd.f32 %v3654_v47, %v3653_v43  ;;  %v3656_v51 = vpop.f32.mrb[30].mxu1 }
 0x200   : > { %v3657_v52 = vpop.f32.mrb[31].mxu1  ;;  %3923 = vmatpush3.bf16.msra.mxu0 %v4423_v60 }
 0x201   : > { %v5382_v54 = vadd.f32 %v3657_v52, %v3656_v51  ;;  %3924 = vmatprep.subr.bf16.mxu0 %v4424_v5 }
 0x202   : > { %3466 = vmatmul.mubr.msk.bf16.gmra.mrb[24].mxu0 %vm1547_vm0, %v5315_v56 }
 0x203   : > { %2013 = vmatprep.mubr.bf16.mxu0 %v4740_v1 }
 0x204   : > { %3925 = vmatpush3.bf16.msra.mxu0 %v4424_v5 }
 0x205   : > { %v3675_v57 = vpop.f32.mrb[32].mxu1 }
 0x206   : > { %v3676_v58 = vpop.f32.mrb[33].mxu1 }
 0x207   : > { %v3677_v0 = vadd.f32 %v3676_v58, %v3675_v57  ;;  %v3678_v3 = vpop.f32.mrb[34].mxu1  ;;  %v2091_v58 = vadd.f32 %v5350_v22, %v5378_v50  ;;  %v4440_v22 = vld [vmem:[#allocation8 + $0x38] sm:$0xff]  }
 0x208   : > { %v3679_v56 = vpop.f32.mrb[35].mxu1 }
 0x209   : > { %v5389_v4 = vadd.f32 %v3677_v0, %v2059_v53  ;;  %v3680_v1 = vadd.f32 %v3679_v56, %v3678_v3  ;;  %v4435_v53 = vld [vmem:[#allocation8 + $0x68] sm:$0xff]   ;;  %v2094_v0 = vadd.f32 %v5353_v25, %v5378_v50 }
 0x20a   : > { %3467 = vmatmul.mubr.msk.bf16.gmra.mrb[28].mxu0 %vm1547_vm0, %v5323_v59  ;;  %3806 = vmatprep.subr.bf16.mxu1 %v4435_v53 }
 0x20b   : > { %v5393_v61 = vadd.f32 %v3680_v1, %v2062_v63  ;;  %3807 = vmatpush3.bf16.msra.mxu1 %v4436_v16  ;;  %v4437_v63 = vld [vmem:[#allocation8 + $0x70] sm:$0xff]  }
 0x20c   : > { %v4438_v1 = vld [vmem:[#allocation8 + $0x30] sm:$0xff]   ;;  %3808 = vmatprep.subr.bf16.mxu1 %v4437_v63 }
 0x20e   : > { %v3681_v8 = vpop.f32.mrb[36].mxu1 }
 0x20f   : > { %v3682_v62 = vpop.f32.mrb[37].mxu1  ;;  %3809 = vmatpush3.bf16.msra.mxu1 %v4438_v1 }
 0x210   : > { %v3683_v12 = vadd.f32 %v3682_v62, %v3681_v8  ;;  %v3684_v13 = vpop.f32.mrb[38].mxu1  ;;  %v4439_v62 = vld [vmem:[#allocation8 + $0x78] sm:$0xff]  }
 0x211   : > { %v3685_v59 = vpop.f32.mrb[39].mxu1  ;;  %3810 = vmatprep.subr.bf16.mxu1 %v4439_v62 }
 0x212   : > { %v5399_v17 = vadd.f32 %v3683_v12, %v2067_v6  ;;  %v3686_v18 = vadd.f32 %v3685_v59, %v3684_v13  ;;  %v2102_v13 = vadd.f32 %v5360_v32, %v5378_v50 }
 0x213   : > { %3811 = vmatpush3.bf16.msra.mxu1 %v4440_v22 }
 0x214   : > { %v5401_v21 = vadd.f32 %v3686_v18, %v2070_v10  ;;  %v2099_v10 = vadd.f32 %v5356_v29, %v5378_v50  ;;  %v2110_v29 = vadd.f32 %v5369_v42, %v5378_v50 }
 0x216   : > { %v3687_v24 = vpop.f32.mrb[40].mxu1 }
 0x217   : > { %v3688_v7 = vpop.f32.mrb[41].mxu1 }
 0x218   : > { %v3689_v28 = vadd.f32 %v3688_v7, %v3687_v24  ;;  %v3690_v30 = vpop.f32.mrb[42].mxu1  ;;  %v2107_v24 = vadd.f32 %v5363_v38, %v5378_v50  ;;  %v2118_v38 = vadd.f32 %v5382_v54, %v5378_v50 }
 0x219   : > { %v3691_v33 = vpop.f32.mrb[43].mxu1 }
 0x21a   : > { %v5407_v34 = vadd.f32 %v3689_v28, %v2075_v23  ;;  %v3692_v35 = vadd.f32 %v3691_v33, %v3690_v30 }
 0x21c   : > { %v5409_v37 = vadd.f32 %v3692_v35, %v2078_v27  ;;  %v2115_v35 = vadd.f32 %v5375_v49, %v5378_v50 }
 0x21e   : > { %v3693_v40 = vpop.f32.mrb[44].mxu1 }
 0x21f   : > { %v3694_v14 = vpop.f32.mrb[45].mxu1 }
 0x220   : > { %v3695_v43 = vadd.f32 %v3694_v14, %v3693_v40  ;;  %v3696_v47 = vpop.f32.mrb[46].mxu1 }
 0x221   : > { %v3697_v51 = vpop.f32.mrb[47].mxu1 }
 0x222   : > { %v5415_v52 = vadd.f32 %v3695_v43, %v2083_v39  ;;  %v3698_v55 = vadd.f32 %v3697_v51, %v3696_v47 }
 0x224   : > { %v5417_v57 = vadd.f32 %v3698_v55, %v2086_v45 }
 0x226   : > { %v3699_v60 = vpop.f32.mrb[48].mxu1 }
 0x227   : > { %v3700_v19 = vpop.f32.mrb[49].mxu1 }
 0x228   : > { %v3701_v3 = vadd.f32 %v3700_v19, %v3699_v60  ;;  %v3702_v56 = vpop.f32.mrb[50].mxu1 }
 0x229   : > { %v3703_v5 = vpop.f32.mrb[51].mxu1 }
 0x22a   : > { %v5423_v6 = vadd.f32 %v3701_v3, %v2091_v58  ;;  %v3704_v8 = vadd.f32 %v3703_v5, %v3702_v56 }
 0x22c   : > { %v5425_v9 = vadd.f32 %v3704_v8, %v2094_v0 }
 0x22e   : > { %v3705_v12 = vpop.f32.mrb[52].mxu1 }
 0x22f   : > { %v3706_v25 = vpop.f32.mrb[53].mxu1 }
 0x230   : > { %v3707_v15 = vadd.f32 %v3706_v25, %v3705_v12  ;;  %v3708_v59 = vpop.f32.mrb[54].mxu1 }
 0x231   : > { %v3709_v18 = vpop.f32.mrb[55].mxu1 }
 0x232   : > { %v5431_v20 = vadd.f32 %v3707_v15, %v2099_v10  ;;  %v3710_v2 = vadd.f32 %v3709_v18, %v3708_v59 }
 0x234   : > { %v5433_v23 = vadd.f32 %v3710_v2, %v2102_v13 }
 0x236   : > { %v3711_v7 = vpop.f32.mrb[56].mxu1 }
 0x237   : > { %v3712_v26 = vpop.f32.mrb[57].mxu1 }
 0x238   : > { %v3713_v27 = vadd.f32 %v3712_v26, %v3711_v7  ;;  %v3714_v28 = vpop.f32.mrb[58].mxu1 }
 0x239   : > { %v3715_v30 = vpop.f32.mrb[59].mxu1 }
 0x23a   : > { %v5439_v32 = vadd.f32 %v3713_v27, %v2107_v24  ;;  %v3716_v31 = vadd.f32 %v3715_v30, %v3714_v28 }
 0x23c   : > { %v5441_v33 = vadd.f32 %v3716_v31, %v2110_v29 }
 0x23e   : > { %v3717_v36 = vpop.f32.mrb[60].mxu1 }
 0x23f   : > { %v3718_v11 = vpop.f32.mrb[61].mxu1 }
 0x240   : > { %v3719_v39 = vadd.f32 %v3718_v11, %v3717_v36  ;;  %v3720_v40 = vpop.f32.mrb[62].mxu1 }
 0x241   : > { %v3721_v14 = vpop.f32.mrb[63].mxu1 }
 0x242   : > { %v5447_v42 = vadd.f32 %v3719_v39, %v2115_v35  ;;  %v3722_v44 = vadd.f32 %v3721_v14, %v3720_v40 }
 0x244   : > { %v5449_v45 = vadd.f32 %v3722_v44, %v2118_v38 }
 0x246   : > { %v3739_v43 = vpop.f32.mrb[64].mxu1 }
 0x247   : > { %v3740_v47 = vpop.f32.mrb[65].mxu1 }
 0x248   : > { %v3741_v48 = vadd.f32 %v3740_v47, %v3739_v43  ;;  %v3742_v51 = vpop.f32.mrb[66].mxu1 }
 0x249   : > { %v3743_v55 = vpop.f32.mrb[67].mxu1 }
 0x24a   : > { %v3744_v53 = vadd.f32 %v3743_v55, %v3742_v51  ;;  %v2253_v49 = vadd.f32 %v3741_v48, %v5389_v4 }
 0x24c   : > { %v5453_v16 = vadd.f32 %v3744_v53, %v5393_v61 }
 0x24e   : > { %v3745_v50 = vpop.f32.mrb[68].mxu1 }
 0x24f   : > { %v3746_v54 = vpop.f32.mrb[69].mxu1 }
 0x250   : > { %v3747_v58 = vadd.f32 %v3746_v54, %v3745_v50  ;;  %v3748_v60 = vpop.f32.mrb[70].mxu1 }
 0x251   : > { %v3749_v19 = vpop.f32.mrb[71].mxu1 }
 0x252   : > { %v3750_v63 = vadd.f32 %v3749_v19, %v3748_v60  ;;  %v2261_v0 = vadd.f32 %v3747_v58, %v5399_v17 }
 0x254   : > { %v2264_v3 = vadd.f32 %v3750_v63, %v5401_v21 }
 0x256   : > { %v3751_v56 = vpop.f32.mrb[72].mxu1 }
 0x257   : > { %v3752_v1 = vpop.f32.mrb[73].mxu1 }
 0x258   : > { %v3753_v5 = vadd.f32 %v3752_v1, %v3751_v56  ;;  %v3754_v8 = vpop.f32.mrb[74].mxu1 }
 0x259   : > { %v3755_v62 = vpop.f32.mrb[75].mxu1 }
 0x25a   : > { %v3756_v22 = vadd.f32 %v3755_v62, %v3754_v8  ;;  %v2269_v4 = vadd.f32 %v3753_v5, %v5407_v34 }
 0x25c   : > { %v5459_v61 = vadd.f32 %v3756_v22, %v5409_v37 }
 0x25e   : > { %v3757_v10 = vpop.f32.mrb[76].mxu1 }
 0x25f   : > { %v3758_v12 = vpop.f32.mrb[77].mxu1 }
 0x260   : > { %v3759_v25 = vadd.f32 %v3758_v12, %v3757_v10  ;;  %v3760_v13 = vpop.f32.mrb[78].mxu1 }
 0x261   : > { %v3761_v15 = vpop.f32.mrb[79].mxu1 }
 0x262   : > { %v3762_v59 = vadd.f32 %v3761_v15, %v3760_v13  ;;  %v2277_v17 = vadd.f32 %v3759_v25, %v5415_v52 }
 0x264   : > { %v2280_v21 = vadd.f32 %v3762_v59, %v5417_v57 }
 0x266   : > { %v3763_v18 = vpop.f32.mrb[80].mxu1 }
 0x267   : > { %v3764_v2 = vpop.f32.mrb[81].mxu1 }
 0x268   : > { %v3765_v24 = vadd.f32 %v3764_v2, %v3763_v18  ;;  %v3766_v7 = vpop.f32.mrb[82].mxu1 }
 0x269   : > { %v3767_v26 = vpop.f32.mrb[83].mxu1 }
 0x26a   : > { %v3768_v29 = vadd.f32 %v3767_v26, %v3766_v7  ;;  %v2285_v34 = vadd.f32 %v3765_v24, %v5423_v6 }
 0x26c   : > { %v5465_v37 = vadd.f32 %v3768_v29, %v5425_v9 }
 0x26e   : > { %v3769_v27 = vpop.f32.mrb[84].mxu1 }
 0x26f   : > { %v3770_v28 = vpop.f32.mrb[85].mxu1 }
 0x270   : > { %v3771_v30 = vadd.f32 %v3770_v28, %v3769_v27  ;;  %v3772_v31 = vpop.f32.mrb[86].mxu1 }
 0x271   : > { %v3773_v35 = vpop.f32.mrb[87].mxu1 }
 0x272   : > { %v3774_v36 = vadd.f32 %v3773_v35, %v3772_v31  ;;  %v2293_v52 = vadd.f32 %v3771_v30, %v5431_v20 }
 0x274   : > { %v2296_v57 = vadd.f32 %v3774_v36, %v5433_v23 }
 0x276   : > { %v3775_v11 = vpop.f32.mrb[88].mxu1 }
 0x277   : > { %v3776_v38 = vpop.f32.mrb[89].mxu1 }
 0x278   : > { %v3777_v39 = vadd.f32 %v3776_v38, %v3775_v11  ;;  %v3778_v40 = vpop.f32.mrb[90].mxu1  ;;  %v750_v38 = vsub.s32 0, %v5365_v41 }
 0x279   : > { %v3779_v14 = vpop.f32.mrb[91].mxu1 }
 0x27a   : > { %v3780_v44 = vadd.f32 %v3779_v14, %v3778_v40  ;;  %v2301_v6 = vadd.f32 %v3777_v39, %v5439_v32 }
 0x27c   : > { %v5471_v9 = vadd.f32 %v3780_v44, %v5441_v33 }
 0x27e   : > { %v3781_v43 = vpop.f32.mrb[92].mxu1 }
 0x27f   : > { %v3782_v47 = vpop.f32.mrb[93].mxu1 }
 0x280   : > { %v3783_v48 = vadd.f32 %v3782_v47, %v3781_v43  ;;  %v3784_v51 = vpop.f32.mrb[94].mxu1  ;;  %v5482_v43 = vrot.slane %v5373_v46, %v750_v38 }
 0x281   : > { %v3785_v55 = vpop.f32.mrb[95].mxu1 }
 0x282   : > { %v3786_v53 = vadd.f32 %v3785_v55, %v3784_v51  ;;  %v2309_v20 = vadd.f32 %v3783_v48, %v5447_v42 }
 0x284   : > { %v2312_v23 = vadd.f32 %v3786_v53, %v5449_v45 }
 0x286   : > { %v3896_v50 = vpop.f32.mrb[96].mxu1 }
 0x287   : > { %v2358_v54 = vadd.f32 %v3896_v50, %v2261_v0  ;;  %v2349_v58 = vpop.f32.mrb[97].mxu1 }
 0x288   : > { %v2350_v60 = vadd.f32 %v2349_v58, %v2253_v49  ;;  %v3897_v19 = vpop.f32.mrb[98].mxu1 }
 0x289   : > { %v2361_v63 = vadd.f32 %v3897_v19, %v2264_v3  ;;  %v2352_v32 = vpop.f32.mrb[99].mxu1  ;;  %v2420_v56 = vmax.f32 %v2358_v54, 0.0 }
 0x28a   : > { %v2353_v33 = vadd.f32 %v2352_v32, %v5453_v16  ;;  %v2414_v5 = vmax.f32 %v2350_v60, 0.0 }
 0x28b   : > { %v2423_v1 = vmax.f32 %v2361_v63, 0.0 }
 0x28c   : > { %v2417_v8 = vmax.f32 %v2353_v33, 0.0 }
 0x28d   : > { %v2465_v62 = vpack.c.bf16 %v2423_v1, %v2420_v56 }
 0x28e   : > { %v2462_v22 = vpack.c.bf16 %v2417_v8, %v2414_v5  ;;  %v3900_v10 = vpop.f32.mrb[100].mxu1 }
 0x28f   : > { %v2374_v12 = vadd.f32 %v3900_v10, %v2277_v17  ;;  %v2365_v42 = vpop.f32.mrb[101].mxu1 }
 0x290   : > { %v2366_v25 = vadd.f32 %v2365_v42, %v2269_v4  ;;  %v3901_v45 = vpop.f32.mrb[102].mxu1  ;;  %3926 = vmatprep.mubr.bf16.mxu0 %v2462_v22 }
 0x291   : > { %v2377_v0 = vadd.f32 %v3901_v45, %v2280_v21  ;;  %v2368_v13 = vpop.f32.mrb[103].mxu1  ;;  %3927 = vmatmul.mubr.bf16.vlgmr.msra.gmra.mrb[32].mxu0 %v2465_v62  ;;  %v2432_v3 = vmax.f32 %v2374_v12, 0.0 }
 0x292   : > { %v2369_v49 = vadd.f32 %v2368_v13, %v5459_v61  ;;  %v2426_v16 = vmax.f32 %v2366_v25, 0.0 }
 0x293   : > { %v2435_v15 = vmax.f32 %v2377_v0, 0.0 }
 0x294   : > { %v2429_v59 = vmax.f32 %v2369_v49, 0.0 }
 0x295   : > { %v2471_v18 = vpack.c.bf16 %v2435_v15, %v2432_v3 }
 0x296   : > { %v2468_v2 = vpack.c.bf16 %v2429_v59, %v2426_v16  ;;  %v3904_v24 = vpop.f32.mrb[104].mxu1 }
 0x297   : > { %v2390_v7 = vadd.f32 %v3904_v24, %v2293_v52  ;;  %v2381_v26 = vpop.f32.mrb[105].mxu1 }
 0x298   : > { %v2382_v29 = vadd.f32 %v2381_v26, %v2285_v34  ;;  %v3905_v17 = vpop.f32.mrb[106].mxu1  ;;  %3930 = vmatprep.mubr.bf16.mxu0 %v2468_v2  ;;  %v754_v34 = vsub.s32 1, %v5365_v41 }
 0x299   : > { %v2393_v4 = vadd.f32 %v3905_v17, %v2296_v57  ;;  %v2384_v27 = vpop.f32.mrb[107].mxu1  ;;  %3931 = vmatmul.mubr.bf16.gmra.mrb[36].mxu0 %v2471_v18  ;;  %v2444_v28 = vmax.f32 %v2390_v7, 0.0 }
 0x29a   : > { %v2385_v21 = vadd.f32 %v2384_v27, %v5465_v37  ;;  %v2438_v61 = vmax.f32 %v2382_v29, 0.0  ;;  %v5485_v51 = vrot.slane %v5373_v46, %v754_v34 }
 0x29b   : > { %v2447_v30 = vmax.f32 %v2393_v4, 0.0 }
 0x29c   : > { %v2441_v31 = vmax.f32 %v2385_v21, 0.0 }
 0x29d   : > { %v2477_v35 = vpack.c.bf16 %v2447_v30, %v2444_v28 }
 0x29e   : > { %v2474_v36 = vpack.c.bf16 %v2441_v31, %v2438_v61  ;;  %v3908_v11 = vpop.f32.mrb[108].mxu1 }
 0x29f   : > { %v2406_v39 = vadd.f32 %v3908_v11, %v2309_v20  ;;  %v2397_v52 = vpop.f32.mrb[109].mxu1 }
 0x2a0   : > { %v2398_v40 = vadd.f32 %v2397_v52, %v2301_v6  ;;  %v3909_v14 = vpop.f32.mrb[110].mxu1  ;;  %3934 = vmatprep.mubr.bf16.mxu0 %v2474_v36 }
 0x2a1   : > { %v2409_v57 = vadd.f32 %v3909_v14, %v2312_v23  ;;  %v2400_v44 = vpop.f32.mrb[111].mxu1  ;;  %3935 = vmatmul.mubr.bf16.gmra.mrb[40].mxu0 %v2477_v35  ;;  %v2456_v47 = vmax.f32 %v2406_v39, 0.0 }
 0x2a2   : > { %v2401_v37 = vadd.f32 %v2400_v44, %v5471_v9  ;;  %v2450_v55 = vmax.f32 %v2398_v40, 0.0 }
 0x2a3   : > { %v2459_v48 = vmax.f32 %v2409_v57, 0.0 }
 0x2a4   : > { %v2453_v53 = vmax.f32 %v2401_v37, 0.0 }
 0x2a5   : > { %v2483_v20 = vpack.c.bf16 %v2459_v48, %v2456_v47  ;;  %v1945_v41 = vpop.f32.mrb[0].mxu0 }
 0x2a6   : > { %v2480_v6 = vpack.c.bf16 %v2453_v53, %v2450_v55  ;;  %v3974_v50 = vadd.f32 %v1945_v41, %v5482_v43  ;;  %v1947_v23 = vpop.f32.mrb[1].mxu0 }
 0x2a7   : > { %v3975_v54 = vadd.f32 %v1947_v23, %v5485_v51  ;;  %v1949_v58 = vpop.f32.mrb[2].mxu0 }
 0x2a8   : > { %v3976_v9 = vadd.f32 %v1949_v58, %v5482_v43  ;;  %3938 = vmatprep.mubr.bf16.mxu0 %v2480_v6  ;;  %v1951_v60 = vpop.f32.mrb[3].mxu0  ;;  %v2412_v46 = vmax.f32 %v3974_v50, 0.0 }
 0x2a9   : > { %v3977_v19 = vadd.f32 %v1951_v60, %v5485_v51  ;;  %3939 = vmatmul.mubr.bf16.gmra.mrb[44].mxu0 %v2483_v20  ;;  %v2413_v32 = vmax.f32 %v3975_v54, 0.0 }
 0x2aa   : > { %v2415_v63 = vmax.f32 %v3976_v9, 0.0 }
 0x2ab   : > { %v2416_v33 = vmax.f32 %v3977_v19, 0.0 }
 0x2ac   : > { %v2460_v56 = vpack.c.bf16 %v2415_v63, %v2412_v46 }
 0x2ad   : > { %v2461_v1 = vpack.c.bf16 %v2416_v33, %v2413_v32  ;;  %v1955_v5 = vpop.f32.mrb[4].mxu0 }
 0x2ae   : > { %v3978_v8 = vadd.f32 %v1955_v5, %v5482_v43  ;;  %v1957_v62 = vpop.f32.mrb[5].mxu0 }
 0x2af   : > { %v3979_v22 = vadd.f32 %v1957_v62, %v5485_v51  ;;  %v1959_v10 = vpop.f32.mrb[6].mxu0  ;;  %2715 = vmatprep.mubr.bf16.mxu1 %v2461_v1 }
 0x2b0   : > { %v3980_v12 = vadd.f32 %v1959_v10, %v5482_v43  ;;  %v1961_v42 = vpop.f32.mrb[7].mxu0  ;;  %2716 = vmatmul.mubr.bf16.vlgmr.msra.gmra.mrb[112].mxu1 %v2460_v56  ;;  %v2418_v45 = vmax.f32 %v3978_v8, 0.0 }
 0x2b1   : > { %v3981_v25 = vadd.f32 %v1961_v42, %v5485_v51  ;;  %v2419_v13 = vmax.f32 %v3979_v22, 0.0 }
 0x2b2   : > { %v2421_v0 = vmax.f32 %v3980_v12, 0.0 }
 0x2b3   : > { %v2422_v49 = vmax.f32 %v3981_v25, 0.0 }
 0x2b4   : > { %v2463_v3 = vpack.c.bf16 %v2421_v0, %v2418_v45 }
 0x2b5   : > { %v2464_v15 = vpack.c.bf16 %v2422_v49, %v2419_v13  ;;  %v1965_v16 = vpop.f32.mrb[8].mxu0 }
 0x2b6   : > { %v3982_v59 = vadd.f32 %v1965_v16, %v5482_v43  ;;  %v1967_v18 = vpop.f32.mrb[9].mxu0 }
 0x2b7   : > { %v3983_v2 = vadd.f32 %v1967_v18, %v5485_v51  ;;  %v1969_v24 = vpop.f32.mrb[10].mxu0  ;;  %2723 = vmatprep.mubr.bf16.mxu1 %v2464_v15 }
 0x2b8   : > { %v3984_v7 = vadd.f32 %v1969_v24, %v5482_v43  ;;  %v1971_v26 = vpop.f32.mrb[11].mxu0  ;;  %2724 = vmatmul.mubr.bf16.gmra.mrb[116].mxu1 %v2463_v3  ;;  %v2424_v17 = vmax.f32 %v3982_v59, 0.0 }
 0x2b9   : > { %v3985_v29 = vadd.f32 %v1971_v26, %v5485_v51  ;;  %v2425_v27 = vmax.f32 %v3983_v2, 0.0 }
 0x2ba   : > { %v2427_v4 = vmax.f32 %v3984_v7, 0.0 }
 0x2bb   : > { %v2428_v21 = vmax.f32 %v3985_v29, 0.0 }
 0x2bc   : > { %v2466_v28 = vpack.c.bf16 %v2427_v4, %v2424_v17 }
 0x2bd   : > { %v2467_v30 = vpack.c.bf16 %v2428_v21, %v2425_v27  ;;  %v1975_v61 = vpop.f32.mrb[12].mxu0 }
 0x2be   : > { %v3986_v31 = vadd.f32 %v1975_v61, %v5482_v43  ;;  %v1977_v35 = vpop.f32.mrb[13].mxu0 }
 0x2bf   : > { %v3987_v36 = vadd.f32 %v1977_v35, %v5485_v51  ;;  %v1979_v11 = vpop.f32.mrb[14].mxu0  ;;  %2731 = vmatprep.mubr.bf16.mxu1 %v2467_v30 }
 0x2c0   : > { %v3988_v38 = vadd.f32 %v1979_v11, %v5482_v43  ;;  %v1981_v39 = vpop.f32.mrb[15].mxu0  ;;  %2732 = vmatmul.mubr.bf16.gmra.mrb[120].mxu1 %v2466_v28  ;;  %v2430_v34 = vmax.f32 %v3986_v31, 0.0 }
 0x2c1   : > { %v3989_v52 = vadd.f32 %v1981_v39, %v5485_v51  ;;  %v2431_v14 = vmax.f32 %v3987_v36, 0.0 }
 0x2c2   : > { %v2433_v40 = vmax.f32 %v3988_v38, 0.0 }
 0x2c3   : > { %v2434_v57 = vmax.f32 %v3989_v52, 0.0 }
 0x2c4   : > { %v2469_v44 = vpack.c.bf16 %v2433_v40, %v2430_v34  ;;  %v4441_v34 = vld [vmem:[#allocation11] sm:$0xff]   ;;  %v4442_v40 = vld [vmem:[#allocation11 + $0x8] sm:$0xff]  }
 0x2c5   : > { %v2470_v37 = vpack.c.bf16 %v2434_v57, %v2431_v14  ;;  %v1985_v47 = vpop.f32.mrb[16].mxu0  ;;  %3942 = vmatprep.subr.bf16.mxu1 %v4441_v34  ;;  %v4443_v14 = vld [vmem:[#allocation11 + $0x10] sm:$0xff]   ;;  %v4446_v57 = vld [vmem:[#allocation11 + $0x28] sm:$0xff]  }
 0x2c6   : > { %v3990_v48 = vadd.f32 %v1985_v47, %v5482_v43  ;;  %v1987_v55 = vpop.f32.mrb[17].mxu0  ;;  %3943 = vmatpush3.bf16.msra.mxu1 %v4441_v34 }
 0x2c7   : > { %v3991_v53 = vadd.f32 %v1987_v55, %v5485_v51  ;;  %v1989_v20 = vpop.f32.mrb[18].mxu0  ;;  %2739 = vmatprep.mubr.bf16.mxu1 %v2470_v37  ;;  %3944 = vmatprep.subr.bf16.mxu1 %v4442_v40  ;;  %v4448_v37 = vld [vmem:[#allocation11 + $0x38] sm:$0xff]  }
 0x2c8   : > { %v3992_v41 = vadd.f32 %v1989_v20, %v5482_v43  ;;  %v1991_v6 = vpop.f32.mrb[19].mxu0  ;;  %2740 = vmatmul.mubr.bf16.gmra.mrb[124].mxu1 %v2469_v44  ;;  %v2436_v23 = vmax.f32 %v3990_v48, 0.0  ;;  %v4447_v44 = vld [vmem:[#allocation11 + $0x30] sm:$0xff]  }
 0x2c9   : > { %v3993_v50 = vadd.f32 %v1991_v6, %v5485_v51  ;;  %v2437_v58 = vmax.f32 %v3991_v53, 0.0 }
 0x2ca   : > { %v2439_v54 = vmax.f32 %v3992_v41, 0.0  ;;  %3945 = vmatpush3.bf16.msra.mxu1 %v4442_v40 }
 0x2cb   : > { %v2440_v9 = vmax.f32 %v3993_v50, 0.0  ;;  %3946 = vmatprep.subr.bf16.mxu1 %v4443_v14 }
 0x2cc   : > { %v2472_v60 = vpack.c.bf16 %v2439_v54, %v2436_v23 }
 0x2cd   : > { %v2473_v19 = vpack.c.bf16 %v2440_v9, %v2437_v58  ;;  %v1995_v46 = vpop.f32.mrb[20].mxu0 }
 0x2ce   : > { %v3994_v63 = vadd.f32 %v1995_v46, %v5482_v43  ;;  %v1997_v32 = vpop.f32.mrb[21].mxu0  ;;  %3947 = vmatpush3.bf16.msra.mxu1 %v4443_v14 }
 0x2cf   : > { %v3995_v33 = vadd.f32 %v1997_v32, %v5485_v51  ;;  %v1999_v56 = vpop.f32.mrb[22].mxu0  ;;  %2747 = vmatprep.mubr.bf16.mxu1 %v2473_v19 }
 0x2d0   : > { %v3996_v1 = vadd.f32 %v1999_v56, %v5482_v43  ;;  %v2001_v5 = vpop.f32.mrb[23].mxu0  ;;  %2748 = vmatmul.mubr.bf16.gmra.mrb[128].mxu1 %v2472_v60  ;;  %v2442_v62 = vmax.f32 %v3994_v63, 0.0 }
 0x2d1   : > { %v3997_v8 = vadd.f32 %v2001_v5, %v5485_v51  ;;  %v2443_v10 = vmax.f32 %v3995_v33, 0.0  ;;  %v5535_v33 = vld [vmem:[#allocation10] ss:$0 sm:$0xff] }
 0x2d2   : > { %v2445_v22 = vmax.f32 %v3996_v1, 0.0 }
 0x2d3   : > { %v2446_v12 = vmax.f32 %v3997_v8, 0.0 }
 0x2d4   : > { %v2475_v42 = vpack.c.bf16 %v2445_v22, %v2442_v62 }
 0x2d5   : > { %v2476_v25 = vpack.c.bf16 %v2446_v12, %v2443_v10  ;;  %v2005_v45 = vpop.f32.mrb[24].mxu0 }
 0x2d6   : > { %v3998_v0 = vadd.f32 %v2005_v45, %v5482_v43  ;;  %v2007_v13 = vpop.f32.mrb[25].mxu0 }
 0x2d7   : > { %v3999_v49 = vadd.f32 %v2007_v13, %v5485_v51  ;;  %v2009_v3 = vpop.f32.mrb[26].mxu0  ;;  %2755 = vmatprep.mubr.bf16.mxu1 %v2476_v25 }
 0x2d8   : > { %v4000_v15 = vadd.f32 %v2009_v3, %v5482_v43  ;;  %v2011_v16 = vpop.f32.mrb[27].mxu0  ;;  %2756 = vmatmul.mubr.bf16.gmra.mrb[132].mxu1 %v2475_v42  ;;  %v2448_v18 = vmax.f32 %v3998_v0, 0.0 }
 0x2d9   : > { %v4001_v59 = vadd.f32 %v2011_v16, %v5485_v51  ;;  %v2449_v24 = vmax.f32 %v3999_v49, 0.0 }
 0x2da   : > { %v2451_v2 = vmax.f32 %v4000_v15, 0.0 }
 0x2db   : > { %v2452_v7 = vmax.f32 %v4001_v59, 0.0 }
 0x2dc   : > { %v2478_v26 = vpack.c.bf16 %v2451_v2, %v2448_v18 }
 0x2dd   : > { %v2479_v29 = vpack.c.bf16 %v2452_v7, %v2449_v24  ;;  %v2015_v17 = vpop.f32.mrb[28].mxu0 }
 0x2de   : > { %v4002_v4 = vadd.f32 %v2015_v17, %v5482_v43  ;;  %v2017_v27 = vpop.f32.mrb[29].mxu0 }
 0x2df   : > { %v4003_v21 = vadd.f32 %v2017_v27, %v5485_v51  ;;  %v2019_v28 = vpop.f32.mrb[30].mxu0  ;;  %2763 = vmatprep.mubr.bf16.mxu1 %v2479_v29 }
 0x2e0   : > { %v4004_v30 = vadd.f32 %v2019_v28, %v5482_v43  ;;  %v2021_v61 = vpop.f32.mrb[31].mxu0  ;;  %2764 = vmatmul.mubr.bf16.gmra.mrb[136].mxu1 %v2478_v26  ;;  %v2454_v35 = vmax.f32 %v4002_v4, 0.0  ;;  %v4444_v43 = vld [vmem:[#allocation11 + $0x18] sm:$0xff]  }
 0x2e1   : > { %v4005_v31 = vadd.f32 %v2021_v61, %v5485_v51  ;;  %v2455_v11 = vmax.f32 %v4003_v21, 0.0  ;;  %3948 = vmatprep.subr.bf16.mxu1 %v4444_v43  ;;  %v4445_v51 = vld [vmem:[#allocation11 + $0x20] sm:$0xff]  }
 0x2e2   : > { %v2457_v36 = vmax.f32 %v4004_v30, 0.0  ;;  %3949 = vmatpush3.bf16.msra.mxu1 %v4444_v43 }
 0x2e3   : > { %v2458_v38 = vmax.f32 %v4005_v31, 0.0  ;;  %3950 = vmatprep.subr.bf16.mxu1 %v4445_v51 }
 0x2e4   : > { %v2481_v39 = vpack.c.bf16 %v2457_v36, %v2454_v35 }
 0x2e5   : > { %v2482_v52 = vpack.c.bf16 %v2458_v38, %v2455_v11 }
 0x2e6   : > { %3951 = vmatpush3.bf16.msra.mxu1 %v4445_v51 }
 0x2e7   : > { %2771 = vmatprep.mubr.bf16.mxu1 %v2482_v52  ;;  %3952 = vmatprep.subr.bf16.mxu1 %v4446_v57 }
 0x2e8   : > { %2772 = vmatmul.mubr.bf16.gmra.mrb[140].mxu1 %v2481_v39 }
 0x2ea   : > { %3953 = vmatpush3.bf16.msra.mxu1 %v4446_v57 }
 0x2eb   : > { %3954 = vmatprep.subr.bf16.mxu1 %v4447_v44 }
 0x2ee   : > { %3955 = vmatpush3.bf16.msra.mxu1 %v4447_v44 }
 0x2ef   : > { %3956 = vmatprep.subr.bf16.mxu1 %v4448_v37 }
 0x2f2   : > { %3957 = vmatpush3.bf16.msra.mxu1 %v4448_v37 }
 0x364   : > { %v3928_v47 = vpop.f32.mrb[32].mxu0 }
 0x365   : > { %v2814_v48 = vpop.f32.mrb[33].mxu0 }
 0x366   : > { %v3929_v55 = vpop.f32.mrb[34].mxu0 }
 0x367   : > { %v2817_v53 = vpop.f32.mrb[35].mxu0 }
 0x36c   : > { %v3932_v20 = vpop.f32.mrb[36].mxu0 }
 0x36d   : > { %v2830_v41 = vpop.f32.mrb[37].mxu0 }
 0x36e   : > { %v3933_v6 = vpop.f32.mrb[38].mxu0 }
 0x36f   : > { %v2833_v50 = vpop.f32.mrb[39].mxu0 }
 0x374   : > { %v5519_v23 = vpop.f32.mrb[40].mxu0 }
 0x375   : > { %v5521_v54 = vpop.f32.mrb[41].mxu0 }
 0x376   : > { %v5523_v58 = vpop.f32.mrb[42].mxu0 }
 0x377   : > { %v5525_v9 = vpop.f32.mrb[43].mxu0 }
 0x37c   : > { %v5527_v60 = vpop.f32.mrb[44].mxu0 }
 0x37d   : > { %v5529_v19 = vpop.f32.mrb[45].mxu0 }
 0x37e   : > { %v5531_v46 = vpop.f32.mrb[46].mxu0 }
 0x37f   : > { %v5533_v63 = vpop.f32.mrb[47].mxu0 }
 0x383   : > { %v3812_v32 = vpop.f32.mrb[112].mxu1 }
 0x384   : > { %v3813_v56 = vpop.f32.mrb[113].mxu1 }
 0x385   : > { %v3814_v1 = vadd.f32 %v3813_v56, %v3812_v32  ;;  %v3815_v5 = vpop.f32.mrb[114].mxu1 }
 0x386   : > { %v3816_v8 = vpop.f32.mrb[115].mxu1 }
 0x387   : > { %v2718_v62 = vadd.f32 %v3814_v1, %v5535_v33  ;;  %v3817_v22 = vadd.f32 %v3816_v8, %v3815_v5 }
 0x389   : > { %v2815_v10 = vadd.f32 %v2814_v48, %v2718_v62  ;;  %v2721_v12 = vadd.f32 %v3817_v22, %v5535_v33 }
 0x38b   : > { %v2818_v42 = vadd.f32 %v2817_v53, %v2721_v12  ;;  %v3818_v25 = vpop.f32.mrb[116].mxu1  ;;  %v2877_v0 = vmax.f32 %v2815_v10, 0.0 }
 0x38c   : > { %v3819_v45 = vpop.f32.mrb[117].mxu1 }
 0x38d   : > { %v2878_v13 = vmax.f32 %v2818_v42, 0.0  ;;  %v3820_v49 = vadd.f32 %v3819_v45, %v3818_v25  ;;  %v3821_v3 = vpop.f32.mrb[118].mxu1 }
 0x38e   : > { %v3822_v15 = vpop.f32.mrb[119].mxu1 }
 0x38f   : > { %v2726_v16 = vadd.f32 %v3820_v49, %v5535_v33  ;;  %v3823_v59 = vadd.f32 %v3822_v15, %v3821_v3  ;;  %v2893_v18 = vpack.c.bf16 %v2878_v13, %v2877_v0 }
 0x391   : > { %v2823_v2 = vadd.f32 %v3928_v47, %v2726_v16  ;;  %v2729_v24 = vadd.f32 %v3823_v59, %v5535_v33  ;;  %3958 = vmatprep.mubr.bf16.mxu1 %v2893_v18 }
 0x393   : > { %v2826_v7 = vadd.f32 %v3929_v55, %v2729_v24  ;;  %v3824_v26 = vpop.f32.mrb[120].mxu1  ;;  %v2879_v17 = vmax.f32 %v2823_v2, 0.0 }
 0x394   : > { %v3825_v29 = vpop.f32.mrb[121].mxu1 }
 0x395   : > { %v2880_v4 = vmax.f32 %v2826_v7, 0.0  ;;  %v3826_v27 = vadd.f32 %v3825_v29, %v3824_v26  ;;  %v3827_v21 = vpop.f32.mrb[122].mxu1 }
 0x396   : > { %v3828_v28 = vpop.f32.mrb[123].mxu1 }
 0x397   : > { %v2894_v30 = vpack.c.bf16 %v2880_v4, %v2879_v17  ;;  %v2734_v61 = vadd.f32 %v3826_v27, %v5535_v33  ;;  %v3829_v31 = vadd.f32 %v3828_v28, %v3827_v21 }
 0x399   : > { %v2831_v35 = vadd.f32 %v2830_v41, %v2734_v61  ;;  %v2737_v36 = vadd.f32 %v3829_v31, %v5535_v33  ;;  %3959 = vmatmul.mubr.bf16.vlgmr.msra.gmra.mrb[144].mxu1 %v2894_v30 }
 0x39b   : > { %v2834_v11 = vadd.f32 %v2833_v50, %v2737_v36  ;;  %v3830_v38 = vpop.f32.mrb[124].mxu1  ;;  %v2881_v52 = vmax.f32 %v2831_v35, 0.0 }
 0x39c   : > { %v3831_v39 = vpop.f32.mrb[125].mxu1 }
 0x39d   : > { %v2882_v34 = vmax.f32 %v2834_v11, 0.0  ;;  %v3832_v40 = vadd.f32 %v3831_v39, %v3830_v38  ;;  %v3833_v14 = vpop.f32.mrb[126].mxu1 }
 0x39e   : > { %v3834_v43 = vpop.f32.mrb[127].mxu1 }
 0x39f   : > { %v2742_v51 = vadd.f32 %v3832_v40, %v5535_v33  ;;  %v3835_v57 = vadd.f32 %v3834_v43, %v3833_v14  ;;  %v2895_v44 = vpack.c.bf16 %v2882_v34, %v2881_v52 }
 0x3a1   : > { %v2839_v37 = vadd.f32 %v3932_v20, %v2742_v51  ;;  %v2745_v47 = vadd.f32 %v3835_v57, %v5535_v33  ;;  %3962 = vmatprep.mubr.bf16.mxu1 %v2895_v44  ;;  %v3501_v57 = vld [vmem:[#allocation13] ss:$0 sm:$0xff] }
 0x3a3   : > { %v2842_v48 = vadd.f32 %v3933_v6, %v2745_v47  ;;  %v3836_v55 = vpop.f32.mrb[128].mxu1  ;;  %v2883_v41 = vmax.f32 %v2839_v37, 0.0 }
 0x3a4   : > { %v3837_v53 = vpop.f32.mrb[129].mxu1 }
 0x3a5   : > { %v2884_v50 = vmax.f32 %v2842_v48, 0.0  ;;  %v3838_v32 = vadd.f32 %v3837_v53, %v3836_v55  ;;  %v3839_v56 = vpop.f32.mrb[130].mxu1 }
 0x3a6   : > { %v3840_v1 = vpop.f32.mrb[131].mxu1 }
 0x3a7   : > { %v2750_v5 = vadd.f32 %v3838_v32, %v5535_v33  ;;  %v3841_v8 = vadd.f32 %v3840_v1, %v3839_v56  ;;  %v2896_v62 = vpack.c.bf16 %v2884_v50, %v2883_v41 }
 0x3a9   : > { %v2847_v22 = vadd.f32 %v5521_v54, %v2750_v5  ;;  %v2753_v10 = vadd.f32 %v3841_v8, %v5535_v33  ;;  %3963 = vmatmul.mubr.bf16.gmra.mrb[148].mxu1 %v2896_v62 }
 0x3ab   : > { %v2850_v20 = vadd.f32 %v5525_v9, %v2753_v10  ;;  %v3842_v12 = vpop.f32.mrb[132].mxu1  ;;  %v2885_v42 = vmax.f32 %v2847_v22, 0.0 }
 0x3ac   : > { %v3843_v6 = vpop.f32.mrb[133].mxu1 }
 0x3ad   : > { %v2886_v25 = vmax.f32 %v2850_v20, 0.0  ;;  %v3844_v45 = vadd.f32 %v3843_v6, %v3842_v12  ;;  %v3845_v0 = vpop.f32.mrb[134].mxu1 }
 0x3ae   : > { %v3846_v13 = vpop.f32.mrb[135].mxu1 }
 0x3af   : > { %v2758_v49 = vadd.f32 %v3844_v45, %v5535_v33  ;;  %v3847_v3 = vadd.f32 %v3846_v13, %v3845_v0  ;;  %v2897_v15 = vpack.c.bf16 %v2886_v25, %v2885_v42 }
 0x3b1   : > { %v2855_v16 = vadd.f32 %v5519_v23, %v2758_v49  ;;  %v2761_v54 = vadd.f32 %v3847_v3, %v5535_v33  ;;  %3966 = vmatprep.mubr.bf16.mxu1 %v2897_v15 }
 0x3b3   : > { %v2858_v59 = vadd.f32 %v5523_v58, %v2761_v54  ;;  %v3848_v18 = vpop.f32.mrb[136].mxu1  ;;  %v2887_v2 = vmax.f32 %v2855_v16, 0.0 }
 0x3b4   : > { %v3849_v9 = vpop.f32.mrb[137].mxu1 }
 0x3b5   : > { %v2888_v24 = vmax.f32 %v2858_v59, 0.0  ;;  %v3850_v7 = vadd.f32 %v3849_v9, %v3848_v18  ;;  %v3851_v26 = vpop.f32.mrb[138].mxu1 }
 0x3b6   : > { %v3852_v29 = vpop.f32.mrb[139].mxu1 }
 0x3b7   : > { %v2766_v17 = vadd.f32 %v3850_v7, %v5535_v33  ;;  %v3853_v4 = vadd.f32 %v3852_v29, %v3851_v26  ;;  %v2898_v27 = vpack.c.bf16 %v2888_v24, %v2887_v2 }
 0x3b9   : > { %v2863_v21 = vadd.f32 %v5529_v19, %v2766_v17  ;;  %v2769_v23 = vadd.f32 %v3853_v4, %v5535_v33  ;;  %3967 = vmatmul.mubr.bf16.gmra.mrb[152].mxu1 %v2898_v27 }
 0x3bb   : > { %v2866_v28 = vadd.f32 %v5533_v63, %v2769_v23  ;;  %v3854_v30 = vpop.f32.mrb[140].mxu1  ;;  %v2889_v61 = vmax.f32 %v2863_v21, 0.0 }
 0x3bc   : > { %v3855_v58 = vpop.f32.mrb[141].mxu1 }
 0x3bd   : > { %v2890_v31 = vmax.f32 %v2866_v28, 0.0  ;;  %v3856_v35 = vadd.f32 %v3855_v58, %v3854_v30  ;;  %v3857_v36 = vpop.f32.mrb[142].mxu1 }
 0x3be   : > { %v3858_v11 = vpop.f32.mrb[143].mxu1 }
 0x3bf   : > { %v2774_v38 = vadd.f32 %v3856_v35, %v5535_v33  ;;  %v3859_v39 = vadd.f32 %v3858_v11, %v3857_v36  ;;  %v2899_v52 = vpack.c.bf16 %v2890_v31, %v2889_v61 }
 0x3c1   : > { %v2871_v34 = vadd.f32 %v5527_v60, %v2774_v38  ;;  %v2777_v19 = vadd.f32 %v3859_v39, %v5535_v33  ;;  %3970 = vmatprep.mubr.bf16.mxu1 %v2899_v52 }
 0x3c3   : > { %v2874_v40 = vadd.f32 %v5531_v46, %v2777_v19  ;;  %v2891_v63 = vmax.f32 %v2871_v34, 0.0 }
 0x3c5   : > { %v2892_v14 = vmax.f32 %v2874_v40, 0.0 }
 0x3c7   : > { %v2900_v43 = vpack.c.bf16 %v2892_v14, %v2891_v63 }
 0x3c9   : > { %3971 = vmatmul.mubr.bf16.gmra.mrb[156].mxu1 %v2900_v43 }
 0x46c   : > { %v3960_v51 = vpop.f32.mrb[144].mxu1 }
 0x46d   : > { %v3006_v44 = vpop.f32.mrb[145].mxu1  ;;  %v3015_v47 = vadd.f32 %v3960_v51, %v3501_v57 }
 0x46e   : > { %v3961_v37 = vpop.f32.mrb[146].mxu1  ;;  %v3007_v53 = vadd.f32 %v3501_v57, %v3006_v44 }
 0x46f   : > { %v3018_v48 = vadd.f32 %v3961_v37, %v3501_v57  ;;  %v3009_v55 = vpop.f32.mrb[147].mxu1 }
 0x470   : > { %v3010_v41 = vadd.f32 %v3501_v57, %v3009_v55 }
 0x471   : > { %v3556_v60 = vpack.c.bf16 %v3018_v48, %v3015_v47 }
 0x472   : > { %v3551_v50 = vpack.c.bf16 %v3010_v41, %v3007_v53 }
 0x473   : > { %3588 = vst [vmem:[%s5562_s29 + $0x8] sm:$0xff] %v3556_v60  }
 0x474   : > { %3552 = vst [vmem:[%s5562_s29] sm:$0xff] %v3551_v50  }
 0x47c   : > { %v3964_v46 = vpop.f32.mrb[148].mxu1 }
 0x47d   : > { %v3022_v33 = vpop.f32.mrb[149].mxu1  ;;  %v3031_v56 = vadd.f32 %v3964_v46, %v3501_v57 }
 0x47e   : > { %v3965_v32 = vpop.f32.mrb[150].mxu1  ;;  %v3023_v8 = vadd.f32 %v3501_v57, %v3022_v33 }
 0x47f   : > { %v3034_v1 = vadd.f32 %v3965_v32, %v3501_v57  ;;  %v3025_v5 = vpop.f32.mrb[151].mxu1 }
 0x480   : > { %v3026_v62 = vadd.f32 %v3501_v57, %v3025_v5 }
 0x481   : > { %v3566_v22 = vpack.c.bf16 %v3034_v1, %v3031_v56 }
 0x482   : > { %v3561_v10 = vpack.c.bf16 %v3026_v62, %v3023_v8 }
 0x483   : > { %3590 = vst [vmem:[%s5562_s29 + $0x18] sm:$0xff] %v3566_v22  }
 0x484   : > { %3589 = vst [vmem:[%s5562_s29 + $0x10] sm:$0xff] %v3561_v10  }
 0x48c   : > { %v3968_v20 = vpop.f32.mrb[152].mxu1 }
 0x48d   : > { %v3038_v12 = vpop.f32.mrb[153].mxu1  ;;  %v3047_v42 = vadd.f32 %v3968_v20, %v3501_v57 }
 0x48e   : > { %v3969_v6 = vpop.f32.mrb[154].mxu1  ;;  %v3039_v0 = vadd.f32 %v3501_v57, %v3038_v12 }
 0x48f   : > { %v3050_v25 = vadd.f32 %v3969_v6, %v3501_v57  ;;  %v3041_v45 = vpop.f32.mrb[155].mxu1 }
 0x490   : > { %v3042_v13 = vadd.f32 %v3501_v57, %v3041_v45 }
 0x491   : > { %v3576_v49 = vpack.c.bf16 %v3050_v25, %v3047_v42 }
 0x492   : > { %v3571_v3 = vpack.c.bf16 %v3042_v13, %v3039_v0 }
 0x493   : > { %3592 = vst [vmem:[%s5562_s29 + $0x28] sm:$0xff] %v3576_v49  }
 0x494   : > { %3591 = vst [vmem:[%s5562_s29 + $0x20] sm:$0xff] %v3571_v3  }
 0x49c   : > { %v3972_v15 = vpop.f32.mrb[156].mxu1 }
 0x49d   : > { %v3054_v16 = vpop.f32.mrb[157].mxu1  ;;  %v3063_v59 = vadd.f32 %v3972_v15, %v3501_v57 }
 0x49e   : > { %v3973_v54 = vpop.f32.mrb[158].mxu1  ;;  %v3055_v2 = vadd.f32 %v3501_v57, %v3054_v16 }
 0x49f   : > { %v3066_v18 = vadd.f32 %v3973_v54, %v3501_v57  ;;  %v3057_v9 = vpop.f32.mrb[159].mxu1 }
 0x4a0   : > { %v3058_v24 = vadd.f32 %v3501_v57, %v3057_v9 }
 0x4a1   : > { %v3586_v7 = vpack.c.bf16 %v3066_v18, %v3063_v59 }
 0x4a2   : > { %v3581_v26 = vpack.c.bf16 %v3058_v24, %v3055_v2 }
 0x4a3   : > { %3594 = vst [vmem:[%s5562_s29 + $0x38] sm:$0xff] %v3586_v7  }
 0x4a4   : > { %3593 = vst [vmem:[%s5562_s29 + $0x30] sm:$0xff] %v3581_v26  }
 0x4a5   : > { %4660 = shalt.err (!%p4657_p8)
}
 0x4a6   : > { %s4661_s18 = scalar_lea.hbm %s5577_s15, 1024  ;;  %s4665_s8 = scalar_lea.hbm %s5630_s7, 2048 }
 0x4a7   : > { %p4662_p7 = scmp.ne.s32.totalorder %s5577_s15, %s4661_s18  ;;  %p4666_p3 = scmp.lt.u32.totalorder %s5577_s15, %s5630_s7 }
 0x4a8   : > { %p4667_p6 = scmp.lt.u32.totalorder %s4665_s8, %s4661_s18  ;;  %p4669_p0 = scmp.lt.u32.totalorder %s4661_s18, %s5577_s15 }
 0x4a9   : > { %p4663_p9 = pnand %p4662_p7, %p5651_p5 }
 0x4aa   : > { %p4668_p2 = por %p4667_p6, %p4666_p3 }
 0x4ab   : > { %p4664_p4 = pneg %p4663_p9 }
 0x4ac   : > { %p4670_p10 = por %p4669_p0, %p4668_p2 }
 0x4ae   : > { %p4671_p1 = pnand %p4670_p10, %p4664_p4 }
 0x4b0   : > { %4674 = shalt.err (!%p4671_p1)
}
 0x4b1   : > { %s4742_s9 = smov 64   ;;  %s4743_s19 = smov 4  }
 0x4b2   : > { %4131 = dma.vmem_to_hbm [thread:$0]  (%p5651_p5), %s5572_s17, 1024, %s5577_s15, %s3150_s30, %s4742_s9, %s4742_s9, %s4743_s19  }
 0x4b3 PF: > { %s3178_s21 = sand.u32 1, %s4713_s24   ;;  %p5652_p11 = scmp.ne.s32.totalorder %s5642_s12, 0 }
 0x4b4   : > { %p5653_p12 = scmp.ge.s32.totalorder %s4725_s27, 2  ;;  %s3179_s1 = scalar_lea.sflag [#allocation4], %s3178_s21 }
 0x4b6   : > { %p4157_p13 = pnand %p5653_p12, %p5652_p11 }
 0x4b8   : > { %4708 = dma.done.wait (!%p4157_p13), %s3179_s1, 1024  }
 0x4b9   : > { %4710 = vsyncadd (!%p4157_p13), %s3179_s1, 4294966272  ;;  %p23_p8 = scmp.ge.s32.totalorder %s4956_s11, 4   ;;  %s5654_s24 = smov %s4717_s25 }
 0x4ba   : > { %s5655_s25 = smov %s4721_s26  ;;  %s5656_s26 = smov %s4967_s22 }
 0x4bb   : > { %s5657_s27 = smov %s4956_s11  ;;  %25 = sbr.rel (!%p23_p8) target bundleno = 10 (0xa), region = 117 }
 0x4c2   :  { %3184 = vsyncpa [#allocation3], 1 }
 0x4c3   :  { %3186 = vsyncpa [#allocation3 + $0x1], 1 }
 0x4c4   :  { %3187 = vsyncpa [#allocation6], 1 }
 0x4c5   :  { %3188 = vsyncpa [#allocation9], 1 }
 0x4c6   :  { %3189 = vsyncpa [#allocation12], 1 }
 0x4c7   :  { %3190 = vsyncpa [#allocation4], 1 }
 0x4c8   :  { %3192 = vsyncpa [#allocation4 + $0x1], 1 }

</bundles_post_ra>
